<compile_context>
chip_gen: v5e
topology: v5e:2x2
jax: 0.10.0
libtpu: 0.0.40
codegen_flags: <defaults>
</compile_context>

<pallas_src>
import functools

import jax
import jax.numpy as jnp
from jax.experimental import pallas as pl
from jax.experimental.pallas import tpu as pltpu


def _round_up(x, m):
    return (x + m - 1) // m * m


# ----------------------------- Pallas kernel ------------------------------ #
def _gemm_bias_act_kernel(x_ref, w_ref, b_ref, o_ref, *, act):
    acc = jnp.dot(x_ref[...], w_ref[...], preferred_element_type=jnp.float32)
    acc = acc + b_ref[...]                        # (1, N) broadcast over rows
    if act == "relu":
        acc = jnp.maximum(acc, 0.0)
    elif act == "sigmoid":
        acc = jax.nn.sigmoid(acc)
    o_ref[...] = acc.astype(o_ref.dtype)


def _m_tiling(M):
    """Pick the M tile: one full-dim block for tiny M, else >=2 equal
    8-aligned tiles (capped near 512 rows) so v7x's two TCs both get work."""
    if M <= 256:
        return M, 1, M                   # tm, grid steps, (possibly padded) M
    steps = max(2, pl.cdiv(M, 512))
    Mp = _round_up(M, 8 * steps)
    return Mp // steps, steps, Mp


def matmul_bias_act(x, w, b, act):
    """Fused (M,K)@(K,N) + bias + activation Pallas TPU kernel.

    bf16 operands, f32 accumulation, bf16 output. K and N are never padded in
    HBM; only M is tiled (padded by at most a few rows when not 8*steps
    aligned, which is negligible)."""
    M, K = x.shape
    K2, N = w.shape
    assert K == K2
    x = x.astype(jnp.bfloat16)
    w = w.astype(jnp.bfloat16)
    b = b.astype(jnp.float32).reshape(1, N)

    tm, steps, Mp = _m_tiling(M)
    if Mp != M:
        x = jnp.pad(x, ((0, Mp - M), (0, 0)))

    out = pl.pallas_call(
        functools.partial(_gemm_bias_act_kernel, act=act),
        out_shape=jax.ShapeDtypeStruct((Mp, N), jnp.bfloat16),
        grid=(steps,),
        in_specs=[
            pl.BlockSpec((tm, K), lambda i: (i, 0)),   # LHS: tile M only
            pl.BlockSpec((K, N), lambda i: (0, 0)),    # RHS: full weight
            pl.BlockSpec((1, N), lambda i: (0, 0)),    # bias
        ],
        out_specs=pl.BlockSpec((tm, N), lambda i: (i, 0)),
        compiler_params=pltpu.CompilerParams(
            dimension_semantics=("parallel",)),
    )(x, w, b)
    return out[:M] if Mp != M else out


def _matmul_bias_act_ref(x, w, b, act):
    """Pure-jnp reference with matching bf16-operand / f32-accum numerics."""
    y = jnp.dot(x.astype(jnp.bfloat16), w.astype(jnp.bfloat16),
                preferred_element_type=jnp.float32)
    y = y + b.astype(jnp.float32)[None, :]
    if act == "relu":
        y = jnp.maximum(y, 0.0)
    elif act == "sigmoid":
        y = jax.nn.sigmoid(y)
    return y.astype(jnp.bfloat16)


# ------------------------------ conv lowering ------------------------------ #
def _im2col(x, k, stride, pad):
    """x: (N,H,W,C) -> patches (N,Ho,Wo,k*k*C), ordered (kh, kw, cin)."""
    N, H, W, C = x.shape
    xp = jnp.pad(x, ((0, 0), (pad, pad), (pad, pad), (0, 0)))
    Hp, Wp = H + 2 * pad, W + 2 * pad
    Ho = (Hp - k) // stride + 1
    Wo = (Wp - k) // stride + 1
    cols = []
    for di in range(k):
        for dj in range(k):
            cols.append(xp[:, di:di + (Ho - 1) * stride + 1:stride,
                           dj:dj + (Wo - 1) * stride + 1:stride, :])
    patches = jnp.stack(cols, axis=3)              # (N, Ho, Wo, k*k, C)
    return patches.reshape(N, Ho, Wo, k * k * C), Ho, Wo


def conv2d_gemm(x, w_mat, b, k, stride, pad, act, matmul_fn):
    """x: (N,H,W,Cin) NHWC; w_mat: (k*k*Cin, Cout) pre-laid-out GEMM weight."""
    patches, Ho, Wo = _im2col(x, k, stride, pad)
    Nb = x.shape[0]
    Cout = w_mat.shape[1]
    y = matmul_fn(patches.reshape(Nb * Ho * Wo, -1), w_mat, b, act)
    return y.reshape(Nb, Ho, Wo, Cout)


def conv_transpose2d_gemm(x, w_mat, b, k, stride, pad, out_pad, act, matmul_fn):
    """PyTorch ConvTranspose2d = dilate-by-stride, pad by (k-1-pad)
    (+output_padding on the high side), then a stride-1 conv with the
    pre-flipped / channel-swapped GEMM weight (built in prepare_params)."""
    N, H, W, C = x.shape
    if stride > 1:
        xd = jnp.zeros((N, (H - 1) * stride + 1, (W - 1) * stride + 1, C),
                       x.dtype)
        xd = xd.at[:, ::stride, ::stride, :].set(x)
    else:
        xd = x
    lo = k - 1 - pad
    hi = k - 1 - pad + out_pad
    xpad = jnp.pad(xd, ((0, 0), (lo, hi), (lo, hi), (0, 0)))
    return conv2d_gemm(xpad, w_mat, b, k, 1, 0, act, matmul_fn)


# ------------------------------- model setup ------------------------------- #
def init_params(key):
    """Deterministic init mirroring the PyTorch module's parameter shapes."""
    def u(key, shape, fan_in):
        bound = 1.0 / jnp.sqrt(jnp.float32(fan_in))
        return jax.random.uniform(key, shape, jnp.float32, -bound, bound)

    ks = jax.random.split(key, 12)
    p = {}
    # encoder (Conv2d weights: OIHW)
    p["e1_w"] = u(ks[0], (16, 1, 3, 3), 1 * 3 * 3)
    p["e1_b"] = u(ks[1], (16,), 1 * 3 * 3)
    p["e2_w"] = u(ks[2], (32, 16, 3, 3), 16 * 3 * 3)
    p["e2_b"] = u(ks[3], (32,), 16 * 3 * 3)
    p["e3_w"] = u(ks[4], (64, 32, 7, 7), 32 * 7 * 7)
    p["e3_b"] = u(ks[5], (64,), 32 * 7 * 7)
    # decoder (ConvTranspose2d weights: IOHW = (Cin, Cout, k, k))
    p["d1_w"] = u(ks[6], (64, 32, 7, 7), 32 * 7 * 7)
    p["d1_b"] = u(ks[7], (32,), 32 * 7 * 7)
    p["d2_w"] = u(ks[8], (32, 16, 3, 3), 16 * 3 * 3)
    p["d2_b"] = u(ks[9], (16,), 16 * 3 * 3)
    p["d3_w"] = u(ks[10], (16, 1, 3, 3), 1 * 3 * 3)
    p["d3_b"] = u(ks[11], (1,), 1 * 3 * 3)
    return p


def prepare_params(p):
    """One-time relayout of PyTorch-layout params into GEMM-ready matrices
    (done once at init time, NOT per forward call)."""
    def conv_mat(w):       # Conv2d (Cout,Cin,k,k) -> (k*k*Cin, Cout)
        Cout, Cin, k, _ = w.shape
        return jnp.transpose(w, (2, 3, 1, 0)).reshape(k * k * Cin, Cout)

    def convT_mat(w):      # ConvT (Cin,Cout,k,k) -> stride-1-conv GEMM matrix
        Cin, Cout, k, _ = w.shape
        wf = jnp.flip(w, axis=(2, 3))
        return jnp.transpose(wf, (2, 3, 0, 1)).reshape(k * k * Cin, Cout)

    g = {}
    g["e1_w"] = conv_mat(p["e1_w"]).astype(jnp.bfloat16)
    g["e1_b"] = p["e1_b"]
    g["e2_w"] = conv_mat(p["e2_w"]).astype(jnp.bfloat16)
    g["e2_b"] = p["e2_b"]
    g["e3_w"] = conv_mat(p["e3_w"]).astype(jnp.bfloat16)
    g["e3_b"] = p["e3_b"]
    # d1 (ConvT 64->32, k=7, 1x1 input) as a direct GEMM:
    #   out[n, i, j, cout] = sum_cin x[n, cin] * w[cin, cout, i, j] + b[cout]
    w = p["d1_w"]                                   # (64, 32, 7, 7)
    Cin, Cout, k, _ = w.shape
    g["d1_w"] = (jnp.transpose(w, (0, 2, 3, 1))     # (Cin, kh, kw, Cout)
                 .reshape(Cin, k * k * Cout).astype(jnp.bfloat16))
    g["d1_b"] = jnp.broadcast_to(p["d1_b"], (k * k, Cout)).reshape(-1)
    g["d2_w"] = convT_mat(p["d2_w"]).astype(jnp.bfloat16)
    g["d2_b"] = p["d2_b"]
    g["d3_w"] = convT_mat(p["d3_w"]).astype(jnp.bfloat16)
    g["d3_b"] = p["d3_b"]
    return g


def autoencoder_forward(x_nchw, gp, matmul_fn=matmul_bias_act):
    """Forward pass of the PyTorch Autoencoder. Input/output are NCHW f32."""
    x = jnp.transpose(x_nchw, (0, 2, 3, 1)).astype(jnp.bfloat16)  # -> NHWC
    # encoder: Conv(1->16,3,s2,p1)+ReLU, Conv(16->32,3,s2,p1)+ReLU, Conv(32->64,7)
    x = conv2d_gemm(x, gp["e1_w"], gp["e1_b"], 3, 2, 1, "relu", matmul_fn)
    x = conv2d_gemm(x, gp["e2_w"], gp["e2_b"], 3, 2, 1, "relu", matmul_fn)
    x = conv2d_gemm(x, gp["e3_w"], gp["e3_b"], 7, 1, 0, "none", matmul_fn)
    # decoder
    # d1: ConvT(64->32, k=7) on a 1x1 map is exactly one GEMM
    #     (B,64)@(64, 7*7*32) -> (B,7,7,32); no dilate/pad/im2col needed.
    Nb, H, W, C = x.shape
    assert H == 1 and W == 1, "28x28 input implies a 1x1 bottleneck"
    y = matmul_fn(x.reshape(Nb, C), gp["d1_w"], gp["d1_b"], "relu")
    x = y.reshape(Nb, 7, 7, 32)
    # d2/d3: ConvT(.,3,s2,p1,op1) + ReLU / Sigmoid
    x = conv_transpose2d_gemm(x, gp["d2_w"], gp["d2_b"], 3, 2, 1, 1, "relu",
                              matmul_fn)
    x = conv_transpose2d_gemm(x, gp["d3_w"], gp["d3_b"], 3, 2, 1, 1, "sigmoid",
                              matmul_fn)
    return jnp.transpose(x, (0, 3, 1, 2)).astype(jnp.float32)  # -> NCHW


if __name__ == "__main__":
    key = jax.random.PRNGKey(0)
    pkey, xkey = jax.random.split(key)
    params = init_params(pkey)
    gparams = prepare_params(params)     # one-time GEMM relayout + bf16 cast

    # MNIST-like input implied by the module: 1 channel, 28x28
    x = jax.random.uniform(xkey, (2, 1, 28, 28), jnp.float32)

    fwd_pallas = jax.jit(
        functools.partial(autoencoder_forward, matmul_fn=matmul_bias_act))
    fwd_ref = jax.jit(
        functools.partial(autoencoder_forward, matmul_fn=_matmul_bias_act_ref))

    out = jax.block_until_ready(fwd_pallas(x, gparams))
    ref = jax.block_until_ready(fwd_ref(x, gparams))

    assert out.shape == (2, 1, 28, 28), out.shape
    assert bool(jnp.all(jnp.isfinite(out)))
    assert bool(jnp.all((out >= 0.0) & (out <= 1.0)))  # sigmoid output range
    # bf16 GEMM operands -> bf16-level tolerance vs. the pure-jnp reference.
    assert bool(jnp.allclose(out, ref, atol=2e-2, rtol=2e-2))

    print("KERNEL_OK")
</pallas_src>

<mosaic_0001>
module attributes {stable_mosaic.version = 11 : i64} {
  func.func @_gemm_bias_act_kernel(%arg0: i32, %arg1: memref<200x9xbf16, #tpu.memory_space<vmem>>, %arg2: memref<9x16xbf16, #tpu.memory_space<vmem>>, %arg3: memref<1x16xf32, #tpu.memory_space<vmem>>, %arg4: memref<200x16xbf16, #tpu.memory_space<vmem>>) attributes {dimension_semantics = [#tpu.dimension_semantics<parallel>], iteration_bounds = array<i64: 2>, scalar_prefetch = 0 : i64, scratch_operands = 0 : i64, tpu.core_type = #tpu.core_type<tc>, window_params = [{transform_indices = @transform_0, window_bounds = array<i64: 200, 9>}, {pipeline_mode = #tpu.pipeline_mode<synchronous>, transform_indices = @transform_1, window_bounds = array<i64: 9, 16>}, {pipeline_mode = #tpu.pipeline_mode<synchronous>, transform_indices = @transform_2, window_bounds = array<i64: 1, 16>}, {transform_indices = @transform_3, window_bounds = array<i64: 200, 16>}]} {
    %c0 = arith.constant 0 : index
    %c0_0 = arith.constant 0 : index
    %0 = vector.load %arg1[%c0, %c0_0] : memref<200x9xbf16, #tpu.memory_space<vmem>>, vector<200x9xbf16>
    %c0_1 = arith.constant 0 : index
    %c0_2 = arith.constant 0 : index
    %1 = vector.load %arg2[%c0_1, %c0_2] : memref<9x16xbf16, #tpu.memory_space<vmem>>, vector<9x16xbf16>
    %cst = arith.constant dense<0.000000e+00> : vector<200x16xf32>
    %2 = tpu.matmul %0, %1, %cst {dimension_numbers = #tpu.dot_dimension_numbers<[1], [0], [0], [1], [0, 0, 1, 1], [], []>} : vector<200x9xbf16>, vector<9x16xbf16>, vector<200x16xf32> -> vector<200x16xf32>
    %c0_3 = arith.constant 0 : index
    %c0_4 = arith.constant 0 : index
    %3 = vector.load %arg3[%c0_3, %c0_4] : memref<1x16xf32, #tpu.memory_space<vmem>>, vector<1x16xf32>
    %4 = vector.broadcast %3 : vector<1x16xf32> to vector<200x16xf32>
    %5 = arith.addf %2, %4 : vector<200x16xf32>
    %cst_5 = arith.constant 0.000000e+00 : f32
    %6 = vector.broadcast %cst_5 : f32 to vector<200x16xf32>
    %7 = arith.maximumf %5, %6 : vector<200x16xf32>
    %8 = arith.truncf %7 : vector<200x16xf32> to vector<200x16xbf16>
    %c0_6 = arith.constant 0 : index
    %c0_7 = arith.constant 0 : index
    %9 = vector.load %arg4[%c0_6, %c0_7] : memref<200x16xbf16, #tpu.memory_space<vmem>>, vector<200x16xbf16>
    tpu.vector_store %arg4[%c0_6, %c0_7], %8 {strides = array<i32>} : memref<200x16xbf16, #tpu.memory_space<vmem>>, vector<200x16xbf16>,
    return
  }
  func.func @transform_0(%arg0: i32) -> (i32, i32) {
    %c0_i32 = arith.constant 0 : i32
    %c0_i32_0 = arith.constant 0 : i32
    return %arg0, %c0_i32 : i32, i32
  }
  func.func @transform_1(%arg0: i32) -> (i32, i32) {
    %c0_i32 = arith.constant 0 : i32
    %c0_i32_0 = arith.constant 0 : i32
    %c0_i32_1 = arith.constant 0 : i32
    return %c0_i32, %c0_i32_0 : i32, i32
  }
  func.func @transform_2(%arg0: i32) -> (i32, i32) {
    %c0_i32 = arith.constant 0 : i32
    %c0_i32_0 = arith.constant 0 : i32
    %c0_i32_1 = arith.constant 0 : i32
    return %c0_i32, %c0_i32_0 : i32, i32
  }
  func.func @transform_3(%arg0: i32) -> (i32, i32) {
    %c0_i32 = arith.constant 0 : i32
    %c0_i32_0 = arith.constant 0 : i32
    return %arg0, %c0_i32 : i32, i32
  }
}

module attributes {stable_mosaic.version = 11 : i64} {
  func.func @_gemm_bias_act_kernel(%arg0: i32, %arg1: memref<98x144xbf16, #tpu.memory_space<vmem>>, %arg2: memref<144x32xbf16, #tpu.memory_space<vmem>>, %arg3: memref<1x32xf32, #tpu.memory_space<vmem>>, %arg4: memref<98x32xbf16, #tpu.memory_space<vmem>>) attributes {dimension_semantics = [#tpu.dimension_semantics<parallel>], iteration_bounds = array<i64: 1>, scalar_prefetch = 0 : i64, scratch_operands = 0 : i64, tpu.core_type = #tpu.core_type<tc>, window_params = [{transform_indices = @transform_0, window_bounds = array<i64: 98, 144>}, {pipeline_mode = #tpu.pipeline_mode<synchronous>, transform_indices = @transform_1, window_bounds = array<i64: 144, 32>}, {pipeline_mode = #tpu.pipeline_mode<synchronous>, transform_indices = @transform_2, window_bounds = array<i64: 1, 32>}, {transform_indices = @transform_3, window_bounds = array<i64: 98, 32>}]} {
    %c0 = arith.constant 0 : index
    %c0_0 = arith.constant 0 : index
    %0 = vector.load %arg1[%c0, %c0_0] : memref<98x144xbf16, #tpu.memory_space<vmem>>, vector<98x144xbf16>
    %c0_1 = arith.constant 0 : index
    %c0_2 = arith.constant 0 : index
    %1 = vector.load %arg2[%c0_1, %c0_2] : memref<144x32xbf16, #tpu.memory_space<vmem>>, vector<144x32xbf16>
    %cst = arith.constant dense<0.000000e+00> : vector<98x32xf32>
    %2 = tpu.matmul %0, %1, %cst {dimension_numbers = #tpu.dot_dimension_numbers<[1], [0], [0], [1], [0, 0, 1, 1], [], []>} : vector<98x144xbf16>, vector<144x32xbf16>, vector<98x32xf32> -> vector<98x32xf32>
    %c0_3 = arith.constant 0 : index
    %c0_4 = arith.constant 0 : index
    %3 = vector.load %arg3[%c0_3, %c0_4] : memref<1x32xf32, #tpu.memory_space<vmem>>, vector<1x32xf32>
    %4 = vector.broadcast %3 : vector<1x32xf32> to vector<98x32xf32>
    %5 = arith.addf %2, %4 : vector<98x32xf32>
    %cst_5 = arith.constant 0.000000e+00 : f32
    %6 = vector.broadcast %cst_5 : f32 to vector<98x32xf32>
    %7 = arith.maximumf %5, %6 : vector<98x32xf32>
    %8 = arith.truncf %7 : vector<98x32xf32> to vector<98x32xbf16>
    %c0_6 = arith.constant 0 : index
    %c0_7 = arith.constant 0 : index
    %9 = vector.load %arg4[%c0_6, %c0_7] : memref<98x32xbf16, #tpu.memory_space<vmem>>, vector<98x32xbf16>
    tpu.vector_store %arg4[%c0_6, %c0_7], %8 {strides = array<i32>} : memref<98x32xbf16, #tpu.memory_space<vmem>>, vector<98x32xbf16>,
    return
  }
  func.func @transform_0(%arg0: i32) -> (i32, i32) {
    %c0_i32 = arith.constant 0 : i32
    %c0_i32_0 = arith.constant 0 : i32
    return %arg0, %c0_i32 : i32, i32
  }
  func.func @transform_1(%arg0: i32) -> (i32, i32) {
    %c0_i32 = arith.constant 0 : i32
    %c0_i32_0 = arith.constant 0 : i32
    %c0_i32_1 = arith.constant 0 : i32
    return %c0_i32, %c0_i32_0 : i32, i32
  }
  func.func @transform_2(%arg0: i32) -> (i32, i32) {
    %c0_i32 = arith.constant 0 : i32
    %c0_i32_0 = arith.constant 0 : i32
    %c0_i32_1 = arith.constant 0 : i32
    return %c0_i32, %c0_i32_0 : i32, i32
  }
  func.func @transform_3(%arg0: i32) -> (i32, i32) {
    %c0_i32 = arith.constant 0 : i32
    %c0_i32_0 = arith.constant 0 : i32
    return %arg0, %c0_i32 : i32, i32
  }
}

module attributes {stable_mosaic.version = 11 : i64} {
  func.func @_gemm_bias_act_kernel(%arg0: i32, %arg1: memref<2x1568xbf16, #tpu.memory_space<vmem>>, %arg2: memref<1568x64xbf16, #tpu.memory_space<vmem>>, %arg3: memref<1x64xf32, #tpu.memory_space<vmem>>, %arg4: memref<2x64xbf16, #tpu.memory_space<vmem>>) attributes {dimension_semantics = [#tpu.dimension_semantics<parallel>], iteration_bounds = array<i64: 1>, scalar_prefetch = 0 : i64, scratch_operands = 0 : i64, tpu.core_type = #tpu.core_type<tc>, window_params = [{transform_indices = @transform_0, window_bounds = array<i64: 2, 1568>}, {pipeline_mode = #tpu.pipeline_mode<synchronous>, transform_indices = @transform_1, window_bounds = array<i64: 1568, 64>}, {pipeline_mode = #tpu.pipeline_mode<synchronous>, transform_indices = @transform_2, window_bounds = array<i64: 1, 64>}, {transform_indices = @transform_3, window_bounds = array<i64: 2, 64>}]} {
    %c0 = arith.constant 0 : index
    %c0_0 = arith.constant 0 : index
    %0 = vector.load %arg1[%c0, %c0_0] : memref<2x1568xbf16, #tpu.memory_space<vmem>>, vector<2x1568xbf16>
    %c0_1 = arith.constant 0 : index
    %c0_2 = arith.constant 0 : index
    %1 = vector.load %arg2[%c0_1, %c0_2] : memref<1568x64xbf16, #tpu.memory_space<vmem>>, vector<1568x64xbf16>
    %cst = arith.constant dense<0.000000e+00> : vector<2x64xf32>
    %2 = tpu.matmul %0, %1, %cst {dimension_numbers = #tpu.dot_dimension_numbers<[1], [0], [0], [1], [0, 0, 1, 1], [], []>} : vector<2x1568xbf16>, vector<1568x64xbf16>, vector<2x64xf32> -> vector<2x64xf32>
    %c0_3 = arith.constant 0 : index
    %c0_4 = arith.constant 0 : index
    %3 = vector.load %arg3[%c0_3, %c0_4] : memref<1x64xf32, #tpu.memory_space<vmem>>, vector<1x64xf32>
    %4 = vector.broadcast %3 : vector<1x64xf32> to vector<2x64xf32>
    %5 = arith.addf %2, %4 : vector<2x64xf32>
    %6 = arith.truncf %5 : vector<2x64xf32> to vector<2x64xbf16>
    %c0_5 = arith.constant 0 : index
    %c0_6 = arith.constant 0 : index
    %7 = vector.load %arg4[%c0_5, %c0_6] : memref<2x64xbf16, #tpu.memory_space<vmem>>, vector<2x64xbf16>
    tpu.vector_store %arg4[%c0_5, %c0_6], %6 {strides = array<i32>} : memref<2x64xbf16, #tpu.memory_space<vmem>>, vector<2x64xbf16>,
    return
  }
  func.func @transform_0(%arg0: i32) -> (i32, i32) {
    %c0_i32 = arith.constant 0 : i32
    %c0_i32_0 = arith.constant 0 : i32
    return %arg0, %c0_i32 : i32, i32
  }
  func.func @transform_1(%arg0: i32) -> (i32, i32) {
    %c0_i32 = arith.constant 0 : i32
    %c0_i32_0 = arith.constant 0 : i32
    %c0_i32_1 = arith.constant 0 : i32
    return %c0_i32, %c0_i32_0 : i32, i32
  }
  func.func @transform_2(%arg0: i32) -> (i32, i32) {
    %c0_i32 = arith.constant 0 : i32
    %c0_i32_0 = arith.constant 0 : i32
    %c0_i32_1 = arith.constant 0 : i32
    return %c0_i32, %c0_i32_0 : i32, i32
  }
  func.func @transform_3(%arg0: i32) -> (i32, i32) {
    %c0_i32 = arith.constant 0 : i32
    %c0_i32_0 = arith.constant 0 : i32
    return %arg0, %c0_i32 : i32, i32
  }
}

module attributes {stable_mosaic.version = 11 : i64} {
  func.func @_gemm_bias_act_kernel(%arg0: i32, %arg1: memref<2x64xbf16, #tpu.memory_space<vmem>>, %arg2: memref<64x1568xbf16, #tpu.memory_space<vmem>>, %arg3: memref<1x1568xf32, #tpu.memory_space<vmem>>, %arg4: memref<2x1568xbf16, #tpu.memory_space<vmem>>) attributes {dimension_semantics = [#tpu.dimension_semantics<parallel>], iteration_bounds = array<i64: 1>, scalar_prefetch = 0 : i64, scratch_operands = 0 : i64, tpu.core_type = #tpu.core_type<tc>, window_params = [{transform_indices = @transform_0, window_bounds = array<i64: 2, 64>}, {pipeline_mode = #tpu.pipeline_mode<synchronous>, transform_indices = @transform_1, window_bounds = array<i64: 64, 1568>}, {pipeline_mode = #tpu.pipeline_mode<synchronous>, transform_indices = @transform_2, window_bounds = array<i64: 1, 1568>}, {transform_indices = @transform_3, window_bounds = array<i64: 2, 1568>}]} {
    %c0 = arith.constant 0 : index
    %c0_0 = arith.constant 0 : index
    %0 = vector.load %arg1[%c0, %c0_0] : memref<2x64xbf16, #tpu.memory_space<vmem>>, vector<2x64xbf16>
    %c0_1 = arith.constant 0 : index
    %c0_2 = arith.constant 0 : index
    %1 = vector.load %arg2[%c0_1, %c0_2] : memref<64x1568xbf16, #tpu.memory_space<vmem>>, vector<64x1568xbf16>
    %cst = arith.constant dense<0.000000e+00> : vector<2x1568xf32>
    %2 = tpu.matmul %0, %1, %cst {dimension_numbers = #tpu.dot_dimension_numbers<[1], [0], [0], [1], [0, 0, 1, 1], [], []>} : vector<2x64xbf16>, vector<64x1568xbf16>, vector<2x1568xf32> -> vector<2x1568xf32>
    %c0_3 = arith.constant 0 : index
    %c0_4 = arith.constant 0 : index
    %3 = vector.load %arg3[%c0_3, %c0_4] : memref<1x1568xf32, #tpu.memory_space<vmem>>, vector<1x1568xf32>
    %4 = vector.broadcast %3 : vector<1x1568xf32> to vector<2x1568xf32>
    %5 = arith.addf %2, %4 : vector<2x1568xf32>
    %cst_5 = arith.constant 0.000000e+00 : f32
    %6 = vector.broadcast %cst_5 : f32 to vector<2x1568xf32>
    %7 = arith.maximumf %5, %6 : vector<2x1568xf32>
    %8 = arith.truncf %7 : vector<2x1568xf32> to vector<2x1568xbf16>
    %c0_6 = arith.constant 0 : index
    %c0_7 = arith.constant 0 : index
    %9 = vector.load %arg4[%c0_6, %c0_7] : memref<2x1568xbf16, #tpu.memory_space<vmem>>, vector<2x1568xbf16>
    tpu.vector_store %arg4[%c0_6, %c0_7], %8 {strides = array<i32>} : memref<2x1568xbf16, #tpu.memory_space<vmem>>, vector<2x1568xbf16>,
    return
  }
  func.func @transform_0(%arg0: i32) -> (i32, i32) {
    %c0_i32 = arith.constant 0 : i32
    %c0_i32_0 = arith.constant 0 : i32
    return %arg0, %c0_i32 : i32, i32
  }
  func.func @transform_1(%arg0: i32) -> (i32, i32) {
    %c0_i32 = arith.constant 0 : i32
    %c0_i32_0 = arith.constant 0 : i32
    %c0_i32_1 = arith.constant 0 : i32
    return %c0_i32, %c0_i32_0 : i32, i32
  }
  func.func @transform_2(%arg0: i32) -> (i32, i32) {
    %c0_i32 = arith.constant 0 : i32
    %c0_i32_0 = arith.constant 0 : i32
    %c0_i32_1 = arith.constant 0 : i32
    return %c0_i32, %c0_i32_0 : i32, i32
  }
  func.func @transform_3(%arg0: i32) -> (i32, i32) {
    %c0_i32 = arith.constant 0 : i32
    %c0_i32_0 = arith.constant 0 : i32
    return %arg0, %c0_i32 : i32, i32
  }
}

module attributes {stable_mosaic.version = 11 : i64} {
  func.func @_gemm_bias_act_kernel(%arg0: i32, %arg1: memref<200x288xbf16, #tpu.memory_space<vmem>>, %arg2: memref<288x16xbf16, #tpu.memory_space<vmem>>, %arg3: memref<1x16xf32, #tpu.memory_space<vmem>>, %arg4: memref<200x16xbf16, #tpu.memory_space<vmem>>) attributes {dimension_semantics = [#tpu.dimension_semantics<parallel>], iteration_bounds = array<i64: 2>, scalar_prefetch = 0 : i64, scratch_operands = 0 : i64, tpu.core_type = #tpu.core_type<tc>, window_params = [{transform_indices = @transform_0, window_bounds = array<i64: 200, 288>}, {pipeline_mode = #tpu.pipeline_mode<synchronous>, transform_indices = @transform_1, window_bounds = array<i64: 288, 16>}, {pipeline_mode = #tpu.pipeline_mode<synchronous>, transform_indices = @transform_2, window_bounds = array<i64: 1, 16>}, {transform_indices = @transform_3, window_bounds = array<i64: 200, 16>}]} {
    %c0 = arith.constant 0 : index
    %c0_0 = arith.constant 0 : index
    %0 = vector.load %arg1[%c0, %c0_0] : memref<200x288xbf16, #tpu.memory_space<vmem>>, vector<200x288xbf16>
    %c0_1 = arith.constant 0 : index
    %c0_2 = arith.constant 0 : index
    %1 = vector.load %arg2[%c0_1, %c0_2] : memref<288x16xbf16, #tpu.memory_space<vmem>>, vector<288x16xbf16>
    %cst = arith.constant dense<0.000000e+00> : vector<200x16xf32>
    %2 = tpu.matmul %0, %1, %cst {dimension_numbers = #tpu.dot_dimension_numbers<[1], [0], [0], [1], [0, 0, 1, 1], [], []>} : vector<200x288xbf16>, vector<288x16xbf16>, vector<200x16xf32> -> vector<200x16xf32>
    %c0_3 = arith.constant 0 : index
    %c0_4 = arith.constant 0 : index
    %3 = vector.load %arg3[%c0_3, %c0_4] : memref<1x16xf32, #tpu.memory_space<vmem>>, vector<1x16xf32>
    %4 = vector.broadcast %3 : vector<1x16xf32> to vector<200x16xf32>
    %5 = arith.addf %2, %4 : vector<200x16xf32>
    %cst_5 = arith.constant 0.000000e+00 : f32
    %6 = vector.broadcast %cst_5 : f32 to vector<200x16xf32>
    %7 = arith.maximumf %5, %6 : vector<200x16xf32>
    %8 = arith.truncf %7 : vector<200x16xf32> to vector<200x16xbf16>
    %c0_6 = arith.constant 0 : index
    %c0_7 = arith.constant 0 : index
    %9 = vector.load %arg4[%c0_6, %c0_7] : memref<200x16xbf16, #tpu.memory_space<vmem>>, vector<200x16xbf16>
    tpu.vector_store %arg4[%c0_6, %c0_7], %8 {strides = array<i32>} : memref<200x16xbf16, #tpu.memory_space<vmem>>, vector<200x16xbf16>,
    return
  }
  func.func @transform_0(%arg0: i32) -> (i32, i32) {
    %c0_i32 = arith.constant 0 : i32
    %c0_i32_0 = arith.constant 0 : i32
    return %arg0, %c0_i32 : i32, i32
  }
  func.func @transform_1(%arg0: i32) -> (i32, i32) {
    %c0_i32 = arith.constant 0 : i32
    %c0_i32_0 = arith.constant 0 : i32
    %c0_i32_1 = arith.constant 0 : i32
    return %c0_i32, %c0_i32_0 : i32, i32
  }
  func.func @transform_2(%arg0: i32) -> (i32, i32) {
    %c0_i32 = arith.constant 0 : i32
    %c0_i32_0 = arith.constant 0 : i32
    %c0_i32_1 = arith.constant 0 : i32
    return %c0_i32, %c0_i32_0 : i32, i32
  }
  func.func @transform_3(%arg0: i32) -> (i32, i32) {
    %c0_i32 = arith.constant 0 : i32
    %c0_i32_0 = arith.constant 0 : i32
    return %arg0, %c0_i32 : i32, i32
  }
}

module attributes {stable_mosaic.version = 11 : i64} {
  func.func @_gemm_bias_act_kernel(%arg0: i32, %arg1: memref<392x144xbf16, #tpu.memory_space<vmem>>, %arg2: memref<144x1xbf16, #tpu.memory_space<vmem>>, %arg3: memref<1x1xf32, #tpu.memory_space<vmem>>, %arg4: memref<392x1xbf16, #tpu.memory_space<vmem>>) attributes {dimension_semantics = [#tpu.dimension_semantics<parallel>], iteration_bounds = array<i64: 4>, scalar_prefetch = 0 : i64, scratch_operands = 0 : i64, tpu.core_type = #tpu.core_type<tc>, window_params = [{transform_indices = @transform_0, window_bounds = array<i64: 392, 144>}, {pipeline_mode = #tpu.pipeline_mode<synchronous>, transform_indices = @transform_1, window_bounds = array<i64: 144, 1>}, {pipeline_mode = #tpu.pipeline_mode<synchronous>, transform_indices = @transform_2, window_bounds = array<i64: 1, 1>}, {transform_indices = @transform_3, window_bounds = array<i64: 392, 1>}]} {
    %c0 = arith.constant 0 : index
    %c0_0 = arith.constant 0 : index
    %0 = vector.load %arg1[%c0, %c0_0] : memref<392x144xbf16, #tpu.memory_space<vmem>>, vector<392x144xbf16>
    %c0_1 = arith.constant 0 : index
    %c0_2 = arith.constant 0 : index
    %1 = vector.load %arg2[%c0_1, %c0_2] : memref<144x1xbf16, #tpu.memory_space<vmem>>, vector<144x1xbf16>
    %cst = arith.constant dense<0.000000e+00> : vector<392x1xf32>
    %2 = tpu.matmul %0, %1, %cst {dimension_numbers = #tpu.dot_dimension_numbers<[1], [0], [0], [1], [0, 0, 1, 1], [], []>} : vector<392x144xbf16>, vector<144x1xbf16>, vector<392x1xf32> -> vector<392x1xf32>
    %c0_3 = arith.constant 0 : index
    %c0_4 = arith.constant 0 : index
    %3 = vector.load %arg3[%c0_3, %c0_4] : memref<1x1xf32, #tpu.memory_space<vmem>>, vector<1x1xf32>
    %4 = vector.broadcast %3 : vector<1x1xf32> to vector<392x1xf32>
    %5 = arith.addf %2, %4 : vector<392x1xf32>
    %6 = arith.negf %5 : vector<392x1xf32>
    %7 = math.exp %6 : vector<392x1xf32>
    %cst_5 = arith.constant 1.000000e+00 : f32
    %8 = vector.broadcast %cst_5 : f32 to vector<392x1xf32>
    %9 = arith.addf %8, %7 : vector<392x1xf32>
    %10 = arith.divf %8, %9 : vector<392x1xf32>
    %11 = arith.truncf %10 : vector<392x1xf32> to vector<392x1xbf16>
    %c0_6 = arith.constant 0 : index
    %c0_7 = arith.constant 0 : index
    %12 = vector.load %arg4[%c0_6, %c0_7] : memref<392x1xbf16, #tpu.memory_space<vmem>>, vector<392x1xbf16>
    tpu.vector_store %arg4[%c0_6, %c0_7], %11 {strides = array<i32>} : memref<392x1xbf16, #tpu.memory_space<vmem>>, vector<392x1xbf16>,
    return
  }
  func.func @transform_0(%arg0: i32) -> (i32, i32) {
    %c0_i32 = arith.constant 0 : i32
    %c0_i32_0 = arith.constant 0 : i32
    return %arg0, %c0_i32 : i32, i32
  }
  func.func @transform_1(%arg0: i32) -> (i32, i32) {
    %c0_i32 = arith.constant 0 : i32
    %c0_i32_0 = arith.constant 0 : i32
    %c0_i32_1 = arith.constant 0 : i32
    return %c0_i32, %c0_i32_0 : i32, i32
  }
  func.func @transform_2(%arg0: i32) -> (i32, i32) {
    %c0_i32 = arith.constant 0 : i32
    %c0_i32_0 = arith.constant 0 : i32
    %c0_i32_1 = arith.constant 0 : i32
    return %c0_i32, %c0_i32_0 : i32, i32
  }
  func.func @transform_3(%arg0: i32) -> (i32, i32) {
    %c0_i32 = arith.constant 0 : i32
    %c0_i32_0 = arith.constant 0 : i32
    return %arg0, %c0_i32 : i32, i32
  }
}

</mosaic_0001>

<bundles_post_ra>
// kernel: autoencoder_forward.6
= control target key start
LH: loop header
LB: loop body
LE: loop exit
PB: predicated region body
PF: predicated region fallthrough
CT: control target
= control target key end

     0   :  { %8 = vsyncpa [#allocation3], 0  ;;  %s952_s0 = inlined_call_operand.vmem [shape: bf16[400,9], index: 0, kind: input, shape index: {}]   ;;  %s953_s1 = inlined_call_operand.hbm [shape: bf16[9,16], index: 1, kind: input, shape index: {}]   ;;  %s954_s2 = inlined_call_operand.hbm [shape: f32[1,16], index: 2, kind: input, shape index: {}]   ;;  %s955_s3 = inlined_call_operand.vmem [shape: bf16[400,16], index: 3, kind: output, shape index: {}]  }
   0x1   :  { %9 = vsyncpa [#allocation5], 0  ;;  %s808_s12 = smov 0  }
   0x2 LB: > { %s125_s15 = sshll.u32 %s953_s1, 4  ;;  %s580_s16 = sadd.s32 4294967295, %s781_s12   ;;  %s781_s12 = sphi %s808_s12, %s15_s12   ;;  %s126_s15 = int_to_ptr.hbm [resolvable:$true] %s125_s15 }
   0x3   : > { %p582_p0 = scmp.ge.s32.totalorder %s781_s12, 1  ;;  %p114_p1 = scmp.lt.s32.totalorder %s781_s12, 3 }
   0x4   : > { %p819_p2 = scmp.eq.s32.totalorder %s580_s16, 0  ;;  %s783_s19 = smov [#allocation2]  }
   0x5   : > { %p823_p3 = pnand %p582_p0, %p114_p1  ;;  %s127_s20 = sshll.u32 %s783_s19, 4  ;;  %s128_s20 = int_to_ptr.vmem [resolvable:$true] %s127_s20 }
   0x6   : > { %s140_s23 = sshll.u32 %s954_s2, 4  ;;  %s784_s24 = smov [#allocation4]   ;;  %s141_s23 = int_to_ptr.hbm [resolvable:$true] %s140_s23 }
   0x7   : > { %p682_p4 = pneg %p823_p3  ;;  %s142_s25 = sshll.u32 %s784_s24, 4  ;;  %s143_s25 = int_to_ptr.vmem [resolvable:$true] %s142_s25 }
   0x8   : > { %s785_s26 = smov 64   ;;  %s786_s27 = smov 4  }
   0x9   : > { %p683_p5 = pnand %p819_p2, %p682_p4  ;;  %164 = sbr.rel (%p823_p3) target bundleno = 216 (0xd8), region = 32 }
   0xb   : > { %685 = dma.hbm_to_vmem [thread:$0]  (!%p683_p5), %s126_s15, 128, %s128_s20, [#allocation3], %s785_s26, %s785_s26, %s786_s27  }
   0xc   : > { %688 = dma.hbm_to_vmem [thread:$0]  (!%p683_p5), %s141_s23, 16, %s143_s25, [#allocation5]  }
   0xe   : > { %772 = dma.done.wait (%p819_p2), [#allocation3], 128  }
   0xf   : > { %774 = vsyncadd (%p819_p2), [#allocation3], 4294967168 }
  0x10   : > { %776 = dma.done.wait (%p819_p2), [#allocation5], 16  }
  0x11   : > { %778 = vsyncadd (%p819_p2), [#allocation5], 4294967280  ;;  %vm346_vm0 = vcmask 1043456   ;;  %s194_s28 = smul.u32 25, %s580_s16  ;;  %vm347_vm1 = vcmask 1044480   ;;  %v787_v0 = vmov 65535  }
  0x12   : > { %v348_v1 = vsel %vm346_vm0, 4294967295, %v787_v0  ;;  %v641_v3 = vld [vmem:[#allocation2] sm:$0xf]  ;;  %v670_v4 = vld [vmem:[#allocation2] sm:$0x10]  ;;  %vm306_vm2 = vcmask 72704  }
  0x13   : > { %p195_p6 = scmp.lt.s32.totalorder %s194_s28, 49  ;;  %v349_v2 = vsel %vm347_vm1, %v348_v1, 0  ;;  %v642_v5 = vor.u32 %v670_v4, %v641_v3  ;;  %v865_v22 = vld [vmem:[#allocation4] ss:$0 sm:$0xff]  ;;  %vm476_vm3 = vcmask 125952  }
  0x15   : > { %s959_s28 = smov (!%p195_p6, %s194_s28), 49  ;;  %v351_v6 = vand.u32 %v642_v5, %v349_v2 }
  0x16   : > { %s589_s29 = sshll.u32 %s959_s28, 2 }
  0x17   : > { %s198_s5 = scalar_lea.vmem %s952_s0, %s589_s29  ;;  %360 = vmatpush.bf16.msra.mxu0 %v351_v6  ;;  %671 = vmatpush.bf16.msra.mxu1 %v351_v6  ;;  %s874_s8 = scalar_lea.vmem %s955_s3, %s589_s29 }
  0x18   : > { %v658_v7 = vld [vmem:[%s198_s5] sm:$0xff]  ;;  %v667_v9 = vld [vmem:[%s198_s5 + $0x48] sm:$0xff]  ;;  %673 = vmatpush.bf16.msra.mxu3 %v351_v6  ;;  %672 = vmatpush.bf16.msra.mxu2 %v351_v6  ;;  %v668_v13 = vld [vmem:[%s198_s5 + $0x50] sm:$0xff] }
  0x19   : > { %v662_v8 = vld [vmem:[%s198_s5 + $0x20] sm:$0xff]  ;;  %v659_v11 = vld [vmem:[%s198_s5 + $0x8] sm:$0xff]  ;;  %v660_v14 = vld [vmem:[%s198_s5 + $0x10] sm:$0xff] }
  0x1a   : > { %643 = vmatmul.msk.bf16.vlgmr.msra.gmra.mxu0 %vm306_vm2, %v658_v7  ;;  %647 = vmatmul.msk.bf16.vlgmr.msra.gmra.mxu1 %vm306_vm2, %v662_v8  ;;  %v666_v10 = vld [vmem:[%s198_s5 + $0x40] sm:$0xff]  ;;  %v663_v12 = vld [vmem:[%s198_s5 + $0x28] sm:$0xff]  ;;  %v664_v15 = vld [vmem:[%s198_s5 + $0x30] sm:$0xff] }
  0x1b   : > { %652 = vmatmul.msk.bf16.vlgmr.msra.gmra.mxu3 %vm306_vm2, %v667_v9  ;;  %651 = vmatmul.msk.bf16.vlgmr.msra.gmra.mxu2 %vm306_vm2, %v666_v10  ;;  %v669_v16 = vld [vmem:[%s198_s5 + $0x58] sm:$0xff]  ;;  %v231_v17 = vld [vmem:[%s198_s5 + $0x60] sm:$0xf] }
  0x1c   : > { %v287_v18 = vunpack.c.l.b16 %v231_v17  ;;  %v661_v19 = vld [vmem:[%s198_s5 + $0x18] sm:$0xff] }
  0x1d   : > { %v665_v20 = vld [vmem:[%s198_s5 + $0x38] sm:$0xff] }
  0x1e   : > { %v300_v21 = vpack.c.b16 %v287_v18, %v287_v18 }
  0x2a   : > { %644 = vmatmul.msk.bf16.gmra.mxu0 %vm306_vm2, %v659_v11  ;;  %648 = vmatmul.msk.bf16.gmra.mxu1 %vm306_vm2, %v663_v12 }
  0x2b   : > { %653 = vmatmul.msk.bf16.gmra.mxu3 %vm306_vm2, %v668_v13 }
  0x3a   : > { %645 = vmatmul.msk.bf16.gmra.mxu0 %vm306_vm2, %v660_v14  ;;  %649 = vmatmul.msk.bf16.gmra.mxu1 %vm306_vm2, %v664_v15 }
  0x3b   : > { %654 = vmatmul.msk.bf16.gmra.mxu3 %vm306_vm2, %v669_v16 }
  0x4a   : > { %646 = vmatmul.msk.bf16.gmra.mxu0 %vm306_vm2, %v661_v19  ;;  %650 = vmatmul.msk.bf16.gmra.mxu1 %vm306_vm2, %v665_v20 }
  0x4b   : > { %655 = vmatmul.msk.bf16.gmra.mxu3 %vm306_vm2, %v300_v21 }
  0x97   : > { %v362_v23 = vpop.f32.mrf.mxu0  ;;  %v382_v24 = vpop.f32.mrf.mxu1 }
  0x98   : > { %v363_v25 = vadd.f32 %v865_v22, %v362_v23  ;;  %v383_v26 = vadd.f32 %v865_v22, %v382_v24 }
  0x9a   : > { %v426_v27 = vmax.f32 %v363_v25, 0.0  ;;  %v434_v28 = vmax.f32 %v383_v26, 0.0 }
  0x9c   : > { %v451_v29 = vpack.c.bf16 %v426_v27, %v426_v27  ;;  %v459_v30 = vpack.c.bf16 %v434_v28, %v434_v28 }
  0x9e   : > { %477 = vst.msk [vmem:[%s874_s8] sm:$0xf] %vm476_vm3, %v451_v29  ;;  %v407_v31 = vpop.f32.mrf.mxu3  ;;  %v402_v37 = vpop.f32.mrf.mxu2 }
  0x9f   : > { %485 = vst.msk [vmem:[%s874_s8 + $0x20] sm:$0xf] %vm476_vm3, %v459_v30  ;;  %v408_v32 = vadd.f32 %v865_v22, %v407_v31  ;;  %v364_v33 = vpop.f32.mrf.mxu0  ;;  %v384_v34 = vpop.f32.mrf.mxu1  ;;  %v403_v48 = vadd.f32 %v865_v22, %v402_v37 }
  0xa0   : > { %v365_v35 = vadd.f32 %v865_v22, %v364_v33  ;;  %v385_v36 = vadd.f32 %v865_v22, %v384_v34 }
  0xa1   : > { %v444_v38 = vmax.f32 %v408_v32, 0.0  ;;  %v442_v53 = vmax.f32 %v403_v48, 0.0 }
  0xa2   : > { %v427_v39 = vmax.f32 %v365_v35, 0.0  ;;  %v435_v40 = vmax.f32 %v385_v36, 0.0 }
  0xa3   : > { %v469_v41 = vpack.c.bf16 %v444_v38, %v444_v38  ;;  %v467_v61 = vpack.c.bf16 %v442_v53, %v442_v53 }
  0xa4   : > { %v452_v42 = vpack.c.bf16 %v427_v39, %v427_v39  ;;  %v460_v43 = vpack.c.bf16 %v435_v40, %v435_v40 }
  0xa5   : > { %495 = vst.msk [vmem:[%s874_s8 + $0x48] sm:$0xf] %vm476_vm3, %v469_v41 }
  0xa6   : > { %478 = vst.msk [vmem:[%s874_s8 + $0x4] sm:$0xf] %vm476_vm3, %v452_v42  ;;  %v409_v44 = vpop.f32.mrf.mxu3  ;;  %v404_v51 = vpop.f32.mrf.mxu2 }
  0xa7   : > { %486 = vst.msk [vmem:[%s874_s8 + $0x24] sm:$0xf] %vm476_vm3, %v460_v43  ;;  %v410_v45 = vadd.f32 %v865_v22, %v409_v44  ;;  %v367_v46 = vpop.f32.mrf.mxu0  ;;  %v387_v47 = vpop.f32.mrf.mxu1  ;;  %v405_v54 = vadd.f32 %v865_v22, %v404_v51 }
  0xa8   : > { %v368_v49 = vadd.f32 %v865_v22, %v367_v46  ;;  %v388_v50 = vadd.f32 %v865_v22, %v387_v47  ;;  %493 = vst.msk [vmem:[%s874_s8 + $0x40] sm:$0xf] %vm476_vm3, %v467_v61 }
  0xa9   : > { %v445_v52 = vmax.f32 %v410_v45, 0.0  ;;  %v443_v58 = vmax.f32 %v405_v54, 0.0 }
  0xaa   : > { %v428_v55 = vmax.f32 %v368_v49, 0.0  ;;  %v436_v56 = vmax.f32 %v388_v50, 0.0 }
  0xab   : > { %v470_v57 = vpack.c.bf16 %v445_v52, %v445_v52  ;;  %v468_v62 = vpack.c.bf16 %v443_v58, %v443_v58 }
  0xac   : > { %v453_v59 = vpack.c.bf16 %v428_v55, %v428_v55  ;;  %v461_v60 = vpack.c.bf16 %v436_v56, %v436_v56 }
  0xad   : > { %496 = vst.msk [vmem:[%s874_s8 + $0x4c] sm:$0xf] %vm476_vm3, %v470_v57 }
  0xae   : > { %479 = vst.msk [vmem:[%s874_s8 + $0x8] sm:$0xf] %vm476_vm3, %v453_v59  ;;  %v412_v63 = vpop.f32.mrf.mxu3 }
  0xaf   : > { %487 = vst.msk [vmem:[%s874_s8 + $0x28] sm:$0xf] %vm476_vm3, %v461_v60  ;;  %v413_v0 = vadd.f32 %v865_v22, %v412_v63  ;;  %v369_v1 = vpop.f32.mrf.mxu0  ;;  %v389_v2 = vpop.f32.mrf.mxu1 }
  0xb0   : > { %v370_v3 = vadd.f32 %v865_v22, %v369_v1  ;;  %v390_v4 = vadd.f32 %v865_v22, %v389_v2  ;;  %494 = vst.msk [vmem:[%s874_s8 + $0x44] sm:$0xf] %vm476_vm3, %v468_v62 }
  0xb1   : > { %v446_v5 = vmax.f32 %v413_v0, 0.0 }
  0xb2   : > { %v429_v6 = vmax.f32 %v370_v3, 0.0  ;;  %v437_v7 = vmax.f32 %v390_v4, 0.0 }
  0xb3   : > { %v471_v8 = vpack.c.bf16 %v446_v5, %v446_v5 }
  0xb4   : > { %v454_v9 = vpack.c.bf16 %v429_v6, %v429_v6  ;;  %v462_v10 = vpack.c.bf16 %v437_v7, %v437_v7 }
  0xb5   : > { %497 = vst.msk [vmem:[%s874_s8 + $0x50] sm:$0xf] %vm476_vm3, %v471_v8 }
  0xb6   : > { %480 = vst.msk [vmem:[%s874_s8 + $0xc] sm:$0xf] %vm476_vm3, %v454_v9  ;;  %v414_v11 = vpop.f32.mrf.mxu3 }
  0xb7   : > { %488 = vst.msk [vmem:[%s874_s8 + $0x2c] sm:$0xf] %vm476_vm3, %v462_v10  ;;  %v415_v12 = vadd.f32 %v865_v22, %v414_v11  ;;  %v372_v13 = vpop.f32.mrf.mxu0  ;;  %v392_v14 = vpop.f32.mrf.mxu1 }
  0xb8   : > { %v373_v15 = vadd.f32 %v865_v22, %v372_v13  ;;  %v393_v16 = vadd.f32 %v865_v22, %v392_v14 }
  0xb9   : > { %v447_v17 = vmax.f32 %v415_v12, 0.0 }
  0xba   : > { %v430_v18 = vmax.f32 %v373_v15, 0.0  ;;  %v438_v19 = vmax.f32 %v393_v16, 0.0 }
  0xbb   : > { %v472_v20 = vpack.c.bf16 %v447_v17, %v447_v17 }
  0xbc   : > { %v455_v21 = vpack.c.bf16 %v430_v18, %v430_v18  ;;  %v463_v23 = vpack.c.bf16 %v438_v19, %v438_v19 }
  0xbd   : > { %498 = vst.msk [vmem:[%s874_s8 + $0x54] sm:$0xf] %vm476_vm3, %v472_v20 }
  0xbe   : > { %481 = vst.msk [vmem:[%s874_s8 + $0x10] sm:$0xf] %vm476_vm3, %v455_v21  ;;  %v417_v24 = vpop.f32.mrf.mxu3 }
  0xbf   : > { %489 = vst.msk [vmem:[%s874_s8 + $0x30] sm:$0xf] %vm476_vm3, %v463_v23  ;;  %v418_v25 = vadd.f32 %v865_v22, %v417_v24  ;;  %v374_v26 = vpop.f32.mrf.mxu0  ;;  %v394_v27 = vpop.f32.mrf.mxu1 }
  0xc0   : > { %v375_v28 = vadd.f32 %v865_v22, %v374_v26  ;;  %v395_v29 = vadd.f32 %v865_v22, %v394_v27 }
  0xc1   : > { %v448_v30 = vmax.f32 %v418_v25, 0.0 }
  0xc2   : > { %v431_v31 = vmax.f32 %v375_v28, 0.0  ;;  %v439_v32 = vmax.f32 %v395_v29, 0.0 }
  0xc3   : > { %v473_v33 = vpack.c.bf16 %v448_v30, %v448_v30 }
  0xc4   : > { %v456_v34 = vpack.c.bf16 %v431_v31, %v431_v31  ;;  %v464_v35 = vpack.c.bf16 %v439_v32, %v439_v32 }
  0xc5   : > { %499 = vst.msk [vmem:[%s874_s8 + $0x58] sm:$0xf] %vm476_vm3, %v473_v33 }
  0xc6   : > { %482 = vst.msk [vmem:[%s874_s8 + $0x14] sm:$0xf] %vm476_vm3, %v456_v34  ;;  %v419_v36 = vpop.f32.mrf.mxu3 }
  0xc7   : > { %490 = vst.msk [vmem:[%s874_s8 + $0x34] sm:$0xf] %vm476_vm3, %v464_v35  ;;  %v420_v37 = vadd.f32 %v865_v22, %v419_v36  ;;  %v377_v38 = vpop.f32.mrf.mxu0  ;;  %v397_v39 = vpop.f32.mrf.mxu1 }
  0xc8   : > { %v378_v40 = vadd.f32 %v865_v22, %v377_v38  ;;  %v398_v41 = vadd.f32 %v865_v22, %v397_v39 }
  0xc9   : > { %v449_v42 = vmax.f32 %v420_v37, 0.0 }
  0xca   : > { %v432_v43 = vmax.f32 %v378_v40, 0.0  ;;  %v440_v44 = vmax.f32 %v398_v41, 0.0 }
  0xcb   : > { %v474_v45 = vpack.c.bf16 %v449_v42, %v449_v42 }
  0xcc   : > { %v457_v46 = vpack.c.bf16 %v432_v43, %v432_v43  ;;  %v465_v47 = vpack.c.bf16 %v440_v44, %v440_v44 }
  0xcd   : > { %500 = vst.msk [vmem:[%s874_s8 + $0x5c] sm:$0xf] %vm476_vm3, %v474_v45 }
  0xce   : > { %483 = vst.msk [vmem:[%s874_s8 + $0x18] sm:$0xf] %vm476_vm3, %v457_v46  ;;  %v422_v48 = vpop.f32.mrf.mxu3 }
  0xcf   : > { %491 = vst.msk [vmem:[%s874_s8 + $0x38] sm:$0xf] %vm476_vm3, %v465_v47  ;;  %v423_v49 = vadd.f32 %v865_v22, %v422_v48  ;;  %v379_v50 = vpop.f32.mrf.mxu0  ;;  %v399_v51 = vpop.f32.mrf.mxu1 }
  0xd0   : > { %v380_v52 = vadd.f32 %v865_v22, %v379_v50  ;;  %v400_v53 = vadd.f32 %v865_v22, %v399_v51 }
  0xd1   : > { %v450_v54 = vmax.f32 %v423_v49, 0.0 }
  0xd2   : > { %v433_v55 = vmax.f32 %v380_v52, 0.0  ;;  %v441_v56 = vmax.f32 %v400_v53, 0.0 }
  0xd3   : > { %v475_v57 = vpack.c.bf16 %v450_v54, %v450_v54 }
  0xd4   : > { %v458_v58 = vpack.c.bf16 %v433_v55, %v433_v55  ;;  %v466_v59 = vpack.c.bf16 %v441_v56, %v441_v56 }
  0xd5   : > { %501 = vst.msk [vmem:[%s874_s8 + $0x60] sm:$0xf] %vm476_vm3, %v475_v57 }
  0xd6   : > { %484 = vst.msk [vmem:[%s874_s8 + $0x1c] sm:$0xf] %vm476_vm3, %v458_v58  ;;  %v424_v60 = vpop.f32.mrf.mxu3 }
  0xd7   : > { %492 = vst.msk [vmem:[%s874_s8 + $0x3c] sm:$0xf] %vm476_vm3, %v466_v59 }
  0xd8 PF: > { %s15_s12 = sadd.s32 1, %s781_s12  }
  0xd9   : > { %p12_p7 = scmp.ge.s32.totalorder %s15_s12, 4  }
  0xdb   :  { %14 = sbr.rel (!%p12_p7) target bundleno = 2 (0x2), region = 71 }
  0xe0   :  { %524 = vsyncpa [#allocation3], 1 }
  0xe1   :  { %526 = vsyncpa [#allocation3 + $0x1], 1 }
  0xe2   :  { %527 = vsyncpa [#allocation5], 1 }

// kernel: autoencoder_forward.7
= control target key start
LH: loop header
LB: loop body
LE: loop exit
PB: predicated region body
PF: predicated region fallthrough
CT: control target
= control target key end

     0   :  { %vm164_vm0 = vcmask 130048   ;;  %vm298_vm1 = vcmask 257024   ;;  %vm311_vm2 = vcmask 253952   ;;  %s643_s1 = inlined_call_operand.vmem [shape: bf16[144,32], index: 1, kind: input, shape index: {}]   ;;  %s644_s0 = inlined_call_operand.vmem [shape: bf16[98,144], index: 0, kind: input, shape index: {}]   ;;  %s645_s2 = inlined_call_operand.vmem [shape: f32[1,32], index: 2, kind: input, shape index: {}]   ;;  %s646_s3 = inlined_call_operand.vmem [shape: bf16[98,32], index: 3, kind: output, shape index: {}]  }
   0x1   :  { %v427_v0 = vld [vmem:[%s643_s1 + $0x38] sm:$0xff]  ;;  %v428_v1 = vld [vmem:[%s643_s1 + $0x40] sm:$0xff]  ;;  %v321_v3 = vld [vmem:[%s644_s0 + $0x8] sm:$0xf0] }
   0x2   :  { %v408_v2 = vld [vmem:[%s644_s0 + $0x4] sm:$0xf]  ;;  %186 = vmatpush.bf16.msra.mxu0 %v427_v0  ;;  %429 = vmatpush.bf16.msra.mxu2 %v427_v0  ;;  %v426_v5 = vld [vmem:[%s643_s1 + $0x30] sm:$0xff]  ;;  %v425_v6 = vld [vmem:[%s643_s1 + $0x28] sm:$0xff] }
   0x3   :  { %v324_v4 = vor.u32 %v408_v2, %v321_v3  ;;  %236 = vmatpush.bf16.msra.mxu1 %v428_v1  ;;  %437 = vmatpush.bf16.msra.mxu3 %v428_v1  ;;  %v424_v7 = vld [vmem:[%s643_s1 + $0x20] sm:$0xff]  ;;  %v423_v8 = vld [vmem:[%s643_s1 + $0x18] sm:$0xff]  ;;  %v410_v9 = vld [vmem:[%s644_s0 + $0x14] sm:$0xf] }
   0x4   :  { %v329_v10 = vld [vmem:[%s644_s0 + $0x18] sm:$0xf0]  ;;  %v422_v12 = vld [vmem:[%s643_s1 + $0x10] sm:$0xff]  ;;  %v421_v13 = vld [vmem:[%s643_s1 + $0x8] sm:$0xff] }
   0x5   :  { %v332_v11 = vor.u32 %v410_v9, %v329_v10  ;;  %v418_v14 = vld [vmem:[%s644_s0 + $0x54] sm:$0xf]  ;;  %v361_v15 = vld [vmem:[%s644_s0 + $0x58] sm:$0xf0]  ;;  %v420_v17 = vld [vmem:[%s643_s1] sm:$0xff] }
   0x6   :  { %401 = vmatmul.msk.bf16.vlgmr.msra.gmra.mxu1 %vm164_vm0, %v324_v4  ;;  %187 = vmatpush.bf16.msra.mxu0 %v426_v5  ;;  %v364_v16 = vor.u32 %v418_v14, %v361_v15  ;;  %v319_v18 = vld [vmem:[%s644_s0] sm:$0xf]  ;;  %v409_v19 = vld [vmem:[%s644_s0 + $0x4] sm:$0xf0]  ;;  %v343_v20 = vld [vmem:[%s644_s0 + $0x30] sm:$0xf] }
   0x7   :  { %430 = vmatpush.bf16.msra.mxu2 %v426_v5  ;;  %v415_v21 = vld [vmem:[%s644_s0 + $0x34] sm:$0xf0]  ;;  %v320_v22 = vor.u32 %v409_v19, %v319_v18  ;;  %v412_v24 = vld [vmem:[%s644_s0 + $0x24] sm:$0xf]  ;;  %v337_v25 = vld [vmem:[%s644_s0 + $0x28] sm:$0xf0] }
   0x8   :  { %406 = vmatmul.msk.bf16.vlgmr.msra.gmra.mxu3 %vm164_vm0, %v364_v16  ;;  %v344_v23 = vor.u32 %v415_v21, %v343_v20  ;;  %v340_v26 = vor.u32 %v412_v24, %v337_v25  ;;  %v27_v27 = vld [vmem:[%s644_s0 + $0x60] sm:$0x11]  ;;  %v327_v30 = vld [vmem:[%s644_s0 + $0x10] sm:$0xf]  ;;  %v411_v31 = vld [vmem:[%s644_s0 + $0x14] sm:$0xf0] }
   0x9   :  { %v88_v28 = vunpack.c.h.b16 %v27_v27  ;;  %v351_v32 = vld [vmem:[%s644_s0 + $0x40] sm:$0xf]  ;;  %v417_v33 = vld [vmem:[%s644_s0 + $0x44] sm:$0xf0]  ;;  %v328_v34 = vor.u32 %v411_v31, %v327_v30  ;;  %v414_v36 = vld [vmem:[%s644_s0 + $0x34] sm:$0xf]  ;;  %v87_v48 = vunpack.c.l.b16 %v27_v27 }
   0xa   :  { %188 = vmatpush.bf16.msra.mxu0 %v425_v6  ;;  %v352_v35 = vor.u32 %v417_v33, %v351_v32  ;;  %v345_v37 = vld [vmem:[%s644_s0 + $0x38] sm:$0xf0]  ;;  %v335_v39 = vld [vmem:[%s644_s0 + $0x20] sm:$0xf]  ;;  %v413_v40 = vld [vmem:[%s644_s0 + $0x24] sm:$0xf0] }
   0xb   :  { %431 = vmatpush.bf16.msra.mxu2 %v425_v6  ;;  %v102_v29 = vpack.c.b16 %v88_v28, %v88_v28  ;;  %v348_v38 = vor.u32 %v414_v36, %v345_v37  ;;  %v359_v41 = vld [vmem:[%s644_s0 + $0x50] sm:$0xf]  ;;  %v419_v42 = vld [vmem:[%s644_s0 + $0x54] sm:$0xf0]  ;;  %v336_v43 = vor.u32 %v413_v40, %v335_v39  ;;  %v416_v45 = vld [vmem:[%s644_s0 + $0x44] sm:$0xf]  ;;  %v101_v49 = vpack.c.b16 %v87_v48, %v87_v48 }
   0xc   :  { %v360_v44 = vor.u32 %v419_v42, %v359_v41  ;;  %v353_v46 = vld [vmem:[%s644_s0 + $0x48] sm:$0xf0]  ;;  %v571_v54 = vld [vmem:[%s645_s2] ss:$0 sm:$0xff] }
   0xd   :  { %v356_v47 = vor.u32 %v416_v45, %v353_v46 }
   0xe   :  { %189 = vmatpush.bf16.msra.mxu0 %v424_v7 }
   0xf   :  { %432 = vmatpush.bf16.msra.mxu2 %v424_v7 }
  0x12   :  { %190 = vmatpush.bf16.msra.mxu0 %v423_v8 }
  0x13   :  { %433 = vmatpush.bf16.msra.mxu2 %v423_v8 }
  0x16   :  { %402 = vmatmul.msk.bf16.gmra.mxu1 %vm164_vm0, %v332_v11  ;;  %191 = vmatpush.bf16.msra.mxu0 %v422_v12 }
  0x17   :  { %434 = vmatpush.bf16.msra.mxu2 %v422_v12 }
  0x18   :  { %407 = vmatmul.msk.bf16.gmra.mxu3 %vm164_vm0, %v102_v29 }
  0x1a   :  { %192 = vmatpush.bf16.msra.mxu0 %v421_v13 }
  0x1b   :  { %435 = vmatpush.bf16.msra.mxu2 %v421_v13 }
  0x1e   :  { %193 = vmatpush.bf16.msra.mxu0 %v420_v17 }
  0x1f   :  { %436 = vmatpush.bf16.msra.mxu2 %v420_v17 }
  0x21   :  { %194 = vmatmul.bf16.vlgmr.msra.gmra.mxu0 %v320_v22 }
  0x22   :  { %209 = vmatmul.bf16.vlgmr.msra.gmra.mxu2 %v344_v23 }
  0x26   :  { %403 = vmatmul.msk.bf16.gmra.mxu1 %vm164_vm0, %v340_v26 }
  0x31   :  { %199 = vmatmul.bf16.gmra.mxu0 %v328_v34 }
  0x32   :  { %214 = vmatmul.bf16.gmra.mxu2 %v352_v35 }
  0x36   :  { %404 = vmatmul.msk.bf16.gmra.mxu1 %vm164_vm0, %v348_v38 }
  0x41   :  { %204 = vmatmul.bf16.gmra.mxu0 %v336_v43 }
  0x42   :  { %219 = vmatmul.bf16.gmra.mxu2 %v360_v44 }
  0x46   :  { %405 = vmatmul.msk.bf16.gmra.mxu1 %vm164_vm0, %v356_v47 }
  0x52   :  { %224 = vmatmul.bf16.gmra.mxu2 %v101_v49 }
  0x83   :  { %v238_v50 = vpop.f32.mrf.mxu1 }
  0x8b   :  { %v240_v51 = vpop.f32.mrf.mxu1  ;;  %v263_v56 = vpop.f32.mrf.mxu3 }
  0x93   :  { %v243_v52 = vpop.f32.mrf.mxu1  ;;  %v574_v0 = vpop.f32.mrf.mxu3 }
  0x9b   :  { %v245_v53 = vpop.f32.mrf.mxu1  ;;  %v581_v8 = vpop.f32.mrf.mxu3 }
  0x9e   :  { %v195_v55 = vpop.f32.mrf.mxu0 }
  0x9f   :  { %v196_v57 = vadd.f32 %v571_v54, %v195_v55 }
  0xa1   :  { %v239_v58 = vadd.f32 %v238_v50, %v196_v57 }
  0xa3   :  { %v272_v59 = vmax.f32 %v239_v58, 0.0  ;;  %v248_v60 = vpop.f32.mrf.mxu1  ;;  %v270_v19 = vpop.f32.mrf.mxu3 }
  0xa5   :  { %v285_v61 = vpack.c.bf16 %v272_v59, %v272_v59  ;;  %v210_v62 = vpop.f32.mrf.mxu2 }
  0xa6   :  { %v197_v63 = vpop.f32.mrf.mxu0  ;;  %v211_v11 = vadd.f32 %v571_v54, %v210_v62 }
  0xa7   :  { %299 = vst.msk [vmem:[%s646_s3] sm:$0xf] %vm298_vm1, %v285_v61  ;;  %v198_v1 = vadd.f32 %v571_v54, %v197_v63 }
  0xa9   :  { %v241_v2 = vadd.f32 %v240_v51, %v198_v1 }
  0xab   :  { %v273_v3 = vmax.f32 %v241_v2, 0.0  ;;  %v250_v4 = vpop.f32.mrf.mxu1 }
  0xad   :  { %v286_v5 = vpack.c.bf16 %v273_v3, %v273_v3  ;;  %v212_v6 = vpop.f32.mrf.mxu2 }
  0xae   :  { %v200_v7 = vpop.f32.mrf.mxu0  ;;  %v213_v23 = vadd.f32 %v571_v54, %v212_v6 }
  0xaf   :  { %300 = vst.msk [vmem:[%s646_s3 + $0x4] sm:$0xf] %vm298_vm1, %v286_v5  ;;  %v201_v9 = vadd.f32 %v571_v54, %v200_v7 }
  0xb1   :  { %v244_v10 = vadd.f32 %v243_v52, %v201_v9 }
  0xb3   :  { %v274_v12 = vmax.f32 %v244_v10, 0.0  ;;  %v253_v13 = vpop.f32.mrf.mxu1 }
  0xb4   :  { %v254_v14 = vadd.f32 %v253_v13, %v211_v11 }
  0xb5   :  { %v287_v15 = vpack.c.bf16 %v274_v12, %v274_v12  ;;  %v215_v16 = vpop.f32.mrf.mxu2 }
  0xb6   :  { %v278_v17 = vmax.f32 %v254_v14, 0.0  ;;  %v202_v18 = vpop.f32.mrf.mxu0  ;;  %v216_v34 = vadd.f32 %v571_v54, %v215_v16 }
  0xb7   :  { %301 = vst.msk [vmem:[%s646_s3 + $0x8] sm:$0xf] %vm298_vm1, %v287_v15  ;;  %v203_v20 = vadd.f32 %v571_v54, %v202_v18 }
  0xb8   :  { %v291_v21 = vpack.c.bf16 %v278_v17, %v278_v17 }
  0xb9   :  { %v246_v22 = vadd.f32 %v245_v53, %v203_v20 }
  0xba   :  { %305 = vst.msk [vmem:[%s646_s3 + $0x18] sm:$0xf] %vm298_vm1, %v291_v21 }
  0xbb   :  { %v275_v24 = vmax.f32 %v246_v22, 0.0  ;;  %v255_v25 = vpop.f32.mrf.mxu1 }
  0xbc   :  { %v256_v26 = vadd.f32 %v255_v25, %v213_v23 }
  0xbd   :  { %v288_v27 = vpack.c.bf16 %v275_v24, %v275_v24  ;;  %v217_v28 = vpop.f32.mrf.mxu2 }
  0xbe   :  { %v279_v29 = vmax.f32 %v256_v26, 0.0  ;;  %v205_v30 = vpop.f32.mrf.mxu0  ;;  %v218_v47 = vadd.f32 %v571_v54, %v217_v28 }
  0xbf   :  { %302 = vst.msk [vmem:[%s646_s3 + $0xc] sm:$0xf] %vm298_vm1, %v288_v27  ;;  %v206_v31 = vadd.f32 %v571_v54, %v205_v30 }
  0xc0   :  { %v292_v32 = vpack.c.bf16 %v279_v29, %v279_v29 }
  0xc1   :  { %v249_v33 = vadd.f32 %v248_v60, %v206_v31 }
  0xc2   :  { %306 = vst.msk [vmem:[%s646_s3 + $0x1c] sm:$0xf] %vm298_vm1, %v292_v32 }
  0xc3   :  { %v276_v35 = vmax.f32 %v249_v33, 0.0  ;;  %v258_v36 = vpop.f32.mrf.mxu1 }
  0xc4   :  { %v259_v37 = vadd.f32 %v258_v36, %v216_v34 }
  0xc5   :  { %v289_v38 = vpack.c.bf16 %v276_v35, %v276_v35  ;;  %v220_v39 = vpop.f32.mrf.mxu2 }
  0xc6   :  { %v280_v40 = vmax.f32 %v259_v37, 0.0  ;;  %v221_v41 = vadd.f32 %v571_v54, %v220_v39  ;;  %v207_v42 = vpop.f32.mrf.mxu0 }
  0xc7   :  { %303 = vst.msk [vmem:[%s646_s3 + $0x10] sm:$0xf] %vm298_vm1, %v289_v38  ;;  %v208_v43 = vadd.f32 %v571_v54, %v207_v42 }
  0xc8   :  { %v293_v44 = vpack.c.bf16 %v280_v40, %v280_v40  ;;  %v264_v45 = vadd.f32 %v263_v56, %v221_v41 }
  0xc9   :  { %v251_v46 = vadd.f32 %v250_v4, %v208_v43 }
  0xca   :  { %307 = vst.msk [vmem:[%s646_s3 + $0x20] sm:$0xf] %vm298_vm1, %v293_v44  ;;  %v282_v48 = vmax.f32 %v264_v45, 0.0 }
  0xcb   :  { %v277_v49 = vmax.f32 %v251_v46, 0.0  ;;  %v260_v50 = vpop.f32.mrf.mxu1 }
  0xcc   :  { %v295_v51 = vpack.c.bf16 %v282_v48, %v282_v48  ;;  %v261_v52 = vadd.f32 %v260_v50, %v218_v47 }
  0xcd   :  { %v290_v53 = vpack.c.bf16 %v277_v49, %v277_v49  ;;  %v222_v55 = vpop.f32.mrf.mxu2 }
  0xce   :  { %309 = vst.msk [vmem:[%s646_s3 + $0x28] sm:$0xf] %vm298_vm1, %v295_v51  ;;  %v281_v56 = vmax.f32 %v261_v52, 0.0  ;;  %v223_v57 = vadd.f32 %v571_v54, %v222_v55 }
  0xcf   :  { %304 = vst.msk [vmem:[%s646_s3 + $0x14] sm:$0xf] %vm298_vm1, %v290_v53 }
  0xd0   :  { %v294_v58 = vpack.c.bf16 %v281_v56, %v281_v56  ;;  %v266_v59 = vadd.f32 %v574_v0, %v223_v57 }
  0xd2   :  { %308 = vst.msk [vmem:[%s646_s3 + $0x24] sm:$0xf] %vm298_vm1, %v294_v58  ;;  %v283_v60 = vmax.f32 %v266_v59, 0.0 }
  0xd4   :  { %v296_v61 = vpack.c.bf16 %v283_v60, %v283_v60 }
  0xd5   :  { %v225_v62 = vpop.f32.mrf.mxu2 }
  0xd6   :  { %310 = vst.msk [vmem:[%s646_s3 + $0x2c] sm:$0xf] %vm298_vm1, %v296_v61  ;;  %v226_v63 = vadd.f32 %v571_v54, %v225_v62 }
  0xd8   :  { %v269_v1 = vadd.f32 %v581_v8, %v226_v63 }
  0xda   :  { %v284_v2 = vmax.f32 %v269_v1, 0.0 }
  0xdc   :  { %v297_v0 = vpack.c.bf16 %v284_v2, %v284_v2 }
  0xdd   :  { %v227_v3 = vpop.f32.mrf.mxu2 }
  0xde   :  { %312 = vst.msk [vmem:[%s646_s3 + $0x30] sm:$0x1] %vm311_vm2, %v297_v0 }

// kernel: autoencoder_forward.9
= control target key start
LH: loop header
LB: loop body
LE: loop exit
PB: predicated region body
PF: predicated region fallthrough
CT: control target
= control target key end

     0   :  { %vm366_vm0 = vcmask 523264   ;;  %vm582_vm1 = vcmask 1042434   ;;  %vm578_vm2 = vcmask 1040384   ;;  %vm586_vm3 = vcmask 1041408   ;;  %s1283_s1 = inlined_call_operand.vmem [shape: bf16[64,1568], index: 1, kind: input, shape index: {}]   ;;  %s1284_s0 = inlined_call_operand.vmem [shape: bf16[2,64], index: 0, kind: input, shape index: {}]   ;;  %s1285_s2 = inlined_call_operand.vmem [shape: f32[1,1568], index: 2, kind: input, shape index: {}]   ;;  %s1286_s3 = inlined_call_operand.vmem [shape: bf16[2,1568], index: 3, kind: output, shape index: {}]  }
   0x1   :  { %v786_v0 = vld [vmem:[%s1283_s1 + $0x138] sm:$0xf]  ;;  %v894_v1 = vld [vmem:[%s1283_s1 + $0x168] sm:$0xf0]  ;;  %v888_v2 = vld [vmem:[%s1283_s1 + $0x13c] sm:$0xf] }
   0x2   :  { %v787_v3 = vor.u32 %v894_v1, %v786_v0  ;;  %v788_v4 = vld [vmem:[%s1283_s1 + $0x16c] sm:$0xf0]  ;;  %v794_v5 = vld [vmem:[%s1283_s1 + $0x140] sm:$0xf]  ;;  %v895_v6 = vld [vmem:[%s1283_s1 + $0x170] sm:$0xf0] }
   0x3   :  { %v791_v7 = vor.u32 %v888_v2, %v788_v4  ;;  %v795_v8 = vor.u32 %v895_v6, %v794_v5  ;;  %v889_v9 = vld [vmem:[%s1283_s1 + $0x144] sm:$0xf]  ;;  %v796_v10 = vld [vmem:[%s1283_s1 + $0x174] sm:$0xf0]  ;;  %v734_v11 = vld [vmem:[%s1283_s1 + $0xd0] sm:$0xf] }
   0x4   :  { %374 = vmatpush.bf16.msra.mxu0 %v787_v3  ;;  %v799_v12 = vor.u32 %v889_v9, %v796_v10  ;;  %v881_v13 = vld [vmem:[%s1283_s1 + $0x100] sm:$0xf0]  ;;  %v875_v14 = vld [vmem:[%s1283_s1 + $0xd4] sm:$0xf]  ;;  %v736_v15 = vld [vmem:[%s1283_s1 + $0x104] sm:$0xf0] }
   0x5   :  { %387 = vmatpush.bf16.msra.mxu1 %v791_v7  ;;  %400 = vmatpush.bf16.msra.mxu2 %v795_v8  ;;  %v735_v16 = vor.u32 %v881_v13, %v734_v11  ;;  %v739_v17 = vor.u32 %v875_v14, %v736_v15  ;;  %v742_v18 = vld [vmem:[%s1283_s1 + $0xd8] sm:$0xf]  ;;  %v882_v19 = vld [vmem:[%s1283_s1 + $0x108] sm:$0xf0]  ;;  %v876_v20 = vld [vmem:[%s1283_s1 + $0xdc] sm:$0xf] }
   0x6   :  { %413 = vmatpush.bf16.msra.mxu3 %v799_v12  ;;  %v743_v21 = vor.u32 %v882_v19, %v742_v18  ;;  %v744_v22 = vld [vmem:[%s1283_s1 + $0x10c] sm:$0xf0]  ;;  %v682_v23 = vld [vmem:[%s1283_s1 + $0x68] sm:$0xf]  ;;  %v868_v24 = vld [vmem:[%s1283_s1 + $0x98] sm:$0xf0] }
   0x7   :  { %v747_v25 = vor.u32 %v876_v20, %v744_v22  ;;  %v862_v26 = vld [vmem:[%s1283_s1 + $0x6c] sm:$0xf]  ;;  %v684_v27 = vld [vmem:[%s1283_s1 + $0x9c] sm:$0xf0]  ;;  %v690_v28 = vld [vmem:[%s1283_s1 + $0x70] sm:$0xf]  ;;  %v683_v29 = vor.u32 %v868_v24, %v682_v23 }
   0x8   :  { %375 = vmatpush.bf16.msra.mxu0 %v735_v16  ;;  %v869_v30 = vld [vmem:[%s1283_s1 + $0xa0] sm:$0xf0]  ;;  %v863_v31 = vld [vmem:[%s1283_s1 + $0x74] sm:$0xf]  ;;  %v692_v32 = vld [vmem:[%s1283_s1 + $0xa4] sm:$0xf0]  ;;  %v687_v33 = vor.u32 %v862_v26, %v684_v27 }
   0x9   :  { %388 = vmatpush.bf16.msra.mxu1 %v739_v17  ;;  %401 = vmatpush.bf16.msra.mxu2 %v743_v21  ;;  %v691_v34 = vor.u32 %v869_v30, %v690_v28  ;;  %v630_v35 = vld [vmem:[%s1283_s1] sm:$0xf]  ;;  %v855_v36 = vld [vmem:[%s1283_s1 + $0x30] sm:$0xf0]  ;;  %v849_v37 = vld [vmem:[%s1283_s1 + $0x4] sm:$0xf]  ;;  %v695_v38 = vor.u32 %v863_v31, %v692_v32 }
   0xa   :  { %414 = vmatpush.bf16.msra.mxu3 %v747_v25  ;;  %v632_v39 = vld [vmem:[%s1283_s1 + $0x34] sm:$0xf0]  ;;  %v638_v40 = vld [vmem:[%s1283_s1 + $0x8] sm:$0xf]  ;;  %v856_v41 = vld [vmem:[%s1283_s1 + $0x38] sm:$0xf0]  ;;  %v631_v44 = vor.u32 %v855_v36, %v630_v35 }
   0xb   :  { %v850_v42 = vld [vmem:[%s1283_s1 + $0xc] sm:$0xf]  ;;  %v640_v43 = vld [vmem:[%s1283_s1 + $0x3c] sm:$0xf0]  ;;  %v802_v45 = vld [vmem:[%s1283_s1 + $0x148] sm:$0xf]  ;;  %v635_v48 = vor.u32 %v849_v37, %v632_v39  ;;  %v639_v49 = vor.u32 %v856_v41, %v638_v40 }
   0xc   :  { %376 = vmatpush.bf16.msra.mxu0 %v683_v29  ;;  %v896_v46 = vld [vmem:[%s1283_s1 + $0x178] sm:$0xf0]  ;;  %v890_v47 = vld [vmem:[%s1283_s1 + $0x14c] sm:$0xf]  ;;  %v804_v50 = vld [vmem:[%s1283_s1 + $0x17c] sm:$0xf0]  ;;  %v643_v51 = vor.u32 %v850_v42, %v640_v43 }
   0xd   :  { %389 = vmatpush.bf16.msra.mxu1 %v687_v33  ;;  %402 = vmatpush.bf16.msra.mxu2 %v691_v34  ;;  %v803_v52 = vor.u32 %v896_v46, %v802_v45  ;;  %v810_v53 = vld [vmem:[%s1283_s1 + $0x150] sm:$0xf]  ;;  %v897_v54 = vld [vmem:[%s1283_s1 + $0x180] sm:$0xf0]  ;;  %v891_v55 = vld [vmem:[%s1283_s1 + $0x154] sm:$0xf]  ;;  %v807_v56 = vor.u32 %v890_v47, %v804_v50 }
   0xe   :  { %415 = vmatpush.bf16.msra.mxu3 %v695_v38  ;;  %v812_v57 = vld [vmem:[%s1283_s1 + $0x184] sm:$0xf0]  ;;  %v750_v58 = vld [vmem:[%s1283_s1 + $0xe0] sm:$0xf]  ;;  %v883_v59 = vld [vmem:[%s1283_s1 + $0x110] sm:$0xf0]  ;;  %v811_v63 = vor.u32 %v897_v54, %v810_v53 }
   0xf   :  { %v1050_v60 = vld [vmem:[%s1284_s0] sm:$0x1]  ;;  %v877_v61 = vld [vmem:[%s1283_s1 + $0xe4] sm:$0xf]  ;;  %v752_v62 = vld [vmem:[%s1283_s1 + $0x114] sm:$0xf0]  ;;  %v815_v0 = vor.u32 %v891_v55, %v812_v57  ;;  %v751_v1 = vor.u32 %v883_v59, %v750_v58 }
  0x10   :  { %377 = vmatpush.bf16.msra.mxu0 %v631_v44  ;;  %v758_v2 = vld [vmem:[%s1283_s1 + $0xe8] sm:$0xf]  ;;  %v884_v3 = vld [vmem:[%s1283_s1 + $0x118] sm:$0xf0]  ;;  %v878_v4 = vld [vmem:[%s1283_s1 + $0xec] sm:$0xf]  ;;  %v755_v5 = vor.u32 %v877_v61, %v752_v62 }
  0x11   :  { %390 = vmatpush.bf16.msra.mxu1 %v635_v48  ;;  %403 = vmatpush.bf16.msra.mxu2 %v639_v49  ;;  %v760_v6 = vld [vmem:[%s1283_s1 + $0x11c] sm:$0xf0]  ;;  %v698_v7 = vld [vmem:[%s1283_s1 + $0x78] sm:$0xf]  ;;  %v870_v8 = vld [vmem:[%s1283_s1 + $0xa8] sm:$0xf0]  ;;  %v759_v11 = vor.u32 %v884_v3, %v758_v2 }
  0x12   :  { %416 = vmatpush.bf16.msra.mxu3 %v643_v51  ;;  %v864_v9 = vld [vmem:[%s1283_s1 + $0x7c] sm:$0xf]  ;;  %v700_v10 = vld [vmem:[%s1283_s1 + $0xac] sm:$0xf0]  ;;  %v706_v12 = vld [vmem:[%s1283_s1 + $0x80] sm:$0xf]  ;;  %v763_v13 = vor.u32 %v878_v4, %v760_v6  ;;  %v699_v14 = vor.u32 %v870_v8, %v698_v7 }
  0x13   :  { %836 = vmatmul.msk.bf16.vlgmr.msra.gmra.mxu0 %vm366_vm0, %v1050_v60  ;;  %v871_v15 = vld [vmem:[%s1283_s1 + $0xb0] sm:$0xf0]  ;;  %v865_v16 = vld [vmem:[%s1283_s1 + $0x84] sm:$0xf]  ;;  %v708_v17 = vld [vmem:[%s1283_s1 + $0xb4] sm:$0xf0]  ;;  %v703_v18 = vor.u32 %v864_v9, %v700_v10 }
  0x14   :  { %426 = vmatpush.bf16.msrb.mxu0 %v803_v52  ;;  %837 = vmatmul.msk.bf16.vlgmr.msra.gmra.mxu1 %vm366_vm0, %v1050_v60  ;;  %v646_v19 = vld [vmem:[%s1283_s1 + $0x10] sm:$0xf]  ;;  %v857_v20 = vld [vmem:[%s1283_s1 + $0x40] sm:$0xf0]  ;;  %v851_v21 = vld [vmem:[%s1283_s1 + $0x14] sm:$0xf]  ;;  %v707_v25 = vor.u32 %v871_v15, %v706_v12  ;;  %v711_v28 = vor.u32 %v865_v16, %v708_v17 }
  0x15   :  { %439 = vmatpush.bf16.msrb.mxu1 %v807_v56  ;;  %838 = vmatmul.msk.bf16.vlgmr.msra.gmra.mxu2 %vm366_vm0, %v1050_v60  ;;  %v648_v22 = vld [vmem:[%s1283_s1 + $0x44] sm:$0xf0]  ;;  %v818_v23 = vld [vmem:[%s1283_s1 + $0x158] sm:$0xf]  ;;  %v898_v24 = vld [vmem:[%s1283_s1 + $0x188] sm:$0xf0]  ;;  %v647_v29 = vor.u32 %v857_v20, %v646_v19 }
  0x16   :  { %839 = vmatmul.msk.bf16.vlgmr.msra.gmra.mxu3 %vm366_vm0, %v1050_v60  ;;  %452 = vmatpush.bf16.msrb.mxu2 %v811_v63  ;;  %v892_v26 = vld [vmem:[%s1283_s1 + $0x15c] sm:$0xf]  ;;  %v820_v27 = vld [vmem:[%s1283_s1 + $0x18c] sm:$0xf0]  ;;  %v654_v30 = vld [vmem:[%s1283_s1 + $0x18] sm:$0xf]  ;;  %v651_v33 = vor.u32 %v851_v21, %v648_v22  ;;  %v819_v35 = vor.u32 %v898_v24, %v818_v23 }
  0x17   :  { %465 = vmatpush.bf16.msrb.mxu3 %v815_v0  ;;  %v858_v31 = vld [vmem:[%s1283_s1 + $0x48] sm:$0xf0]  ;;  %v852_v32 = vld [vmem:[%s1283_s1 + $0x1c] sm:$0xf]  ;;  %v656_v34 = vld [vmem:[%s1283_s1 + $0x4c] sm:$0xf0]  ;;  %v823_v38 = vor.u32 %v892_v26, %v820_v27 }
  0x18   :  { %427 = vmatpush.bf16.msrb.mxu0 %v751_v1  ;;  %v826_v36 = vld [vmem:[%s1283_s1 + $0x160] sm:$0xf]  ;;  %v899_v37 = vld [vmem:[%s1283_s1 + $0x190] sm:$0xf0]  ;;  %v893_v39 = vld [vmem:[%s1283_s1 + $0x164] sm:$0xf]  ;;  %v655_v41 = vor.u32 %v858_v31, %v654_v30  ;;  %v659_v42 = vor.u32 %v852_v32, %v656_v34 }
  0x19   :  { %440 = vmatpush.bf16.msrb.mxu1 %v755_v5  ;;  %v828_v40 = vld [vmem:[%s1283_s1 + $0x194] sm:$0xf0]  ;;  %v827_v43 = vor.u32 %v899_v37, %v826_v36  ;;  %v766_v44 = vld [vmem:[%s1283_s1 + $0xf0] sm:$0xf]  ;;  %v885_v45 = vld [vmem:[%s1283_s1 + $0x120] sm:$0xf0] }
  0x1a   :  { %453 = vmatpush.bf16.msrb.mxu2 %v759_v11  ;;  %v879_v46 = vld [vmem:[%s1283_s1 + $0xf4] sm:$0xf]  ;;  %v831_v47 = vor.u32 %v893_v39, %v828_v40  ;;  %v768_v48 = vld [vmem:[%s1283_s1 + $0x124] sm:$0xf0]  ;;  %v774_v49 = vld [vmem:[%s1283_s1 + $0xf8] sm:$0xf]  ;;  %v767_v53 = vor.u32 %v885_v45, %v766_v44 }
  0x1b   :  { %466 = vmatpush.bf16.msrb.mxu3 %v763_v13  ;;  %v886_v50 = vld [vmem:[%s1283_s1 + $0x128] sm:$0xf0]  ;;  %v880_v51 = vld [vmem:[%s1283_s1 + $0xfc] sm:$0xf]  ;;  %v776_v52 = vld [vmem:[%s1283_s1 + $0x12c] sm:$0xf0]  ;;  %v771_v54 = vor.u32 %v879_v46, %v768_v48 }
  0x1c   :  { %428 = vmatpush.bf16.msrb.mxu0 %v699_v14  ;;  %v775_v55 = vor.u32 %v886_v50, %v774_v49  ;;  %v714_v56 = vld [vmem:[%s1283_s1 + $0x88] sm:$0xf]  ;;  %v872_v57 = vld [vmem:[%s1283_s1 + $0xb8] sm:$0xf0]  ;;  %v866_v58 = vld [vmem:[%s1283_s1 + $0x8c] sm:$0xf]  ;;  %v779_v59 = vor.u32 %v880_v51, %v776_v52 }
  0x1d   :  { %441 = vmatpush.bf16.msrb.mxu1 %v703_v18  ;;  %v716_v61 = vld [vmem:[%s1283_s1 + $0xbc] sm:$0xf0]  ;;  %v722_v62 = vld [vmem:[%s1283_s1 + $0x90] sm:$0xf]  ;;  %v873_v63 = vld [vmem:[%s1283_s1 + $0xc0] sm:$0xf0]  ;;  %v715_v2 = vor.u32 %v872_v57, %v714_v56 }
  0x1e   :  { %454 = vmatpush.bf16.msrb.mxu2 %v707_v25  ;;  %v867_v0 = vld [vmem:[%s1283_s1 + $0x94] sm:$0xf]  ;;  %v724_v1 = vld [vmem:[%s1283_s1 + $0xc4] sm:$0xf0]  ;;  %v662_v3 = vld [vmem:[%s1283_s1 + $0x20] sm:$0xf]  ;;  %v719_v4 = vor.u32 %v866_v58, %v716_v61  ;;  %v723_v5 = vor.u32 %v873_v63, %v722_v62 }
  0x1f   :  { %467 = vmatpush.bf16.msrb.mxu3 %v711_v28  ;;  %v859_v6 = vld [vmem:[%s1283_s1 + $0x50] sm:$0xf0]  ;;  %v853_v7 = vld [vmem:[%s1283_s1 + $0x24] sm:$0xf]  ;;  %v664_v8 = vld [vmem:[%s1283_s1 + $0x54] sm:$0xf0]  ;;  %v727_v9 = vor.u32 %v867_v0, %v724_v1 }
  0x20   :  { %429 = vmatpush.bf16.msrb.mxu0 %v647_v29  ;;  %v670_v10 = vld [vmem:[%s1283_s1 + $0x28] sm:$0xf]  ;;  %v860_v11 = vld [vmem:[%s1283_s1 + $0x58] sm:$0xf0]  ;;  %v854_v12 = vld [vmem:[%s1283_s1 + $0x2c] sm:$0xf]  ;;  %v663_v16 = vor.u32 %v859_v6, %v662_v3  ;;  %v667_v17 = vor.u32 %v853_v7, %v664_v8 }
  0x21   :  { %442 = vmatpush.bf16.msrb.mxu1 %v651_v33  ;;  %v672_v13 = vld [vmem:[%s1283_s1 + $0x5c] sm:$0xf0]  ;;  %v834_v14 = vld [vmem:[%s1283_s1 + $0x168] sm:$0xf]  ;;  %v900_v15 = vld [vmem:[%s1283_s1 + $0x198] sm:$0xf0]  ;;  %v671_v18 = vor.u32 %v860_v11, %v670_v10 }
  0x22   :  { %455 = vmatpush.bf16.msrb.mxu2 %v655_v41  ;;  %v675_v19 = vor.u32 %v854_v12, %v672_v13  ;;  %v835_v20 = vor.u32 %v900_v15, %v834_v14  ;;  %v782_v21 = vld [vmem:[%s1283_s1 + $0x100] sm:$0xf]  ;;  %v887_v22 = vld [vmem:[%s1283_s1 + $0x130] sm:$0xf0]  ;;  %v730_v24 = vld [vmem:[%s1283_s1 + $0x98] sm:$0xf] }
  0x23   :  { %468 = vmatpush.bf16.msrb.mxu3 %v659_v42  ;;  %840 = vmatmul.msk.bf16.vlgmr.msrb.gmra.mxu0 %vm366_vm0, %v1050_v60  ;;  %v783_v23 = vor.u32 %v887_v22, %v782_v21  ;;  %v874_v25 = vld [vmem:[%s1283_s1 + $0xc8] sm:$0xf0]  ;;  %v678_v27 = vld [vmem:[%s1283_s1 + $0x30] sm:$0xf]  ;;  %v861_v28 = vld [vmem:[%s1283_s1 + $0x60] sm:$0xf0] }
  0x24   :  { %478 = vmatpush.bf16.msra.mxu0 %v819_v35  ;;  %841 = vmatmul.msk.bf16.vlgmr.msrb.gmra.mxu1 %vm366_vm0, %v1050_v60  ;;  %v731_v26 = vor.u32 %v874_v25, %v730_v24  ;;  %v679_v29 = vor.u32 %v861_v28, %v678_v27  ;;  %v72_v36 = vld [vmem:[%s1285_s2] sm:$0xff]  ;;  %vm588_vm4 = vcmask 1044484   ;;  %vm592_vm5 = vcmask 1046534  }
  0x25   :  { %491 = vmatpush.bf16.msra.mxu1 %v823_v38  ;;  %842 = vmatmul.msk.bf16.vlgmr.msrb.gmra.mxu2 %vm366_vm0, %v1050_v60  ;;  %v78_v37 = vperm.slane %v72_v36, 2  ;;  %v79_v38 = vperm.slane %v72_v36, 3  ;;  %v76_v39 = vperm.slane %v72_v36, 0  ;;  %v77_v40 = vperm.slane %v72_v36, 1 }
  0x26   :  { %504 = vmatpush.bf16.msra.mxu2 %v827_v43  ;;  %843 = vmatmul.msk.bf16.vlgmr.msrb.gmra.mxu3 %vm366_vm0, %v1050_v60  ;;  %v80_v41 = vperm.slane %v72_v36, 4  ;;  %v81_v42 = vperm.slane %v72_v36, 5  ;;  %vm596_vm6 = vcmask 1045508   ;;  %vm598_vm7 = vcmask 1043456  }
  0x27   :  { %517 = vmatpush.bf16.msra.mxu3 %v831_v47  ;;  %vm617_vm8 = vcmask 1041409   ;;  %vm605_vm10 = vcmask 1043459   ;;  %vm621_vm13 = vcmask 258052   ;;  %vm609_vm14 = vcmask 1044483  }
  0x28   :  { %479 = vmatpush.bf16.msra.mxu0 %v767_v53  ;;  %vm618_vm9 = vmor %vm617_vm8, %vm578_vm2  ;;  %vm612_vm15 = vcmask 1042432  }
  0x29   :  { %492 = vmatpush.bf16.msra.mxu1 %v771_v54  ;;  %v82_v54 = vperm.slane %v72_v36, 6  ;;  %vm619_vm11 = vmor %vm582_vm1, %vm618_vm9 }
  0x2a   :  { %505 = vmatpush.bf16.msra.mxu2 %v775_v55  ;;  %v83_v55 = vperm.slane %v72_v36, 7  ;;  %vm620_vm12 = vmor %vm605_vm10, %vm619_vm11 }
  0x2b   :  { %518 = vmatpush.bf16.msra.mxu3 %v779_v59 }
  0x2c   :  { %480 = vmatpush.bf16.msra.mxu0 %v715_v2 }
  0x2d   :  { %493 = vmatpush.bf16.msra.mxu1 %v719_v4 }
  0x2e   :  { %506 = vmatpush.bf16.msra.mxu2 %v723_v5 }
  0x2f   :  { %519 = vmatpush.bf16.msra.mxu3 %v727_v9 }
  0x30   :  { %481 = vmatpush.bf16.msra.mxu0 %v663_v16 }
  0x31   :  { %494 = vmatpush.bf16.msra.mxu1 %v667_v17 }
  0x32   :  { %507 = vmatpush.bf16.msra.mxu2 %v671_v18 }
  0x33   :  { %520 = vmatpush.bf16.msra.mxu3 %v675_v19  ;;  %844 = vmatmul.msk.bf16.vlgmr.msra.gmra.mxu0 %vm366_vm0, %v1050_v60 }
  0x34   :  { %530 = vmatpush.bf16.msrb.mxu0 %v835_v20  ;;  %845 = vmatmul.msk.bf16.vlgmr.msra.gmra.mxu1 %vm366_vm0, %v1050_v60 }
  0x35   :  { %846 = vmatmul.msk.bf16.vlgmr.msra.gmra.mxu2 %vm366_vm0, %v1050_v60 }
  0x36   :  { %847 = vmatmul.msk.bf16.vlgmr.msra.gmra.mxu3 %vm366_vm0, %v1050_v60 }
  0x38   :  { %531 = vmatpush.bf16.msrb.mxu0 %v783_v23 }
  0x3c   :  { %532 = vmatpush.bf16.msrb.mxu0 %v731_v26  ;;  %v73_v26 = vld [vmem:[%s1285_s2 + $0x8] sm:$0x1f] }
  0x3d   :  { %v84_v28 = vperm.slane %v73_v26, 0 }
  0x40   :  { %533 = vmatpush.bf16.msrb.mxu0 %v679_v29  ;;  %v85_v29 = vperm.slane %v73_v26, 1 }
  0x43   :  { %848 = vmatmul.msk.bf16.vlgmr.msrb.gmra.mxu0 %vm366_vm0, %v1050_v60  ;;  %vm622_vm0 = vmor %vm621_vm13, %vm620_vm12 }
  0x90   :  { %v379_v30 = vpop.f32.mrf.mxu0 }
  0x91   :  { %v392_v31 = vpop.f32.mrf.mxu1  ;;  %v380_v47 = vadd.f32 %v379_v30, %v76_v39  ;;  %v86_v30 = vperm.slane %v73_v26, 2 }
  0x92   :  { %v393_v48 = vadd.f32 %v392_v31, %v77_v40  ;;  %v87_v31 = vperm.slane %v73_v26, 3 }
  0x93   :  { %v539_v56 = vmax.f32 %v380_v47, 0.0 }
  0x94   :  { %v540_v57 = vmax.f32 %v393_v48, 0.0 }
  0x96   :  { %v552_v2 = vpack.c.bf16 %v540_v57, %v539_v56 }
  0x98   :  { %v405_v32 = vpop.f32.mrf.mxu2  ;;  %v381_v34 = vpop.f32.mrf.mxu0  ;;  %v566_v10 = vrot.slane %v552_v2, 3 }
  0x99   :  { %v418_v33 = vpop.f32.mrf.mxu3  ;;  %v394_v35 = vpop.f32.mrf.mxu1  ;;  %v406_v43 = vadd.f32 %v405_v32, %v78_v37 }
  0x9a   :  { %v419_v44 = vadd.f32 %v418_v33, %v79_v38  ;;  %v581_v20 = vsel %vm578_vm2, %v552_v2, %v566_v10 }
  0x9b   :  { %v541_v52 = vmax.f32 %v406_v43, 0.0 }
  0x9c   :  { %v542_v53 = vmax.f32 %v419_v44, 0.0 }
  0x9e   :  { %v553_v61 = vpack.c.bf16 %v542_v53, %v541_v52 }
  0xa0   :  { %v407_v45 = vpop.f32.mrf.mxu2  ;;  %v431_v46 = vpop.f32.mrf.mxu0  ;;  %v567_v7 = vrot.slane %v553_v61, 6  ;;  %v568_v8 = vrot.slane %v553_v61, 1 }
  0xa1   :  { %v420_v60 = vpop.f32.mrf.mxu3  ;;  %v432_v49 = vadd.f32 %v431_v46, %v80_v41  ;;  %v444_v50 = vpop.f32.mrf.mxu1 }
  0xa2   :  { %v445_v51 = vadd.f32 %v444_v50, %v81_v42  ;;  %v585_v14 = vsel %vm582_vm1, %v567_v7, %v568_v8  ;;  %v88_v42 = vperm.slane %v73_v26, 4 }
  0xa3   :  { %v543_v58 = vmax.f32 %v432_v49, 0.0  ;;  %v587_v24 = vsel %vm586_vm3, %v581_v20, %v585_v14 }
  0xa4   :  { %v544_v59 = vmax.f32 %v445_v51, 0.0 }
  0xa6   :  { %v554_v3 = vpack.c.bf16 %v544_v59, %v543_v58 }
  0xa8   :  { %v457_v62 = vpop.f32.mrf.mxu2  ;;  %v433_v1 = vpop.f32.mrf.mxu0  ;;  %v569_v11 = vrot.slane %v554_v3, 4  ;;  %v570_v12 = vrot.slane %v554_v3, 7 }
  0xa9   :  { %v458_v63 = vadd.f32 %v457_v62, %v82_v54  ;;  %v470_v0 = vpop.f32.mrf.mxu3  ;;  %v446_v5 = vpop.f32.mrf.mxu1 }
  0xaa   :  { %v471_v4 = vadd.f32 %v470_v0, %v83_v55  ;;  %v591_v21 = vsel %vm588_vm4, %v569_v11, %v570_v12 }
  0xab   :  { %v545_v6 = vmax.f32 %v458_v63, 0.0 }
  0xac   :  { %v546_v9 = vmax.f32 %v471_v4, 0.0 }
  0xae   :  { %v555_v13 = vpack.c.bf16 %v546_v9, %v545_v6 }
  0xb0   :  { %v571_v15 = vrot.slane %v555_v13, 2  ;;  %v572_v16 = vrot.slane %v555_v13, 5  ;;  %v459_v17 = vpop.f32.mrf.mxu2  ;;  %v483_v19 = vpop.f32.mrf.mxu0 }
  0xb1   :  { %v472_v18 = vpop.f32.mrf.mxu3  ;;  %v496_v23 = vpop.f32.mrf.mxu1  ;;  %v484_v35 = vadd.f32 %v483_v19, %v84_v28 }
  0xb2   :  { %v595_v22 = vsel %vm592_vm5, %v571_v15, %v572_v16  ;;  %v497_v36 = vadd.f32 %v496_v23, %v85_v29 }
  0xb3   :  { %v597_v25 = vsel %vm596_vm6, %v591_v21, %v595_v22  ;;  %v547_v40 = vmax.f32 %v484_v35, 0.0 }
  0xb4   :  { %v599_v27 = vsel %vm598_vm7, %v587_v24, %v597_v25  ;;  %v548_v41 = vmax.f32 %v497_v36, 0.0 }
  0xb5   :  { %616 = vst [vmem:[%s1286_s3] sm:$0xff] %v599_v27 }
  0xb6   :  { %v556_v47 = vpack.c.bf16 %v548_v41, %v547_v40 }
  0xb8   :  { %v509_v32 = vpop.f32.mrf.mxu2  ;;  %v485_v34 = vpop.f32.mrf.mxu0  ;;  %v573_v51 = vrot.slane %v556_v47, 3 }
  0xb9   :  { %v522_v33 = vpop.f32.mrf.mxu3  ;;  %v498_v37 = vpop.f32.mrf.mxu1  ;;  %v510_v38 = vadd.f32 %v509_v32, %v86_v30 }
  0xba   :  { %v523_v39 = vadd.f32 %v522_v33, %v87_v31  ;;  %v602_v58 = vsel %vm578_vm2, %v556_v47, %v573_v51 }
  0xbb   :  { %v549_v43 = vmax.f32 %v510_v38, 0.0 }
  0xbc   :  { %v550_v44 = vmax.f32 %v523_v39, 0.0 }
  0xbe   :  { %v557_v49 = vpack.c.bf16 %v550_v44, %v549_v43 }
  0xc0   :  { %v511_v45 = vpop.f32.mrf.mxu2  ;;  %v535_v46 = vpop.f32.mrf.mxu0  ;;  %v575_v52 = vrot.slane %v557_v49, 1  ;;  %v574_v54 = vrot.slane %v557_v49, 6 }
  0xc1   :  { %v524_v60 = vpop.f32.mrf.mxu3  ;;  %v536_v48 = vadd.f32 %v535_v46, %v88_v42 }
  0xc2   :  { %v604_v61 = vsel %vm586_vm3, %v602_v58, %v574_v54 }
  0xc3   :  { %v551_v50 = vmax.f32 %v536_v48, 0.0 }
  0xc5   :  { %v558_v53 = vpack.c.bf16 %v551_v50, %v551_v50 }
  0xc7   :  { %v576_v55 = vrot.slane %v558_v53, 4  ;;  %v577_v56 = vrot.slane %v558_v53, 7 }
  0xc8   :  { %v537_v57 = vpop.f32.mrf.mxu0 }
  0xc9   :  { %v608_v59 = vsel %vm605_vm10, %v575_v52, %v576_v55 }
  0xca   :  { %v611_v62 = vsel %vm609_vm14, %v608_v59, %v577_v56 }
  0xcb   :  { %v613_v63 = vsel %vm612_vm15, %v604_v61, %v611_v62 }
  0xcc   :  { %623 = vst.msk [vmem:[%s1286_s3 + $0x8] sm:$0x1f] %vm622_vm0, %v613_v63 }

// kernel: autoencoder_forward.8
= control target key start
LH: loop header
LB: loop body
LE: loop exit
PB: predicated region body
PF: predicated region fallthrough
CT: control target
= control target key end

     0   :  { %vm834_vm0 = vcmask 261120   ;;  %vm1007_vm1 = vcmask 516096   ;;  %s1843_s1 = inlined_call_operand.vmem [shape: bf16[1568,64], index: 1, kind: input, shape index: {}]   ;;  %s1844_s0 = inlined_call_operand.vmem [shape: bf16[2,1568], index: 0, kind: input, shape index: {}]   ;;  %s1845_s2 = inlined_call_operand.vmem [shape: f32[1,64], index: 2, kind: input, shape index: {}]   ;;  %s1846_s3 = inlined_call_operand.vmem [shape: bf16[2,64], index: 3, kind: output, shape index: {}]  }
   0x1   :  { %v1413_v0 = vld [vmem:[%s1843_s1 + $0x38] sm:$0xff]  ;;  %v1412_v4 = vld [vmem:[%s1843_s1 + $0x30] sm:$0xff]  ;;  %v1411_v8 = vld [vmem:[%s1843_s1 + $0x28] sm:$0xff] }
   0x2   :  { %v1429_v1 = vld [vmem:[%s1843_s1 + $0xb8] sm:$0xff]  ;;  %837 = vmatpush.bf16.msra.mxu0 %v1413_v0  ;;  %v1428_v5 = vld [vmem:[%s1843_s1 + $0xb0] sm:$0xff]  ;;  %v1427_v9 = vld [vmem:[%s1843_s1 + $0xa8] sm:$0xff] }
   0x3   :  { %v1421_v2 = vld [vmem:[%s1843_s1 + $0x78] sm:$0xff]  ;;  %863 = vmatpush.bf16.msra.mxu2 %v1429_v1  ;;  %v1420_v6 = vld [vmem:[%s1843_s1 + $0x70] sm:$0xff]  ;;  %v1419_v10 = vld [vmem:[%s1843_s1 + $0x68] sm:$0xff] }
   0x4   :  { %v1437_v3 = vld [vmem:[%s1843_s1 + $0xf8] sm:$0xff]  ;;  %850 = vmatpush.bf16.msra.mxu1 %v1421_v2  ;;  %v1436_v7 = vld [vmem:[%s1843_s1 + $0xf0] sm:$0xff]  ;;  %v1435_v11 = vld [vmem:[%s1843_s1 + $0xe8] sm:$0xff] }
   0x5   :  { %876 = vmatpush.bf16.msra.mxu3 %v1437_v3  ;;  %v1410_v12 = vld [vmem:[%s1843_s1 + $0x20] sm:$0xff]  ;;  %v1409_v16 = vld [vmem:[%s1843_s1 + $0x18] sm:$0xff]  ;;  %v1408_v21 = vld [vmem:[%s1843_s1 + $0x10] sm:$0xff] }
   0x6   :  { %838 = vmatpush.bf16.msra.mxu0 %v1412_v4  ;;  %v1426_v13 = vld [vmem:[%s1843_s1 + $0xa0] sm:$0xff]  ;;  %v1425_v17 = vld [vmem:[%s1843_s1 + $0x98] sm:$0xff]  ;;  %v1424_v22 = vld [vmem:[%s1843_s1 + $0x90] sm:$0xff] }
   0x7   :  { %864 = vmatpush.bf16.msra.mxu2 %v1428_v5  ;;  %v1418_v14 = vld [vmem:[%s1843_s1 + $0x60] sm:$0xff]  ;;  %v1417_v18 = vld [vmem:[%s1843_s1 + $0x58] sm:$0xff]  ;;  %v1416_v23 = vld [vmem:[%s1843_s1 + $0x50] sm:$0xff] }
   0x8   :  { %851 = vmatpush.bf16.msra.mxu1 %v1420_v6  ;;  %v1434_v15 = vld [vmem:[%s1843_s1 + $0xe0] sm:$0xff]  ;;  %v1433_v19 = vld [vmem:[%s1843_s1 + $0xd8] sm:$0xff]  ;;  %v1432_v24 = vld [vmem:[%s1843_s1 + $0xd0] sm:$0xff] }
   0x9   :  { %877 = vmatpush.bf16.msra.mxu3 %v1436_v7  ;;  %v15_v20 = vld [vmem:[%s1844_s0] sm:$0xff]  ;;  %v1407_v25 = vld [vmem:[%s1843_s1 + $0x8] sm:$0xff]  ;;  %v1445_v31 = vld [vmem:[%s1843_s1 + $0x138] sm:$0xff] }
   0xa   :  { %839 = vmatpush.bf16.msra.mxu0 %v1411_v8  ;;  %218 = vst [vmem:[#allocation1] ss:$9 sm:$0xff] %v15_v20  ;;  %v1423_v26 = vld [vmem:[%s1843_s1 + $0x88] sm:$0xff]  ;;  %v1406_v29 = vld [vmem:[%s1843_s1] sm:$0xff]  ;;  %v1461_v32 = vld [vmem:[%s1843_s1 + $0x1b8] sm:$0xff] }
   0xb   :  { %865 = vmatpush.bf16.msra.mxu2 %v1427_v9  ;;  %v1415_v27 = vld [vmem:[%s1843_s1 + $0x48] sm:$0xff]  ;;  %v1422_v30 = vld [vmem:[%s1843_s1 + $0x80] sm:$0xff]  ;;  %v1453_v35 = vld [vmem:[%s1843_s1 + $0x178] sm:$0xff] }
   0xc   :  { %852 = vmatpush.bf16.msra.mxu1 %v1419_v10  ;;  %v1431_v28 = vld [vmem:[%s1843_s1 + $0xc8] sm:$0xff]  ;;  %v1414_v33 = vld [vmem:[%s1843_s1 + $0x40] sm:$0xff]  ;;  %v1469_v36 = vld [vmem:[%s1843_s1 + $0x1f8] sm:$0xff] }
   0xd   :  { %878 = vmatpush.bf16.msra.mxu3 %v1435_v11  ;;  %v1430_v34 = vld [vmem:[%s1843_s1 + $0xc0] sm:$0xff]  ;;  %v1444_v37 = vld [vmem:[%s1843_s1 + $0x130] sm:$0xff]  ;;  %v16_v45 = vld [vmem:[%s1844_s0 + $0x8] sm:$0x1f] }
   0xe   :  { %840 = vmatpush.bf16.msra.mxu0 %v1410_v12  ;;  %v1460_v38 = vld [vmem:[%s1843_s1 + $0x1b0] sm:$0xff]  ;;  %v1443_v46 = vld [vmem:[%s1843_s1 + $0x128] sm:$0xff]  ;;  %v1442_v54 = vld [vmem:[%s1843_s1 + $0x120] sm:$0xff] }
   0xf   :  { %866 = vmatpush.bf16.msra.mxu2 %v1426_v13  ;;  %v1452_v41 = vld [vmem:[%s1843_s1 + $0x170] sm:$0xff]  ;;  %v1459_v47 = vld [vmem:[%s1843_s1 + $0x1a8] sm:$0xff]  ;;  %v1458_v55 = vld [vmem:[%s1843_s1 + $0x1a0] sm:$0xff] }
  0x10   :  { %853 = vmatpush.bf16.msra.mxu1 %v1418_v14  ;;  %v1468_v42 = vld [vmem:[%s1843_s1 + $0x1f0] sm:$0xff]  ;;  %v1451_v52 = vld [vmem:[%s1843_s1 + $0x168] sm:$0xff]  ;;  %v1450_v56 = vld [vmem:[%s1843_s1 + $0x160] sm:$0xff] }
  0x11   :  { %879 = vmatpush.bf16.msra.mxu3 %v1434_v15  ;;  %v221_v39 = vld [vmem:[#allocation1 + $0x12] sm:$0xff]  ;;  %v219_v40 = vld [vmem:[#allocation1] sm:$0xff]  ;;  %v220_v44 = vld [vmem:[#allocation1 + $0x9] sm:$0xff] }
  0x12   :  { %841 = vmatpush.bf16.msra.mxu0 %v1409_v16  ;;  %v222_v43 = vld [vmem:[#allocation1 + $0x1b] sm:$0xff]  ;;  %v1659_v49 = vld [vmem:[#allocation1 + $0x24] sm:$0xff]  ;;  %v1663_v51 = vld [vmem:[#allocation1 + $0x2d] sm:$0xff] }
  0x13   :  { %867 = vmatpush.bf16.msra.mxu2 %v1425_v17  ;;  %v1657_v48 = vld [vmem:[#allocation1 + $0x36] sm:$0xff]  ;;  %v1661_v50 = vld [vmem:[#allocation1 + $0x3f] sm:$0xff]  ;;  %v1467_v53 = vld [vmem:[%s1843_s1 + $0x1e8] sm:$0xff] }
  0x14   :  { %854 = vmatpush.bf16.msra.mxu1 %v1417_v18  ;;  %228 = vst [vmem:[#allocation1] ss:$9 sm:$0xff] %v16_v45  ;;  %v1466_v57 = vld [vmem:[%s1843_s1 + $0x1e0] sm:$0xff]  ;;  %v1441_v58 = vld [vmem:[%s1843_s1 + $0x118] sm:$0xff]  ;;  %v1440_v62 = vld [vmem:[%s1843_s1 + $0x110] sm:$0xff] }
  0x15   :  { %880 = vmatpush.bf16.msra.mxu3 %v1433_v19  ;;  %v1457_v59 = vld [vmem:[%s1843_s1 + $0x198] sm:$0xff]  ;;  %v1456_v63 = vld [vmem:[%s1843_s1 + $0x190] sm:$0xff]  ;;  %v1439_v2 = vld [vmem:[%s1843_s1 + $0x108] sm:$0xff] }
  0x16   :  { %842 = vmatpush.bf16.msra.mxu0 %v1408_v21  ;;  %v1449_v60 = vld [vmem:[%s1843_s1 + $0x158] sm:$0xff]  ;;  %v1448_v0 = vld [vmem:[%s1843_s1 + $0x150] sm:$0xff]  ;;  %v1455_v3 = vld [vmem:[%s1843_s1 + $0x188] sm:$0xff] }
  0x17   :  { %868 = vmatpush.bf16.msra.mxu2 %v1424_v22  ;;  %v1465_v61 = vld [vmem:[%s1843_s1 + $0x1d8] sm:$0xff]  ;;  %v1464_v1 = vld [vmem:[%s1843_s1 + $0x1d0] sm:$0xff]  ;;  %v1447_v4 = vld [vmem:[%s1843_s1 + $0x148] sm:$0xff] }
  0x18   :  { %855 = vmatpush.bf16.msra.mxu1 %v1416_v23  ;;  %v1463_v5 = vld [vmem:[%s1843_s1 + $0x1c8] sm:$0xff]  ;;  %v1438_v6 = vld [vmem:[%s1843_s1 + $0x100] sm:$0xff]  ;;  %v1477_v8 = vld [vmem:[%s1843_s1 + $0x238] sm:$0xff] }
  0x19   :  { %881 = vmatpush.bf16.msra.mxu3 %v1432_v24  ;;  %v1454_v7 = vld [vmem:[%s1843_s1 + $0x180] sm:$0xff]  ;;  %v1493_v9 = vld [vmem:[%s1843_s1 + $0x2b8] sm:$0xff]  ;;  %v1476_v14 = vld [vmem:[%s1843_s1 + $0x230] sm:$0xff] }
  0x1a   :  { %843 = vmatpush.bf16.msra.mxu0 %v1407_v25  ;;  %v1446_v10 = vld [vmem:[%s1843_s1 + $0x140] sm:$0xff]  ;;  %v1485_v12 = vld [vmem:[%s1843_s1 + $0x278] sm:$0xff]  ;;  %v1492_v15 = vld [vmem:[%s1843_s1 + $0x2b0] sm:$0xff] }
  0x1b   :  { %869 = vmatpush.bf16.msra.mxu2 %v1423_v26  ;;  %v1462_v11 = vld [vmem:[%s1843_s1 + $0x1c0] sm:$0xff]  ;;  %v1501_v13 = vld [vmem:[%s1843_s1 + $0x2f8] sm:$0xff]  ;;  %v1484_v16 = vld [vmem:[%s1843_s1 + $0x270] sm:$0xff] }
  0x1c   :  { %856 = vmatpush.bf16.msra.mxu1 %v1415_v27  ;;  %v1500_v17 = vld [vmem:[%s1843_s1 + $0x2f0] sm:$0xff]  ;;  %v1475_v18 = vld [vmem:[%s1843_s1 + $0x228] sm:$0xff]  ;;  %v1474_v22 = vld [vmem:[%s1843_s1 + $0x220] sm:$0xff] }
  0x1d   :  { %882 = vmatpush.bf16.msra.mxu3 %v1431_v28  ;;  %v1491_v19 = vld [vmem:[%s1843_s1 + $0x2a8] sm:$0xff]  ;;  %v1490_v23 = vld [vmem:[%s1843_s1 + $0x2a0] sm:$0xff]  ;;  %v1473_v26 = vld [vmem:[%s1843_s1 + $0x218] sm:$0xff] }
  0x1e   :  { %844 = vmatpush.bf16.msra.mxu0 %v1406_v29  ;;  %v1483_v20 = vld [vmem:[%s1843_s1 + $0x268] sm:$0xff]  ;;  %v1482_v24 = vld [vmem:[%s1843_s1 + $0x260] sm:$0xff]  ;;  %v1489_v27 = vld [vmem:[%s1843_s1 + $0x298] sm:$0xff] }
  0x1f   :  { %870 = vmatpush.bf16.msra.mxu2 %v1422_v30  ;;  %v1499_v21 = vld [vmem:[%s1843_s1 + $0x2e8] sm:$0xff]  ;;  %v1498_v25 = vld [vmem:[%s1843_s1 + $0x2e0] sm:$0xff]  ;;  %v1481_v28 = vld [vmem:[%s1843_s1 + $0x258] sm:$0xff] }
  0x20   :  { %857 = vmatpush.bf16.msra.mxu1 %v1414_v33  ;;  %v1497_v29 = vld [vmem:[%s1843_s1 + $0x2d8] sm:$0xff]  ;;  %v1472_v30 = vld [vmem:[%s1843_s1 + $0x210] sm:$0xff] }
  0x21   :  { %883 = vmatpush.bf16.msra.mxu3 %v1430_v34  ;;  %845 = vmatmul.bf16.vlgmr.msra.gmra.mxu0 %v219_v40  ;;  %v1496_v33 = vld [vmem:[%s1843_s1 + $0x2d0] sm:$0xff]  ;;  %v1471_v34 = vld [vmem:[%s1843_s1 + $0x208] sm:$0xff] }
  0x22   :  { %889 = vmatpush.bf16.msrb.mxu0 %v1445_v31  ;;  %871 = vmatmul.bf16.vlgmr.msra.gmra.mxu2 %v221_v39  ;;  %v1488_v31 = vld [vmem:[%s1843_s1 + $0x290] sm:$0xff]  ;;  %v1486_v39 = vld [vmem:[%s1843_s1 + $0x280] sm:$0xff]  ;;  %v1503_v40 = vld [vmem:[%s1843_s1 + $0x308] sm:$0xff] }
  0x23   :  { %915 = vmatpush.bf16.msrb.mxu2 %v1461_v32  ;;  %858 = vmatmul.bf16.vlgmr.msra.gmra.mxu1 %v220_v44  ;;  %v1480_v32 = vld [vmem:[%s1843_s1 + $0x250] sm:$0xff] }
  0x24   :  { %902 = vmatpush.bf16.msrb.mxu1 %v1453_v35  ;;  %884 = vmatmul.bf16.vlgmr.msra.gmra.mxu3 %v222_v43  ;;  %v1487_v35 = vld [vmem:[%s1843_s1 + $0x288] sm:$0xff]  ;;  %v229_v43 = vld [vmem:[#allocation1] sm:$0xff]  ;;  %v231_v44 = vld [vmem:[#allocation1 + $0x12] sm:$0xff] }
  0x25   :  { %928 = vmatpush.bf16.msrb.mxu3 %v1469_v36  ;;  %v1479_v36 = vld [vmem:[%s1843_s1 + $0x248] sm:$0xff] }
  0x26   :  { %890 = vmatpush.bf16.msrb.mxu0 %v1444_v37  ;;  %v1495_v37 = vld [vmem:[%s1843_s1 + $0x2c8] sm:$0xff] }
  0x27   :  { %916 = vmatpush.bf16.msrb.mxu2 %v1460_v38  ;;  %v1470_v38 = vld [vmem:[%s1843_s1 + $0x200] sm:$0xff]  ;;  %v230_v45 = vld [vmem:[#allocation1 + $0x9] sm:$0xff] }
  0x28   :  { %903 = vmatpush.bf16.msrb.mxu1 %v1452_v41  ;;  %v1478_v41 = vld [vmem:[%s1843_s1 + $0x240] sm:$0xff] }
  0x29   :  { %929 = vmatpush.bf16.msrb.mxu3 %v1468_v42  ;;  %v1494_v42 = vld [vmem:[%s1843_s1 + $0x2c0] sm:$0xff] }
  0x2a   :  { %891 = vmatpush.bf16.msrb.mxu0 %v1443_v46  ;;  %v232_v46 = vld [vmem:[#allocation1 + $0x1b] sm:$0xff] }
  0x2b   :  { %917 = vmatpush.bf16.msrb.mxu2 %v1459_v47  ;;  %v1502_v47 = vld [vmem:[%s1843_s1 + $0x300] sm:$0xff] }
  0x2c   :  { %904 = vmatpush.bf16.msrb.mxu1 %v1451_v52 }
  0x2d   :  { %930 = vmatpush.bf16.msrb.mxu3 %v1467_v53 }
  0x2e   :  { %892 = vmatpush.bf16.msrb.mxu0 %v1442_v54 }
  0x2f   :  { %918 = vmatpush.bf16.msrb.mxu2 %v1458_v55 }
  0x30   :  { %905 = vmatpush.bf16.msrb.mxu1 %v1450_v56 }
  0x31   :  { %931 = vmatpush.bf16.msrb.mxu3 %v1466_v57  ;;  %v1504_v57 = vld [vmem:[%s1845_s2] ss:$0 sm:$0xff] }
  0x32   :  { %893 = vmatpush.bf16.msrb.mxu0 %v1441_v58 }
  0x33   :  { %919 = vmatpush.bf16.msrb.mxu2 %v1457_v59 }
  0x34   :  { %906 = vmatpush.bf16.msrb.mxu1 %v1449_v60 }
  0x35   :  { %932 = vmatpush.bf16.msrb.mxu3 %v1465_v61 }
  0x36   :  { %894 = vmatpush.bf16.msrb.mxu0 %v1440_v62 }
  0x37   :  { %920 = vmatpush.bf16.msrb.mxu2 %v1456_v63 }
  0x38   :  { %907 = vmatpush.bf16.msrb.mxu1 %v1448_v0 }
  0x39   :  { %933 = vmatpush.bf16.msrb.mxu3 %v1464_v1 }
  0x3a   :  { %895 = vmatpush.bf16.msrb.mxu0 %v1439_v2 }
  0x3b   :  { %921 = vmatpush.bf16.msrb.mxu2 %v1455_v3 }
  0x3c   :  { %908 = vmatpush.bf16.msrb.mxu1 %v1447_v4 }
  0x3d   :  { %934 = vmatpush.bf16.msrb.mxu3 %v1463_v5 }
  0x3e   :  { %896 = vmatpush.bf16.msrb.mxu0 %v1438_v6 }
  0x3f   :  { %922 = vmatpush.bf16.msrb.mxu2 %v1454_v7 }
  0x40   :  { %909 = vmatpush.bf16.msrb.mxu1 %v1446_v10 }
  0x41   :  { %935 = vmatpush.bf16.msrb.mxu3 %v1462_v11  ;;  %897 = vmatmul.bf16.vlgmr.msrb.gmra.mxu0 %v1659_v49 }
  0x42   :  { %941 = vmatpush.bf16.msra.mxu0 %v1477_v8  ;;  %923 = vmatmul.bf16.vlgmr.msrb.gmra.mxu2 %v1657_v48  ;;  %v233_v48 = vld [vmem:[#allocation1 + $0x24] sm:$0xff] }
  0x43   :  { %967 = vmatpush.bf16.msra.mxu2 %v1493_v9  ;;  %910 = vmatmul.bf16.vlgmr.msrb.gmra.mxu1 %v1663_v51 }
  0x44   :  { %954 = vmatpush.bf16.msra.mxu1 %v1485_v12  ;;  %936 = vmatmul.bf16.vlgmr.msrb.gmra.mxu3 %v1661_v50 }
  0x45   :  { %980 = vmatpush.bf16.msra.mxu3 %v1501_v13 }
  0x46   :  { %942 = vmatpush.bf16.msra.mxu0 %v1476_v14 }
  0x47   :  { %968 = vmatpush.bf16.msra.mxu2 %v1492_v15 }
  0x48   :  { %955 = vmatpush.bf16.msra.mxu1 %v1484_v16 }
  0x49   :  { %981 = vmatpush.bf16.msra.mxu3 %v1500_v17 }
  0x4a   :  { %943 = vmatpush.bf16.msra.mxu0 %v1475_v18 }
  0x4b   :  { %969 = vmatpush.bf16.msra.mxu2 %v1491_v19 }
  0x4c   :  { %956 = vmatpush.bf16.msra.mxu1 %v1483_v20 }
  0x4d   :  { %982 = vmatpush.bf16.msra.mxu3 %v1499_v21 }
  0x4e   :  { %944 = vmatpush.bf16.msra.mxu0 %v1474_v22 }
  0x4f   :  { %970 = vmatpush.bf16.msra.mxu2 %v1490_v23 }
  0x50   :  { %957 = vmatpush.bf16.msra.mxu1 %v1482_v24 }
  0x51   :  { %983 = vmatpush.bf16.msra.mxu3 %v1498_v25 }
  0x52   :  { %945 = vmatpush.bf16.msra.mxu0 %v1473_v26 }
  0x53   :  { %971 = vmatpush.bf16.msra.mxu2 %v1489_v27 }
  0x54   :  { %958 = vmatpush.bf16.msra.mxu1 %v1481_v28 }
  0x55   :  { %984 = vmatpush.bf16.msra.mxu3 %v1497_v29 }
  0x56   :  { %946 = vmatpush.bf16.msra.mxu0 %v1472_v30 }
  0x57   :  { %972 = vmatpush.bf16.msra.mxu2 %v1488_v31 }
  0x58   :  { %959 = vmatpush.bf16.msra.mxu1 %v1480_v32 }
  0x59   :  { %985 = vmatpush.bf16.msra.mxu3 %v1496_v33 }
  0x5a   :  { %947 = vmatpush.bf16.msra.mxu0 %v1471_v34 }
  0x5b   :  { %973 = vmatpush.bf16.msra.mxu2 %v1487_v35 }
  0x5c   :  { %960 = vmatpush.bf16.msra.mxu1 %v1479_v36 }
  0x5d   :  { %986 = vmatpush.bf16.msra.mxu3 %v1495_v37 }
  0x5e   :  { %948 = vmatpush.bf16.msra.mxu0 %v1470_v38 }
  0x5f   :  { %974 = vmatpush.bf16.msra.mxu2 %v1486_v39 }
  0x60   :  { %961 = vmatpush.bf16.msra.mxu1 %v1478_v41 }
  0x61   :  { %987 = vmatpush.bf16.msra.mxu3 %v1494_v42  ;;  %949 = vmatmul.bf16.vlgmr.msra.gmra.mxu0 %v229_v43 }
  0x62   :  { %999 = vmatpush.bf16.msrb.mxu0 %v1503_v40  ;;  %975 = vmatmul.bf16.vlgmr.msra.gmra.mxu2 %v231_v44 }
  0x63   :  { %962 = vmatmul.bf16.vlgmr.msra.gmra.mxu1 %v230_v45 }
  0x64   :  { %988 = vmatmul.bf16.vlgmr.msra.gmra.mxu3 %v232_v46 }
  0x66   :  { %1000 = vmatpush.bf16.msrb.mxu0 %v1502_v47 }
  0x71   :  { %1405 = vmatmul.msk.bf16.vlgmr.msrb.gmra.mxu0 %vm834_vm0, %v233_v48 }
  0x9e   :  { %v846_v49 = vpop.f32.mrf.mxu0 }
  0x9f   :  { %v847_v60 = vadd.f32 %v1504_v57, %v846_v49 }
  0xa0   :  { %v859_v50 = vpop.f32.mrf.mxu1 }
  0xa1   :  { %v860_v62 = vadd.f32 %v859_v50, %v847_v60 }
  0xa5   :  { %v872_v51 = vpop.f32.mrf.mxu2 }
  0xa6   :  { %v848_v53 = vpop.f32.mrf.mxu0  ;;  %v873_v2 = vadd.f32 %v872_v51, %v860_v62 }
  0xa7   :  { %v885_v52 = vpop.f32.mrf.mxu3 }
  0xa8   :  { %v861_v54 = vpop.f32.mrf.mxu1  ;;  %v886_v4 = vadd.f32 %v885_v52, %v873_v2 }
  0xad   :  { %v874_v55 = vpop.f32.mrf.mxu2 }
  0xaf   :  { %v887_v56 = vpop.f32.mrf.mxu3 }
  0xbe   :  { %v898_v58 = vpop.f32.mrf.mxu0 }
  0xbf   :  { %v899_v6 = vadd.f32 %v898_v58, %v886_v4 }
  0xc0   :  { %v911_v59 = vpop.f32.mrf.mxu1 }
  0xc1   :  { %v912_v7 = vadd.f32 %v911_v59, %v899_v6 }
  0xc5   :  { %v924_v61 = vpop.f32.mrf.mxu2 }
  0xc6   :  { %v900_v0 = vpop.f32.mrf.mxu0  ;;  %v925_v8 = vadd.f32 %v924_v61, %v912_v7 }
  0xc7   :  { %v937_v63 = vpop.f32.mrf.mxu3 }
  0xc8   :  { %v913_v1 = vpop.f32.mrf.mxu1  ;;  %v938_v11 = vadd.f32 %v937_v63, %v925_v8 }
  0xcd   :  { %v926_v3 = vpop.f32.mrf.mxu2 }
  0xcf   :  { %v939_v5 = vpop.f32.mrf.mxu3 }
  0xde   :  { %v950_v9 = vpop.f32.mrf.mxu0 }
  0xdf   :  { %v951_v12 = vadd.f32 %v950_v9, %v938_v11 }
  0xe0   :  { %v963_v10 = vpop.f32.mrf.mxu1 }
  0xe1   :  { %v964_v16 = vadd.f32 %v963_v10, %v951_v12 }
  0xe5   :  { %v976_v13 = vpop.f32.mrf.mxu2 }
  0xe6   :  { %v952_v14 = vpop.f32.mrf.mxu0  ;;  %v977_v18 = vadd.f32 %v976_v13, %v964_v16 }
  0xe7   :  { %v989_v15 = vpop.f32.mrf.mxu3 }
  0xe8   :  { %v965_v17 = vpop.f32.mrf.mxu1  ;;  %v990_v20 = vadd.f32 %v989_v15, %v977_v18 }
  0xed   :  { %v978_v19 = vpop.f32.mrf.mxu2 }
  0xee   :  { %v1002_v22 = vpop.f32.mrf.mxu0 }
  0xef   :  { %v991_v21 = vpop.f32.mrf.mxu3  ;;  %v1003_v23 = vadd.f32 %v1002_v22, %v990_v20 }
  0xf1   :  { %v1006_v24 = vpack.c.bf16 %v1003_v23, %v1003_v23 }
  0xf3   :  { %1008 = vst.msk [vmem:[%s1846_s3] sm:$0x1] %vm1007_vm1, %v1006_v24 }
  0xf6   :  { %v1004_v25 = vpop.f32.mrf.mxu0 }

// kernel: autoencoder_forward.10
= control target key start
LH: loop header
LB: loop body
LE: loop exit
PB: predicated region body
PF: predicated region fallthrough
CT: control target
= control target key end

     0   :  { %s1305_s12 = smov 0   ;;  %s1584_s0 = inlined_call_operand.vmem [shape: bf16[400,288], index: 0, kind: input, shape index: {}]   ;;  %s1585_s1 = inlined_call_operand.vmem [shape: bf16[288,16], index: 1, kind: input, shape index: {}]   ;;  %s1586_s2 = inlined_call_operand.vmem [shape: f32[1,16], index: 2, kind: input, shape index: {}]   ;;  %s1587_s3 = inlined_call_operand.vmem [shape: bf16[400,16], index: 3, kind: output, shape index: {}]  }
   0x1 LB: > { %s957_s13 = sadd.s32 4294967295, %s1283_s12   ;;  %p961_p0 = scmp.ge.s32.totalorder %s1283_s12, 1  ;;  %s1283_s12 = sphi %s1305_s12, %s13_s12  }
   0x2   : > { %p139_p1 = scmp.lt.s32.totalorder %s1283_s12, 3 }
   0x4   : > { %p140_p2 = pnand %p961_p0, %p139_p1 }
   0x5   : > { %s164_s20 = smul.u32 (!%p140_p2), 25, %s957_s13 }
   0x6   : > { %143 = sbr.rel (%p140_p2) target bundleno = 332 (0x14c), region = 32 }
   0x7   : > { %p165_p3 = scmp.lt.s32.totalorder (!%p140_p2), %s164_s20, 49 }
   0xb   : > { %v1238_v0 = vld [vmem:[%s1585_s1 + $0x38] sm:$0xff]  ;;  %v1324_v2 = vld [vmem:[%s1585_s1 + $0x88] sm:$0xff]  ;;  %v1237_v3 = vld [vmem:[%s1585_s1 + $0x30] sm:$0xff]  ;;  %s1589_s20 = smov (!%p165_p3, %s164_s20), 49  ;;  %vm566_vm0 = vcmask 261120   ;;  %vm875_vm1 = vcmask 125952  }
   0xc   : > { %v1319_v1 = vld [vmem:[%s1585_s1 + $0x78] sm:$0xff]  ;;  %606 = vmatpush.bf16.msra.mxu0 %v1238_v0  ;;  %1249 = vmatpush.bf16.msra.mxu3 %v1238_v0  ;;  %v1245_v4 = vld [vmem:[%s1585_s1 + $0x70] sm:$0xff]  ;;  %v1337_v5 = vld [vmem:[%s1585_s1 + $0x80] sm:$0xff]  ;;  %s1267_s29 = smul.u32 12, %s1589_s20  ;;  %s963_s5 = sshll.u32 %s1589_s20, 2 }
   0xd   : > { %679 = vmatpush.bf16.msra.mxu1 %v1319_v1  ;;  %758 = vmatpush.bf16.msra.mxu2 %v1324_v2  ;;  %v1236_v6 = vld [vmem:[%s1585_s1 + $0x28] sm:$0xff]  ;;  %v1235_v11 = vld [vmem:[%s1585_s1 + $0x20] sm:$0xff]  ;;  %v1234_v13 = vld [vmem:[%s1585_s1 + $0x18] sm:$0xff]  ;;  %s1481_s9 = scalar_lea.vmem %s1587_s3, %s963_s5 }
   0xe   : > { %v1244_v7 = vld [vmem:[%s1585_s1 + $0x68] sm:$0xff]  ;;  %s1352_s7 = scalar_lea.vmem %s1584_s0, %s1267_s29  ;;  %v1243_v12 = vld [vmem:[%s1585_s1 + $0x60] sm:$0xff]  ;;  %v1242_v14 = vld [vmem:[%s1585_s1 + $0x58] sm:$0xff] }
   0xf   : > { %v974_v8 = vld [vmem:[%s1352_s7 + $0x8] sm:$0xf]  ;;  %v1197_v9 = vld [vmem:[%s1352_s7 + $0x10] sm:$0xf0]  ;;  %v986_v17 = vld [vmem:[%s1352_s7 + $0x20] sm:$0xf] }
  0x10   : > { %607 = vmatpush.bf16.msra.mxu0 %v1237_v3  ;;  %1250 = vmatpush.bf16.msra.mxu3 %v1237_v3  ;;  %v975_v10 = vor.u32 %v1197_v9, %v974_v8  ;;  %v1233_v15 = vld [vmem:[%s1585_s1 + $0x10] sm:$0xff]  ;;  %v1200_v18 = vld [vmem:[%s1352_s7 + $0x28] sm:$0xf0]  ;;  %v1231_v22 = vld [vmem:[%s1585_s1] sm:$0xff] }
  0x11   : > { %680 = vmatpush.bf16.msra.mxu1 %v1245_v4  ;;  %759 = vmatpush.bf16.msra.mxu2 %v1337_v5  ;;  %v1241_v16 = vld [vmem:[%s1585_s1 + $0x50] sm:$0xff]  ;;  %v1232_v19 = vld [vmem:[%s1585_s1 + $0x8] sm:$0xff]  ;;  %v987_v21 = vor.u32 %v1200_v18, %v986_v17  ;;  %v966_v23 = vld [vmem:[%s1352_s7] sm:$0xf] }
  0x12   : > { %v1240_v20 = vld [vmem:[%s1585_s1 + $0x48] sm:$0xff]  ;;  %v1086_v25 = vld [vmem:[%s1352_s7 + $0xf0] sm:$0xf]  ;;  %v1226_v26 = vld [vmem:[%s1352_s7 + $0xf8] sm:$0xf0] }
  0x13   : > { %v1196_v24 = vld [vmem:[%s1352_s7 + $0x8] sm:$0xf0]  ;;  %v1239_v27 = vld [vmem:[%s1585_s1 + $0x40] sm:$0xff]  ;;  %v968_v29 = vld [vmem:[%s1352_s7 + $0xc] sm:$0xf0]  ;;  %v1087_v31 = vor.u32 %v1226_v26, %v1086_v25 }
  0x14   : > { %608 = vmatpush.bf16.msra.mxu0 %v1236_v6  ;;  %1251 = vmatpush.bf16.msra.mxu3 %v1236_v6  ;;  %v1195_v28 = vld [vmem:[%s1352_s7 + $0x4] sm:$0xf]  ;;  %v967_v30 = vor.u32 %v1196_v24, %v966_v23  ;;  %v998_v33 = vld [vmem:[%s1352_s7 + $0x38] sm:$0xf]  ;;  %v1098_v38 = vld [vmem:[%s1352_s7 + $0x108] sm:$0xf] }
  0x15   : > { %681 = vmatpush.bf16.msra.mxu1 %v1244_v7  ;;  %1180 = vmatmul.msk.bf16.vlgmr.msra.gmra.mxu2 %vm566_vm0, %v975_v10  ;;  %v971_v32 = vor.u32 %v1195_v28, %v968_v29  ;;  %v1203_v34 = vld [vmem:[%s1352_s7 + $0x40] sm:$0xf0]  ;;  %v978_v36 = vld [vmem:[%s1352_s7 + $0x18] sm:$0xf]  ;;  %v1229_v39 = vld [vmem:[%s1352_s7 + $0x110] sm:$0xf0] }
  0x16   : > { %v999_v35 = vor.u32 %v1203_v34, %v998_v33  ;;  %v1199_v37 = vld [vmem:[%s1352_s7 + $0x20] sm:$0xf0]  ;;  %v1198_v40 = vld [vmem:[%s1352_s7 + $0x1c] sm:$0xf]  ;;  %v980_v41 = vld [vmem:[%s1352_s7 + $0x24] sm:$0xf0]  ;;  %v1099_v43 = vor.u32 %v1229_v39, %v1098_v38 }
  0x17   : > { %v979_v42 = vor.u32 %v1199_v37, %v978_v36  ;;  %v983_v44 = vor.u32 %v1198_v40, %v980_v41  ;;  %v1010_v45 = vld [vmem:[%s1352_s7 + $0x50] sm:$0xf]  ;;  %v1206_v46 = vld [vmem:[%s1352_s7 + $0x58] sm:$0xf0]  ;;  %v226_v47 = vld [vmem:[%s1352_s7 + $0x120] sm:$0xff] }
  0x18   : > { %609 = vmatpush.bf16.msra.mxu0 %v1235_v11  ;;  %1252 = vmatpush.bf16.msra.mxu3 %v1235_v11  ;;  %v1011_v48 = vor.u32 %v1206_v46, %v1010_v45  ;;  %v390_v49 = vunpack.c.l.b16 %v226_v47  ;;  %v990_v50 = vld [vmem:[%s1352_s7 + $0x30] sm:$0xf]  ;;  %v1202_v51 = vld [vmem:[%s1352_s7 + $0x38] sm:$0xf0]  ;;  %v1201_v52 = vld [vmem:[%s1352_s7 + $0x34] sm:$0xf] }
  0x19   : > { %682 = vmatpush.bf16.msra.mxu1 %v1243_v12  ;;  %v992_v53 = vld [vmem:[%s1352_s7 + $0x3c] sm:$0xf0]  ;;  %v991_v54 = vor.u32 %v1202_v51, %v990_v50  ;;  %v1022_v57 = vld [vmem:[%s1352_s7 + $0x68] sm:$0xf]  ;;  %v1209_v58 = vld [vmem:[%s1352_s7 + $0x70] sm:$0xf0] }
  0x1a   : > { %v429_v55 = vpack.c.b16 %v390_v49, %v390_v49  ;;  %v995_v56 = vor.u32 %v1201_v52, %v992_v53  ;;  %v1023_v59 = vor.u32 %v1209_v58, %v1022_v57  ;;  %v1002_v60 = vld [vmem:[%s1352_s7 + $0x48] sm:$0xf]  ;;  %v1205_v61 = vld [vmem:[%s1352_s7 + $0x50] sm:$0xf0]  ;;  %v1088_v63 = vld [vmem:[%s1352_s7 + $0xfc] sm:$0xf0] }
  0x1b   : > { %v1225_v62 = vld [vmem:[%s1352_s7 + $0xf4] sm:$0xf]  ;;  %v1204_v0 = vld [vmem:[%s1352_s7 + $0x4c] sm:$0xf]  ;;  %v1014_v8 = vld [vmem:[%s1352_s7 + $0x60] sm:$0xf] }
  0x1c   : > { %610 = vmatpush.bf16.msra.mxu0 %v1234_v13  ;;  %1253 = vmatpush.bf16.msra.mxu3 %v1234_v13  ;;  %v1091_v3 = vor.u32 %v1225_v62, %v1088_v63  ;;  %v1212_v6 = vld [vmem:[%s1352_s7 + $0x88] sm:$0xf0]  ;;  %v1100_v11 = vld [vmem:[%s1352_s7 + $0x114] sm:$0xf0]  ;;  %v1016_v13 = vld [vmem:[%s1352_s7 + $0x6c] sm:$0xf0] }
  0x1d   : > { %683 = vmatpush.bf16.msra.mxu1 %v1242_v14  ;;  %v1208_v9 = vld [vmem:[%s1352_s7 + $0x68] sm:$0xf0]  ;;  %v1046_v17 = vld [vmem:[%s1352_s7 + $0x98] sm:$0xf]  ;;  %v1215_v18 = vld [vmem:[%s1352_s7 + $0xa0] sm:$0xf0] }
  0x1e   : > { %v1228_v10 = vld [vmem:[%s1352_s7 + $0x10c] sm:$0xf]  ;;  %v1210_v23 = vld [vmem:[%s1352_s7 + $0x7c] sm:$0xf]  ;;  %v1028_v24 = vld [vmem:[%s1352_s7 + $0x84] sm:$0xf0] }
  0x1f   : > { %v1058_v28 = vld [vmem:[%s1352_s7 + $0xb0] sm:$0xf]  ;;  %v1218_v29 = vld [vmem:[%s1352_s7 + $0xb8] sm:$0xf0]  ;;  %v1040_v36 = vld [vmem:[%s1352_s7 + $0x9c] sm:$0xf0] }
  0x20   : > { %611 = vmatpush.bf16.msra.mxu0 %v1233_v15  ;;  %1254 = vmatpush.bf16.msra.mxu3 %v1233_v15  ;;  %v1103_v15 = vor.u32 %v1228_v10, %v1100_v11  ;;  %v1106_v33 = vld [vmem:[%s1352_s7 + $0x110] sm:$0xf]  ;;  %v1230_v34 = vld [vmem:[%s1352_s7 + $0x118] sm:$0xf0]  ;;  %v1070_v40 = vld [vmem:[%s1352_s7 + $0xc8] sm:$0xf] }
  0x21   : > { %684 = vmatpush.bf16.msra.mxu1 %v1241_v16  ;;  %v1107_v38 = vor.u32 %v1230_v34, %v1106_v33  ;;  %v1221_v41 = vld [vmem:[%s1352_s7 + $0xd0] sm:$0xf0]  ;;  %v1050_v45 = vld [vmem:[%s1352_s7 + $0xa8] sm:$0xf]  ;;  %v1082_v53 = vld [vmem:[%s1352_s7 + $0xe0] sm:$0xf] }
  0x22   : > { %v1217_v46 = vld [vmem:[%s1352_s7 + $0xb0] sm:$0xf0]  ;;  %v1062_v57 = vld [vmem:[%s1352_s7 + $0xc0] sm:$0xf]  ;;  %v1220_v58 = vld [vmem:[%s1352_s7 + $0xc8] sm:$0xf0] }
  0x23   : > { %v1051_v49 = vor.u32 %v1217_v46, %v1050_v45  ;;  %v1063_v62 = vor.u32 %v1220_v58, %v1062_v57 }
  0x24   : > { %612 = vmatpush.bf16.msra.mxu0 %v1232_v19  ;;  %1255 = vmatpush.bf16.msra.mxu3 %v1232_v19  ;;  %v1047_v19 = vor.u32 %v1215_v18, %v1046_v17  ;;  %v1074_v17 = vld [vmem:[%s1352_s7 + $0xd8] sm:$0xf]  ;;  %v1223_v18 = vld [vmem:[%s1352_s7 + $0xe0] sm:$0xf0] }
  0x25   : > { %685 = vmatpush.bf16.msra.mxu1 %v1240_v20  ;;  %1181 = vmatmul.msk.bf16.gmra.mxu2 %vm566_vm0, %v987_v21  ;;  %v1026_v21 = vld [vmem:[%s1352_s7 + $0x78] sm:$0xf] }
  0x28   : > { %613 = vmatpush.bf16.msra.mxu0 %v1231_v22  ;;  %1256 = vmatpush.bf16.msra.mxu3 %v1231_v22  ;;  %v1211_v22 = vld [vmem:[%s1352_s7 + $0x80] sm:$0xf0] }
  0x29   : > { %686 = vmatpush.bf16.msra.mxu1 %v1239_v27  ;;  %v1027_v25 = vor.u32 %v1211_v22, %v1026_v21  ;;  %v1076_v21 = vld [vmem:[%s1352_s7 + $0xe4] sm:$0xf0] }
  0x2b   : > { %614 = vmatmul.bf16.vlgmr.msra.gmra.mxu0 %v967_v30  ;;  %664 = vmatmul.bf16.vlgmr.msra.gmra.mxu3 %v1087_v31  ;;  %v1059_v30 = vor.u32 %v1218_v29, %v1058_v28  ;;  %v1038_v31 = vld [vmem:[%s1352_s7 + $0x90] sm:$0xf] }
  0x2c   : > { %1257 = vmatpush.bf16.msrb.mxu3 %v1319_v1  ;;  %687 = vmatmul.bf16.vlgmr.msra.gmra.mxu1 %v971_v32  ;;  %v1004_v1 = vld [vmem:[%s1352_s7 + $0x54] sm:$0xf0]  ;;  %v1214_v32 = vld [vmem:[%s1352_s7 + $0x98] sm:$0xf0] }
  0x2d   : > { %v1039_v37 = vor.u32 %v1214_v32, %v1038_v31 }
  0x30   : > { %1258 = vmatpush.bf16.msrb.mxu3 %v1245_v4  ;;  %v1007_v4 = vor.u32 %v1204_v0, %v1004_v1 }
  0x34   : > { %1259 = vmatpush.bf16.msrb.mxu3 %v1244_v7 }
  0x35   : > { %1182 = vmatmul.msk.bf16.gmra.mxu2 %vm566_vm0, %v999_v35  ;;  %v1213_v35 = vld [vmem:[%s1352_s7 + $0x94] sm:$0xf] }
  0x36   : > { %v1043_v39 = vor.u32 %v1213_v35, %v1040_v36 }
  0x38   : > { %1260 = vmatpush.bf16.msrb.mxu3 %v1243_v12  ;;  %v1207_v12 = vld [vmem:[%s1352_s7 + $0x64] sm:$0xf] }
  0x3b   : > { %619 = vmatmul.bf16.gmra.mxu0 %v979_v42  ;;  %669 = vmatmul.bf16.gmra.mxu3 %v1099_v43  ;;  %v227_v42 = vld [vmem:[%s1352_s7 + $0x128] sm:$0xf]  ;;  %v1071_v43 = vor.u32 %v1221_v41, %v1070_v40 }
  0x3c   : > { %1261 = vmatpush.bf16.msrb.mxu3 %v1242_v14  ;;  %692 = vmatmul.bf16.gmra.mxu1 %v983_v44  ;;  %v1015_v14 = vor.u32 %v1208_v9, %v1014_v8  ;;  %v392_v44 = vunpack.c.l.b16 %v227_v42  ;;  %v1094_v8 = vld [vmem:[%s1352_s7 + $0xf8] sm:$0xf]  ;;  %v1227_v9 = vld [vmem:[%s1352_s7 + $0x100] sm:$0xf0] }
  0x3e   : > { %v431_v50 = vpack.c.b16 %v392_v44, %v392_v44 }
  0x40   : > { %1262 = vmatpush.bf16.msrb.mxu3 %v1241_v16  ;;  %v1019_v16 = vor.u32 %v1207_v12, %v1016_v13 }
  0x44   : > { %1263 = vmatpush.bf16.msrb.mxu3 %v1240_v20  ;;  %v391_v20 = vunpack.c.h.b16 %v226_v47  ;;  %v1216_v47 = vld [vmem:[%s1352_s7 + $0xac] sm:$0xf] }
  0x45   : > { %1183 = vmatmul.msk.bf16.gmra.mxu2 %vm566_vm0, %v1011_v48  ;;  %v1052_v48 = vld [vmem:[%s1352_s7 + $0xb4] sm:$0xf0] }
  0x46   : > { %v430_v26 = vpack.c.b16 %v391_v20, %v391_v20  ;;  %v1055_v51 = vor.u32 %v1216_v47, %v1052_v48  ;;  %v1222_v20 = vld [vmem:[%s1352_s7 + $0xdc] sm:$0xf] }
  0x48   : > { %1264 = vmatpush.bf16.msrb.mxu3 %v1239_v27  ;;  %v1031_v27 = vor.u32 %v1210_v23, %v1028_v24  ;;  %v1075_v24 = vor.u32 %v1223_v18, %v1074_v17 }
  0x4b   : > { %624 = vmatmul.bf16.gmra.mxu0 %v991_v54  ;;  %674 = vmatmul.bf16.gmra.mxu3 %v429_v55  ;;  %v1224_v54 = vld [vmem:[%s1352_s7 + $0xe8] sm:$0xf0] }
  0x4c   : > { %1265 = vmatpush.bf16.msra.mxu3 %v1324_v2  ;;  %697 = vmatmul.bf16.gmra.mxu1 %v995_v56  ;;  %v1003_v2 = vor.u32 %v1205_v61, %v1002_v60  ;;  %v1083_v56 = vor.u32 %v1224_v54, %v1082_v53  ;;  %v1219_v60 = vld [vmem:[%s1352_s7 + $0xc4] sm:$0xf]  ;;  %v1064_v61 = vld [vmem:[%s1352_s7 + $0xcc] sm:$0xf0] }
  0x4d   : > { %v1067_v0 = vor.u32 %v1219_v60, %v1064_v61 }
  0x50   : > { %1266 = vmatpush.bf16.msra.mxu3 %v1337_v5  ;;  %v1034_v5 = vld [vmem:[%s1352_s7 + $0x80] sm:$0xf] }
  0x51   : > { %v1035_v7 = vor.u32 %v1212_v6, %v1034_v5 }
  0x55   : > { %1184 = vmatmul.msk.bf16.gmra.mxu2 %vm566_vm0, %v1023_v59  ;;  %v1467_v59 = vld [vmem:[%s1586_s2] ss:$0 sm:$0xff] }
  0x5b   : > { %629 = vmatmul.bf16.gmra.mxu0 %v1003_v2  ;;  %737 = vmatmul.bf16.vlgmr.msrb.gmra.mxu3 %v1091_v3 }
  0x5c   : > { %702 = vmatmul.bf16.gmra.mxu1 %v1007_v4 }
  0x65   : > { %1185 = vmatmul.msk.bf16.gmra.mxu2 %vm566_vm0, %v1035_v7 }
  0x6b   : > { %634 = vmatmul.bf16.gmra.mxu0 %v1015_v14  ;;  %742 = vmatmul.bf16.gmra.mxu3 %v1103_v15  ;;  %v1095_v15 = vor.u32 %v1227_v9, %v1094_v8 }
  0x6c   : > { %707 = vmatmul.bf16.gmra.mxu1 %v1019_v16 }
  0x75   : > { %1186 = vmatmul.msk.bf16.gmra.mxu2 %vm566_vm0, %v1047_v19 }
  0x7b   : > { %639 = vmatmul.bf16.gmra.mxu0 %v1027_v25  ;;  %747 = vmatmul.bf16.gmra.mxu3 %v430_v26  ;;  %v1079_v26 = vor.u32 %v1222_v20, %v1076_v21 }
  0x7c   : > { %712 = vmatmul.bf16.gmra.mxu1 %v1031_v27 }
  0x85   : > { %1187 = vmatmul.msk.bf16.gmra.mxu2 %vm566_vm0, %v1059_v30 }
  0x8b   : > { %644 = vmatmul.bf16.gmra.mxu0 %v1039_v37  ;;  %1191 = vmatmul.msk.bf16.vlgmr.msra.gmra.mxu3 %vm566_vm0, %v1107_v38 }
  0x8c   : > { %717 = vmatmul.bf16.gmra.mxu1 %v1043_v39 }
  0x95   : > { %1188 = vmatmul.msk.bf16.gmra.mxu2 %vm566_vm0, %v1071_v43 }
  0x98   : > { %v761_v52 = vpop.f32.mrf.mxu2 }
  0x9b   : > { %649 = vmatmul.bf16.gmra.mxu0 %v1051_v49  ;;  %1192 = vmatmul.msk.bf16.gmra.mxu3 %vm566_vm0, %v431_v50 }
  0x9c   : > { %722 = vmatmul.bf16.gmra.mxu1 %v1055_v51 }
  0xa0   : > { %v763_v55 = vpop.f32.mrf.mxu2 }
  0xa5   : > { %1189 = vmatmul.msk.bf16.gmra.mxu2 %vm566_vm0, %v1083_v56 }
  0xa8   : > { %v615_v63 = vpop.f32.mrf.mxu0  ;;  %v766_v3 = vpop.f32.mrf.mxu2 }
  0xa9   : > { %v616_v1 = vadd.f32 %v1467_v59, %v615_v63  ;;  %v688_v2 = vpop.f32.mrf.mxu1 }
  0xab   : > { %v689_v4 = vadd.f32 %v688_v2, %v616_v1  ;;  %654 = vmatmul.bf16.gmra.mxu0 %v1063_v62 }
  0xac   : > { %727 = vmatmul.bf16.gmra.mxu1 %v1067_v0 }
  0xad   : > { %v762_v5 = vadd.f32 %v761_v52, %v689_v4 }
  0xae   : > { %v1474_v6 = vpop.f32.mrf.mxu3 }
  0xaf   : > { %v825_v7 = vmax.f32 %v762_v5, 0.0  ;;  %v666_v5 = vadd.f32 %v1467_v59, %v1474_v6 }
  0xb0   : > { %v617_v10 = vpop.f32.mrf.mxu0  ;;  %v768_v14 = vpop.f32.mrf.mxu2 }
  0xb1   : > { %v850_v11 = vpack.c.bf16 %v825_v7, %v825_v7  ;;  %v618_v12 = vadd.f32 %v1467_v59, %v617_v10  ;;  %v690_v13 = vpop.f32.mrf.mxu1 }
  0xb3   : > { %876 = vst.msk [vmem:[%s1481_s9] sm:$0xf] %vm875_vm1, %v850_v11  ;;  %v691_v16 = vadd.f32 %v690_v13, %v618_v12 }
  0xb5   : > { %v764_v19 = vadd.f32 %v763_v55, %v691_v16  ;;  %1190 = vmatmul.msk.bf16.gmra.mxu2 %vm566_vm0, %v1095_v15 }
  0xb6   : > { %v1491_v22 = vpop.f32.mrf.mxu3 }
  0xb7   : > { %v826_v23 = vmax.f32 %v764_v19, 0.0  ;;  %v668_v17 = vadd.f32 %v1467_v59, %v1491_v22 }
  0xb8   : > { %v620_v25 = vpop.f32.mrf.mxu0  ;;  %v771_v30 = vpop.f32.mrf.mxu2 }
  0xb9   : > { %v851_v27 = vpack.c.bf16 %v826_v23, %v826_v23  ;;  %v621_v28 = vadd.f32 %v1467_v59, %v620_v25  ;;  %v693_v29 = vpop.f32.mrf.mxu1 }
  0xbb   : > { %877 = vst.msk [vmem:[%s1481_s9 + $0x4] sm:$0xf] %vm875_vm1, %v851_v27  ;;  %v694_v31 = vadd.f32 %v693_v29, %v621_v28  ;;  %659 = vmatmul.bf16.gmra.mxu0 %v1075_v24 }
  0xbc   : > { %732 = vmatmul.bf16.gmra.mxu1 %v1079_v26 }
  0xbd   : > { %v767_v32 = vadd.f32 %v766_v3, %v694_v31 }
  0xbe   : > { %v1496_v33 = vpop.f32.mrf.mxu3 }
  0xbf   : > { %v827_v34 = vmax.f32 %v767_v32, 0.0 }
  0xc0   : > { %v622_v35 = vpop.f32.mrf.mxu0  ;;  %v773_v39 = vpop.f32.mrf.mxu2 }
  0xc1   : > { %v852_v36 = vpack.c.bf16 %v827_v34, %v827_v34  ;;  %v623_v37 = vadd.f32 %v1467_v59, %v622_v35  ;;  %v695_v38 = vpop.f32.mrf.mxu1 }
  0xc3   : > { %878 = vst.msk [vmem:[%s1481_s9 + $0x8] sm:$0xf] %vm875_vm1, %v852_v36  ;;  %v696_v40 = vadd.f32 %v695_v38, %v623_v37 }
  0xc5   : > { %v769_v41 = vadd.f32 %v768_v14, %v696_v40 }
  0xc6   : > { %v1501_v42 = vpop.f32.mrf.mxu3 }
  0xc7   : > { %v828_v43 = vmax.f32 %v769_v41, 0.0 }
  0xc8   : > { %v625_v44 = vpop.f32.mrf.mxu0  ;;  %v776_v48 = vpop.f32.mrf.mxu2 }
  0xc9   : > { %v853_v45 = vpack.c.bf16 %v828_v43, %v828_v43  ;;  %v626_v46 = vadd.f32 %v1467_v59, %v625_v44  ;;  %v698_v47 = vpop.f32.mrf.mxu1 }
  0xcb   : > { %879 = vst.msk [vmem:[%s1481_s9 + $0xc] sm:$0xf] %vm875_vm1, %v853_v45  ;;  %v699_v49 = vadd.f32 %v698_v47, %v626_v46 }
  0xcd   : > { %v772_v50 = vadd.f32 %v771_v30, %v699_v49 }
  0xce   : > { %v1506_v51 = vpop.f32.mrf.mxu3 }
  0xcf   : > { %v829_v52 = vmax.f32 %v772_v50, 0.0 }
  0xd0   : > { %v627_v53 = vpop.f32.mrf.mxu0  ;;  %v778_v57 = vpop.f32.mrf.mxu2 }
  0xd1   : > { %v854_v54 = vpack.c.bf16 %v829_v52, %v829_v52  ;;  %v628_v55 = vadd.f32 %v1467_v59, %v627_v53  ;;  %v700_v56 = vpop.f32.mrf.mxu1 }
  0xd3   : > { %880 = vst.msk [vmem:[%s1481_s9 + $0x10] sm:$0xf] %vm875_vm1, %v854_v54  ;;  %v701_v58 = vadd.f32 %v700_v56, %v628_v55 }
  0xd5   : > { %v774_v60 = vadd.f32 %v773_v39, %v701_v58 }
  0xd6   : > { %v677_v61 = vpop.f32.mrf.mxu3 }
  0xd7   : > { %v830_v62 = vmax.f32 %v774_v60, 0.0 }
  0xd8   : > { %v630_v63 = vpop.f32.mrf.mxu0  ;;  %v781_v3 = vpop.f32.mrf.mxu2 }
  0xd9   : > { %v855_v0 = vpack.c.bf16 %v830_v62, %v830_v62  ;;  %v631_v1 = vadd.f32 %v1467_v59, %v630_v63  ;;  %v703_v2 = vpop.f32.mrf.mxu1 }
  0xdb   : > { %881 = vst.msk [vmem:[%s1481_s9 + $0x14] sm:$0xf] %vm875_vm1, %v855_v0  ;;  %v704_v4 = vadd.f32 %v703_v2, %v631_v1  ;;  %v671_v2 = vadd.f32 %v1467_v59, %v1496_v33 }
  0xdd   : > { %v777_v7 = vadd.f32 %v776_v48, %v704_v4 }
  0xde   : > { %v738_v8 = vpop.f32.mrf.mxu3 }
  0xdf   : > { %v831_v9 = vmax.f32 %v777_v7, 0.0  ;;  %v1516_v10 = vadd.f32 %v738_v8, %v666_v5 }
  0xe0   : > { %v632_v11 = vpop.f32.mrf.mxu0  ;;  %v783_v15 = vpop.f32.mrf.mxu2 }
  0xe1   : > { %v856_v12 = vpack.c.bf16 %v831_v9, %v831_v9  ;;  %v633_v13 = vadd.f32 %v1467_v59, %v632_v11  ;;  %v705_v14 = vpop.f32.mrf.mxu1 }
  0xe3   : > { %882 = vst.msk [vmem:[%s1481_s9 + $0x18] sm:$0xf] %vm875_vm1, %v856_v12  ;;  %v706_v16 = vadd.f32 %v705_v14, %v633_v13 }
  0xe5   : > { %v779_v18 = vadd.f32 %v778_v57, %v706_v16 }
  0xe6   : > { %v740_v6 = vpop.f32.mrf.mxu3 }
  0xe7   : > { %v832_v19 = vmax.f32 %v779_v18, 0.0  ;;  %v1523_v20 = vadd.f32 %v740_v6, %v668_v17  ;;  %v673_v17 = vadd.f32 %v1467_v59, %v1501_v42 }
  0xe8   : > { %v635_v21 = vpop.f32.mrf.mxu0  ;;  %v786_v26 = vpop.f32.mrf.mxu2 }
  0xe9   : > { %v857_v23 = vpack.c.bf16 %v832_v19, %v832_v19  ;;  %v636_v24 = vadd.f32 %v1467_v59, %v635_v21  ;;  %v708_v25 = vpop.f32.mrf.mxu1 }
  0xeb   : > { %883 = vst.msk [vmem:[%s1481_s9 + $0x1c] sm:$0xf] %vm875_vm1, %v857_v23  ;;  %v709_v27 = vadd.f32 %v708_v25, %v636_v24 }
  0xed   : > { %v782_v28 = vadd.f32 %v781_v3, %v709_v27 }
  0xee   : > { %v743_v29 = vpop.f32.mrf.mxu3 }
  0xef   : > { %v833_v30 = vmax.f32 %v782_v28, 0.0  ;;  %v744_v4 = vadd.f32 %v743_v29, %v671_v2 }
  0xf0   : > { %v637_v22 = vpop.f32.mrf.mxu0  ;;  %v788_v35 = vpop.f32.mrf.mxu2 }
  0xf1   : > { %v858_v31 = vpack.c.bf16 %v833_v30, %v833_v30  ;;  %v638_v32 = vadd.f32 %v1467_v59, %v637_v22  ;;  %v710_v34 = vpop.f32.mrf.mxu1  ;;  %v676_v30 = vadd.f32 %v1467_v59, %v1506_v51 }
  0xf3   : > { %884 = vst.msk [vmem:[%s1481_s9 + $0x20] sm:$0xf] %vm875_vm1, %v858_v31  ;;  %v711_v36 = vadd.f32 %v710_v34, %v638_v32 }
  0xf5   : > { %v784_v37 = vadd.f32 %v783_v15, %v711_v36 }
  0xf6   : > { %v745_v38 = vpop.f32.mrf.mxu3 }
  0xf7   : > { %v834_v39 = vmax.f32 %v784_v37, 0.0  ;;  %v746_v6 = vadd.f32 %v745_v38, %v673_v17 }
  0xf8   : > { %v640_v40 = vpop.f32.mrf.mxu0  ;;  %v791_v45 = vpop.f32.mrf.mxu2 }
  0xf9   : > { %v859_v41 = vpack.c.bf16 %v834_v39, %v834_v39  ;;  %v641_v43 = vadd.f32 %v1467_v59, %v640_v40  ;;  %v713_v44 = vpop.f32.mrf.mxu1 }
  0xfb   : > { %885 = vst.msk [vmem:[%s1481_s9 + $0x24] sm:$0xf] %vm875_vm1, %v859_v41  ;;  %v714_v46 = vadd.f32 %v713_v44, %v641_v43 }
  0xfd   : > { %v787_v47 = vadd.f32 %v786_v26, %v714_v46 }
  0xfe   : > { %v748_v48 = vpop.f32.mrf.mxu3 }
  0xff   : > { %v835_v49 = vmax.f32 %v787_v47, 0.0  ;;  %v749_v32 = vadd.f32 %v748_v48, %v676_v30 }
 0x100   : > { %v642_v50 = vpop.f32.mrf.mxu0  ;;  %v793_v55 = vpop.f32.mrf.mxu2 }
 0x101   : > { %v860_v52 = vpack.c.bf16 %v835_v49, %v835_v49  ;;  %v643_v53 = vadd.f32 %v1467_v59, %v642_v50  ;;  %v715_v54 = vpop.f32.mrf.mxu1 }
 0x103   : > { %886 = vst.msk [vmem:[%s1481_s9 + $0x28] sm:$0xf] %vm875_vm1, %v860_v52  ;;  %v716_v56 = vadd.f32 %v715_v54, %v643_v53 }
 0x105   : > { %v789_v57 = vadd.f32 %v788_v35, %v716_v56 }
 0x106   : > { %v750_v58 = vpop.f32.mrf.mxu3 }
 0x107   : > { %v836_v60 = vmax.f32 %v789_v57, 0.0 }
 0x108   : > { %v645_v61 = vpop.f32.mrf.mxu0  ;;  %v796_v1 = vpop.f32.mrf.mxu2 }
 0x109   : > { %v861_v62 = vpack.c.bf16 %v836_v60, %v836_v60  ;;  %v646_v63 = vadd.f32 %v1467_v59, %v645_v61  ;;  %v718_v0 = vpop.f32.mrf.mxu1 }
 0x10b   : > { %887 = vst.msk [vmem:[%s1481_s9 + $0x2c] sm:$0xf] %vm875_vm1, %v861_v62  ;;  %v719_v3 = vadd.f32 %v718_v0, %v646_v63 }
 0x10d   : > { %v792_v5 = vadd.f32 %v791_v45, %v719_v3 }
 0x10e   : > { %v816_v7 = vpop.f32.mrf.mxu3 }
 0x10f   : > { %v837_v8 = vmax.f32 %v792_v5, 0.0  ;;  %v817_v9 = vadd.f32 %v816_v7, %v744_v4 }
 0x110   : > { %v647_v11 = vpop.f32.mrf.mxu0  ;;  %v798_v16 = vpop.f32.mrf.mxu2 }
 0x111   : > { %v862_v12 = vpack.c.bf16 %v837_v8, %v837_v8  ;;  %v847_v13 = vmax.f32 %v817_v9, 0.0  ;;  %v648_v14 = vadd.f32 %v1467_v59, %v647_v11  ;;  %v720_v15 = vpop.f32.mrf.mxu1 }
 0x113   : > { %888 = vst.msk [vmem:[%s1481_s9 + $0x30] sm:$0xf] %vm875_vm1, %v862_v12  ;;  %v872_v33 = vpack.c.bf16 %v847_v13, %v847_v13  ;;  %v721_v18 = vadd.f32 %v720_v15, %v648_v14 }
 0x115   : > { %898 = vst.msk [vmem:[%s1481_s9 + $0x58] sm:$0xf] %vm875_vm1, %v872_v33  ;;  %v794_v19 = vadd.f32 %v793_v55, %v721_v18 }
 0x116   : > { %v818_v21 = vpop.f32.mrf.mxu3 }
 0x117   : > { %v838_v23 = vmax.f32 %v794_v19, 0.0  ;;  %v819_v24 = vadd.f32 %v818_v21, %v746_v6 }
 0x118   : > { %v650_v25 = vpop.f32.mrf.mxu0  ;;  %v801_v42 = vpop.f32.mrf.mxu2 }
 0x119   : > { %v863_v26 = vpack.c.bf16 %v838_v23, %v838_v23  ;;  %v848_v27 = vmax.f32 %v819_v24, 0.0  ;;  %v651_v28 = vadd.f32 %v1467_v59, %v650_v25  ;;  %v723_v29 = vpop.f32.mrf.mxu1 }
 0x11b   : > { %889 = vst.msk [vmem:[%s1481_s9 + $0x34] sm:$0xf] %vm875_vm1, %v863_v26  ;;  %v873_v22 = vpack.c.bf16 %v848_v27, %v848_v27  ;;  %v724_v31 = vadd.f32 %v723_v29, %v651_v28 }
 0x11d   : > { %899 = vst.msk [vmem:[%s1481_s9 + $0x5c] sm:$0xf] %vm875_vm1, %v873_v22  ;;  %v797_v34 = vadd.f32 %v796_v1, %v724_v31 }
 0x11e   : > { %v821_v35 = vpop.f32.mrf.mxu3 }
 0x11f   : > { %v839_v36 = vmax.f32 %v797_v34, 0.0  ;;  %v822_v37 = vadd.f32 %v821_v35, %v749_v32 }
 0x120   : > { %v652_v38 = vpop.f32.mrf.mxu0  ;;  %v803_v43 = vpop.f32.mrf.mxu2 }
 0x121   : > { %v864_v39 = vpack.c.bf16 %v839_v36, %v839_v36  ;;  %v849_v40 = vmax.f32 %v822_v37, 0.0  ;;  %v653_v41 = vadd.f32 %v1467_v59, %v652_v38  ;;  %v725_v51 = vpop.f32.mrf.mxu1 }
 0x123   : > { %890 = vst.msk [vmem:[%s1481_s9 + $0x38] sm:$0xf] %vm875_vm1, %v864_v39  ;;  %v874_v44 = vpack.c.bf16 %v849_v40, %v849_v40  ;;  %v726_v45 = vadd.f32 %v725_v51, %v653_v41 }
 0x125   : > { %900 = vst.msk [vmem:[%s1481_s9 + $0x60] sm:$0xf] %vm875_vm1, %v874_v44  ;;  %v799_v46 = vadd.f32 %v798_v16, %v726_v45 }
 0x126   : > { %v823_v47 = vpop.f32.mrf.mxu3 }
 0x127   : > { %v840_v48 = vmax.f32 %v799_v46, 0.0 }
 0x128   : > { %v655_v49 = vpop.f32.mrf.mxu0  ;;  %v806_v54 = vpop.f32.mrf.mxu2 }
 0x129   : > { %v865_v50 = vpack.c.bf16 %v840_v48, %v840_v48  ;;  %v656_v52 = vadd.f32 %v1467_v59, %v655_v49  ;;  %v728_v53 = vpop.f32.mrf.mxu1 }
 0x12b   : > { %891 = vst.msk [vmem:[%s1481_s9 + $0x3c] sm:$0xf] %vm875_vm1, %v865_v50  ;;  %v729_v55 = vadd.f32 %v728_v53, %v656_v52 }
 0x12d   : > { %v802_v56 = vadd.f32 %v801_v42, %v729_v55 }
 0x12f   : > { %v841_v57 = vmax.f32 %v802_v56, 0.0 }
 0x130   : > { %v657_v58 = vpop.f32.mrf.mxu0  ;;  %v808_v63 = vpop.f32.mrf.mxu2 }
 0x131   : > { %v866_v60 = vpack.c.bf16 %v841_v57, %v841_v57  ;;  %v658_v61 = vadd.f32 %v1467_v59, %v657_v58  ;;  %v730_v62 = vpop.f32.mrf.mxu1 }
 0x133   : > { %892 = vst.msk [vmem:[%s1481_s9 + $0x40] sm:$0xf] %vm875_vm1, %v866_v60  ;;  %v731_v0 = vadd.f32 %v730_v62, %v658_v61 }
 0x135   : > { %v804_v1 = vadd.f32 %v803_v43, %v731_v0 }
 0x137   : > { %v842_v2 = vmax.f32 %v804_v1, 0.0 }
 0x138   : > { %v660_v3 = vpop.f32.mrf.mxu0  ;;  %v811_v8 = vpop.f32.mrf.mxu2 }
 0x139   : > { %v867_v4 = vpack.c.bf16 %v842_v2, %v842_v2  ;;  %v661_v5 = vadd.f32 %v1467_v59, %v660_v3  ;;  %v733_v7 = vpop.f32.mrf.mxu1  ;;  %v812_v9 = vadd.f32 %v811_v8, %v1516_v10 }
 0x13b   : > { %893 = vst.msk [vmem:[%s1481_s9 + $0x44] sm:$0xf] %vm875_vm1, %v867_v4  ;;  %v734_v11 = vadd.f32 %v733_v7, %v661_v5  ;;  %v845_v12 = vmax.f32 %v812_v9, 0.0 }
 0x13d   : > { %v807_v13 = vadd.f32 %v806_v54, %v734_v11  ;;  %v870_v14 = vpack.c.bf16 %v845_v12, %v845_v12 }
 0x13f   : > { %v843_v15 = vmax.f32 %v807_v13, 0.0  ;;  %896 = vst.msk [vmem:[%s1481_s9 + $0x50] sm:$0xf] %vm875_vm1, %v870_v14 }
 0x140   : > { %v662_v16 = vpop.f32.mrf.mxu0  ;;  %v813_v18 = vpop.f32.mrf.mxu2 }
 0x141   : > { %v868_v17 = vpack.c.bf16 %v843_v15, %v843_v15  ;;  %v663_v33 = vadd.f32 %v1467_v59, %v662_v16  ;;  %v735_v6 = vpop.f32.mrf.mxu1  ;;  %v814_v19 = vadd.f32 %v813_v18, %v1523_v20 }
 0x143   : > { %894 = vst.msk [vmem:[%s1481_s9 + $0x48] sm:$0xf] %vm875_vm1, %v868_v17  ;;  %v736_v10 = vadd.f32 %v735_v6, %v663_v33  ;;  %v846_v21 = vmax.f32 %v814_v19, 0.0 }
 0x145   : > { %v809_v23 = vadd.f32 %v808_v63, %v736_v10  ;;  %v871_v24 = vpack.c.bf16 %v846_v21, %v846_v21 }
 0x147   : > { %v844_v25 = vmax.f32 %v809_v23, 0.0  ;;  %897 = vst.msk [vmem:[%s1481_s9 + $0x54] sm:$0xf] %vm875_vm1, %v871_v24 }
 0x149   : > { %v869_v26 = vpack.c.bf16 %v844_v25, %v844_v25 }
 0x14b   : > { %895 = vst.msk [vmem:[%s1481_s9 + $0x4c] sm:$0xf] %vm875_vm1, %v869_v26 }
 0x14c PF: > { %s13_s12 = sadd.s32 1, %s1283_s12  }
 0x14d   : > { %p10_p4 = scmp.ge.s32.totalorder %s13_s12, 4  }
 0x14f   :  { %12 = sbr.rel (!%p10_p4) target bundleno = 1 (0x1), region = 62 }

// kernel: autoencoder_forward.11
= control target key start
LH: loop header
LB: loop body
LE: loop exit
PB: predicated region body
PF: predicated region fallthrough
CT: control target
= control target key end

     0   :  { %s2572_s14 = smov 0   ;;  %s3716_s0 = inlined_call_operand.vmem [shape: bf16[1568,144], index: 0, kind: input, shape index: {}]   ;;  %s3717_s1 = inlined_call_operand.vmem [shape: bf16[144,1], index: 1, kind: input, shape index: {}]   ;;  %s3718_s2 = inlined_call_operand.<no memory space> [shape: f32[1,1], index: 2, kind: input, shape index: {}]   ;;  %s3719_s3 = inlined_call_operand.vmem [shape: bf16[1568,1], index: 3, kind: output, shape index: {}]  }
   0x1   :  { %v8_v0 = vstv %s3718_s2 }
   0x2   :  { %9 = vst [vmem:[#allocation2] sm:$0x1] %v8_v0 }
   0x3 LB: > { %s1955_s15 = sadd.s32 4294967295, %s2547_s14   ;;  %p1959_p0 = scmp.ge.s32.totalorder %s2547_s14, 1  ;;  %s2547_s14 = sphi %s2572_s14, %s15_s14  }
   0x4   : > { %p141_p1 = scmp.lt.s32.totalorder %s2547_s14, 5 }
   0x6   : > { %p142_p2 = pnand %p1959_p0, %p141_p1 }
   0x7   : > { %s166_s19 = smul.u32 (!%p142_p2), 49, %s1955_s15 }
   0x8   : > { %145 = sbr.rel (%p142_p2) target bundleno = 453 (0x1c5), region = 32 }
   0x9   : > { %p167_p3 = scmp.lt.s32.totalorder (!%p142_p2), %s166_s19, 195 }
   0xd   : > { %v2323_v1 = vld [vmem:[%s3717_s1 + $0x38] sm:$0xff]  ;;  %v2324_v2 = vld [vmem:[%s3717_s1 + $0x40] sm:$0xff]  ;;  %v2322_v3 = vld [vmem:[%s3717_s1 + $0x30] sm:$0xff]  ;;  %s3787_s19 = smov (!%p167_p3, %s166_s19), 195  ;;  %vm527_vm0 = vcmask 130048   ;;  %vm1849_vm5 = vcmask 3072  }
   0xe   : > { %603 = vmatpush.bf16.msra.mxu0 %v2323_v1  ;;  %2325 = vmatpush.bf16.msra.mxu2 %v2323_v1  ;;  %v2321_v4 = vld [vmem:[%s3717_s1 + $0x28] sm:$0xff]  ;;  %s2267_s24 = sshll.u32 %s3787_s19, 3  ;;  %v2320_v8 = vld [vmem:[%s3717_s1 + $0x20] sm:$0xff]  ;;  %v2319_v9 = vld [vmem:[%s3717_s1 + $0x18] sm:$0xff]  ;;  %s1962_s11 = sshll.u32 %s3787_s19, 2 }
   0xf   : > { %743 = vmatpush.bf16.msra.mxu1 %v2324_v2  ;;  %2333 = vmatpush.bf16.msra.mxu3 %v2324_v2  ;;  %s2598_s27 = scalar_lea.vmem %s3716_s0, %s2267_s24  ;;  %v2318_v10 = vld [vmem:[%s3717_s1 + $0x10] sm:$0xff]  ;;  %v2317_v13 = vld [vmem:[%s3717_s1 + $0x8] sm:$0xff]  ;;  %v2316_v17 = vld [vmem:[%s3717_s1] sm:$0xff]  ;;  %s2761_s15 = scalar_lea.vmem %s3719_s3, %s1962_s11 }
  0x10   : > { %v2268_v5 = vld [vmem:[%s2598_s27 + $0x4] sm:$0xf]  ;;  %v1967_v6 = vld [vmem:[%s2598_s27 + $0x8] sm:$0xf0]  ;;  %v2270_v11 = vld [vmem:[%s2598_s27 + $0x14] sm:$0xf] }
  0x11   : > { %v1970_v7 = vor.u32 %v2268_v5, %v1967_v6  ;;  %v1975_v12 = vld [vmem:[%s2598_s27 + $0x18] sm:$0xf0]  ;;  %v2296_v15 = vld [vmem:[%s2598_s27 + $0xe4] sm:$0xf]  ;;  %v2079_v16 = vld [vmem:[%s2598_s27 + $0xe8] sm:$0xf0] }
  0x12   : > { %604 = vmatpush.bf16.msra.mxu0 %v2322_v3  ;;  %2326 = vmatpush.bf16.msra.mxu2 %v2322_v3  ;;  %v1978_v14 = vor.u32 %v2270_v11, %v1975_v12  ;;  %v1965_v18 = vld [vmem:[%s2598_s27] sm:$0xf]  ;;  %v2082_v19 = vor.u32 %v2296_v15, %v2079_v16  ;;  %v2269_v20 = vld [vmem:[%s2598_s27 + $0x4] sm:$0xf0]  ;;  %v2272_v25 = vld [vmem:[%s2598_s27 + $0x24] sm:$0xf] }
  0x13   : > { %2191 = vmatmul.msk.bf16.vlgmr.msra.gmra.mxu1 %vm527_vm0, %v1970_v7  ;;  %v2061_v21 = vld [vmem:[%s2598_s27 + $0xc0] sm:$0xf]  ;;  %v2293_v22 = vld [vmem:[%s2598_s27 + $0xc4] sm:$0xf0]  ;;  %v1966_v23 = vor.u32 %v2269_v20, %v1965_v18  ;;  %v1983_v26 = vld [vmem:[%s2598_s27 + $0x28] sm:$0xf0] }
  0x14   : > { %2205 = vmatmul.msk.bf16.vlgmr.msra.gmra.mxu3 %vm527_vm0, %v2082_v19  ;;  %v2062_v24 = vor.u32 %v2293_v22, %v2061_v21  ;;  %v1986_v27 = vor.u32 %v2272_v25, %v1983_v26  ;;  %v2298_v28 = vld [vmem:[%s2598_s27 + $0xf4] sm:$0xf]  ;;  %v2087_v29 = vld [vmem:[%s2598_s27 + $0xf8] sm:$0xf0]  ;;  %v1973_v30 = vld [vmem:[%s2598_s27 + $0x10] sm:$0xf] }
  0x15   : > { %v2090_v31 = vor.u32 %v2298_v28, %v2087_v29  ;;  %v2271_v32 = vld [vmem:[%s2598_s27 + $0x14] sm:$0xf0]  ;;  %v2069_v33 = vld [vmem:[%s2598_s27 + $0xd0] sm:$0xf]  ;;  %v2274_v37 = vld [vmem:[%s2598_s27 + $0x34] sm:$0xf] }
  0x16   : > { %605 = vmatpush.bf16.msra.mxu0 %v2321_v4  ;;  %2327 = vmatpush.bf16.msra.mxu2 %v2321_v4  ;;  %v2295_v34 = vld [vmem:[%s2598_s27 + $0xd4] sm:$0xf0]  ;;  %v1974_v35 = vor.u32 %v2271_v32, %v1973_v30  ;;  %v1991_v38 = vld [vmem:[%s2598_s27 + $0x38] sm:$0xf0]  ;;  %v2300_v40 = vld [vmem:[%s2598_s27 + $0x104] sm:$0xf] }
  0x17   : > { %v2070_v36 = vor.u32 %v2295_v34, %v2069_v33  ;;  %v1994_v39 = vor.u32 %v2274_v37, %v1991_v38  ;;  %v2095_v41 = vld [vmem:[%s2598_s27 + $0x108] sm:$0xf0]  ;;  %v1981_v42 = vld [vmem:[%s2598_s27 + $0x20] sm:$0xf]  ;;  %v2273_v44 = vld [vmem:[%s2598_s27 + $0x24] sm:$0xf0] }
  0x18   : > { %v2098_v43 = vor.u32 %v2300_v40, %v2095_v41  ;;  %v2077_v45 = vld [vmem:[%s2598_s27 + $0xe0] sm:$0xf]  ;;  %v2297_v46 = vld [vmem:[%s2598_s27 + $0xe4] sm:$0xf0]  ;;  %v1982_v47 = vor.u32 %v2273_v44, %v1981_v42  ;;  %v2276_v49 = vld [vmem:[%s2598_s27 + $0x44] sm:$0xf] }
  0x19   : > { %v2078_v48 = vor.u32 %v2297_v46, %v2077_v45  ;;  %v1999_v50 = vld [vmem:[%s2598_s27 + $0x48] sm:$0xf0]  ;;  %v2302_v52 = vld [vmem:[%s2598_s27 + $0x114] sm:$0xf]  ;;  %v2103_v53 = vld [vmem:[%s2598_s27 + $0x118] sm:$0xf0] }
  0x1a   : > { %606 = vmatpush.bf16.msra.mxu0 %v2320_v8  ;;  %2328 = vmatpush.bf16.msra.mxu2 %v2320_v8  ;;  %v2002_v51 = vor.u32 %v2276_v49, %v1999_v50  ;;  %v1989_v54 = vld [vmem:[%s2598_s27 + $0x30] sm:$0xf]  ;;  %v2106_v55 = vor.u32 %v2302_v52, %v2103_v53  ;;  %v2275_v56 = vld [vmem:[%s2598_s27 + $0x34] sm:$0xf0]  ;;  %v2278_v61 = vld [vmem:[%s2598_s27 + $0x54] sm:$0xf] }
  0x1b   : > { %v2085_v57 = vld [vmem:[%s2598_s27 + $0xf0] sm:$0xf]  ;;  %v2299_v58 = vld [vmem:[%s2598_s27 + $0xf4] sm:$0xf0]  ;;  %v1990_v59 = vor.u32 %v2275_v56, %v1989_v54  ;;  %v2007_v62 = vld [vmem:[%s2598_s27 + $0x58] sm:$0xf0] }
  0x1c   : > { %v2086_v60 = vor.u32 %v2299_v58, %v2085_v57  ;;  %v2010_v63 = vor.u32 %v2278_v61, %v2007_v62  ;;  %v2304_v0 = vld [vmem:[%s2598_s27 + $0x124] sm:$0xf]  ;;  %v2111_v1 = vld [vmem:[%s2598_s27 + $0x128] sm:$0xf0]  ;;  %v1997_v2 = vld [vmem:[%s2598_s27 + $0x40] sm:$0xf] }
  0x1d   : > { %v2114_v3 = vor.u32 %v2304_v0, %v2111_v1  ;;  %v2277_v4 = vld [vmem:[%s2598_s27 + $0x44] sm:$0xf0]  ;;  %v2093_v5 = vld [vmem:[%s2598_s27 + $0x100] sm:$0xf]  ;;  %v2306_v12 = vld [vmem:[%s2598_s27 + $0x134] sm:$0xf] }
  0x1e   : > { %607 = vmatpush.bf16.msra.mxu0 %v2319_v9  ;;  %2329 = vmatpush.bf16.msra.mxu2 %v2319_v9  ;;  %v2301_v6 = vld [vmem:[%s2598_s27 + $0x104] sm:$0xf0]  ;;  %v1998_v7 = vor.u32 %v2277_v4, %v1997_v2  ;;  %v2280_v9 = vld [vmem:[%s2598_s27 + $0x64] sm:$0xf]  ;;  %v2279_v15 = vld [vmem:[%s2598_s27 + $0x54] sm:$0xf0] }
  0x1f   : > { %v2094_v8 = vor.u32 %v2301_v6, %v2093_v5  ;;  %v2101_v16 = vld [vmem:[%s2598_s27 + $0x110] sm:$0xf]  ;;  %v2282_v21 = vld [vmem:[%s2598_s27 + $0x74] sm:$0xf]  ;;  %v2023_v22 = vld [vmem:[%s2598_s27 + $0x78] sm:$0xf0] }
  0x20   : > { %v2013_v25 = vld [vmem:[%s2598_s27 + $0x60] sm:$0xf]  ;;  %v2127_v26 = vld [vmem:[%s2598_s27 + $0x148] sm:$0xf0]  ;;  %v2305_v29 = vld [vmem:[%s2598_s27 + $0x124] sm:$0xf0] }
  0x21   : > { %v2109_v28 = vld [vmem:[%s2598_s27 + $0x120] sm:$0xf]  ;;  %v2284_v33 = vld [vmem:[%s2598_s27 + $0x84] sm:$0xf]  ;;  %v2031_v34 = vld [vmem:[%s2598_s27 + $0x88] sm:$0xf0] }
  0x22   : > { %608 = vmatpush.bf16.msra.mxu0 %v2318_v10  ;;  %2330 = vmatpush.bf16.msra.mxu2 %v2318_v10  ;;  %v2015_v10 = vld [vmem:[%s2598_s27 + $0x68] sm:$0xf0]  ;;  %v2110_v32 = vor.u32 %v2305_v29, %v2109_v28  ;;  %v2310_v37 = vld [vmem:[%s2598_s27 + $0x154] sm:$0xf]  ;;  %v2021_v38 = vld [vmem:[%s2598_s27 + $0x70] sm:$0xf] }
  0x23   : > { %2192 = vmatmul.msk.bf16.gmra.mxu1 %vm527_vm0, %v1978_v14  ;;  %v2018_v11 = vor.u32 %v2280_v9, %v2015_v10  ;;  %v2119_v14 = vld [vmem:[%s2598_s27 + $0x138] sm:$0xf0]  ;;  %v2283_v40 = vld [vmem:[%s2598_s27 + $0x74] sm:$0xf0]  ;;  %v2117_v41 = vld [vmem:[%s2598_s27 + $0x130] sm:$0xf] }
  0x24   : > { %2206 = vmatmul.msk.bf16.gmra.mxu3 %vm527_vm0, %v2090_v31  ;;  %v2122_v18 = vor.u32 %v2306_v12, %v2119_v14  ;;  %v2307_v42 = vld [vmem:[%s2598_s27 + $0x134] sm:$0xf0]  ;;  %v2022_v44 = vor.u32 %v2283_v40, %v2021_v38  ;;  %v2285_v52 = vld [vmem:[%s2598_s27 + $0x84] sm:$0xf0]  ;;  %v2312_v53 = vld [vmem:[%s2598_s27 + $0x164] sm:$0xf] }
  0x25   : > { %v2118_v45 = vor.u32 %v2307_v42, %v2117_v41  ;;  %v2125_v54 = vld [vmem:[%s2598_s27 + $0x140] sm:$0xf]  ;;  %v2143_v56 = vld [vmem:[%s2598_s27 + $0x168] sm:$0xf0]  ;;  %v2288_v4 = vld [vmem:[%s2598_s27 + $0xa4] sm:$0xf] }
  0x26   : > { %609 = vmatpush.bf16.msra.mxu0 %v2317_v13  ;;  %2331 = vmatpush.bf16.msra.mxu2 %v2317_v13  ;;  %v2005_v13 = vld [vmem:[%s2598_s27 + $0x50] sm:$0xf]  ;;  %v2707_v57 = vld [vmem:[#allocation2] ss:$0 sm:$0xff]  ;;  %v2146_v58 = vor.u32 %v2312_v53, %v2143_v56  ;;  %v2047_v5 = vld [vmem:[%s2598_s27 + $0xa8] sm:$0xf0] }
  0x27   : > { %v2006_v19 = vor.u32 %v2279_v15, %v2005_v13  ;;  %v2287_v12 = vld [vmem:[%s2598_s27 + $0x94] sm:$0xf0]  ;;  %v2133_v13 = vld [vmem:[%s2598_s27 + $0x150] sm:$0xf] }
  0x28   : > { %v2311_v14 = vld [vmem:[%s2598_s27 + $0x154] sm:$0xf0] }
  0x2a   : > { %610 = vmatpush.bf16.msra.mxu0 %v2316_v17  ;;  %2332 = vmatpush.bf16.msra.mxu2 %v2316_v17  ;;  %v2303_v17 = vld [vmem:[%s2598_s27 + $0x114] sm:$0xf0] }
  0x2b   : > { %v2102_v20 = vor.u32 %v2303_v17, %v2101_v16 }
  0x2d   : > { %611 = vmatmul.bf16.vlgmr.msra.gmra.mxu0 %v1966_v23  ;;  %671 = vmatmul.bf16.vlgmr.msra.gmra.mxu2 %v2062_v24  ;;  %v2026_v23 = vor.u32 %v2282_v21, %v2023_v22  ;;  %v2308_v24 = vld [vmem:[%s2598_s27 + $0x144] sm:$0xf]  ;;  %v2134_v22 = vor.u32 %v2311_v14, %v2133_v13 }
  0x2e   : > { %v2130_v30 = vor.u32 %v2308_v24, %v2127_v26 }
  0x33   : > { %2193 = vmatmul.msk.bf16.gmra.mxu1 %vm527_vm0, %v1986_v27  ;;  %v2281_v27 = vld [vmem:[%s2598_s27 + $0x64] sm:$0xf0] }
  0x34   : > { %2207 = vmatmul.msk.bf16.gmra.mxu3 %vm527_vm0, %v2098_v43  ;;  %v2014_v31 = vor.u32 %v2281_v27, %v2013_v25 }
  0x3d   : > { %616 = vmatmul.bf16.gmra.mxu0 %v1974_v35  ;;  %676 = vmatmul.bf16.gmra.mxu2 %v2070_v36  ;;  %v2034_v35 = vor.u32 %v2284_v33, %v2031_v34  ;;  %v2290_v34 = vld [vmem:[%s2598_s27 + $0xb4] sm:$0xf] }
  0x43   : > { %2194 = vmatmul.msk.bf16.gmra.mxu1 %vm527_vm0, %v1994_v39  ;;  %v2135_v39 = vld [vmem:[%s2598_s27 + $0x158] sm:$0xf0] }
  0x44   : > { %2208 = vmatmul.msk.bf16.gmra.mxu3 %vm527_vm0, %v2106_v55  ;;  %v2138_v43 = vor.u32 %v2310_v37, %v2135_v39  ;;  %v2309_v55 = vld [vmem:[%s2598_s27 + $0x144] sm:$0xf0] }
  0x4d   : > { %621 = vmatmul.bf16.gmra.mxu0 %v1982_v47  ;;  %681 = vmatmul.bf16.gmra.mxu2 %v2078_v48  ;;  %v2286_v47 = vld [vmem:[%s2598_s27 + $0x94] sm:$0xf]  ;;  %v2039_v48 = vld [vmem:[%s2598_s27 + $0x98] sm:$0xf0] }
  0x4e   : > { %v2042_v49 = vor.u32 %v2286_v47, %v2039_v48 }
  0x53   : > { %2195 = vmatmul.msk.bf16.gmra.mxu1 %vm527_vm0, %v2002_v51  ;;  %v2029_v51 = vld [vmem:[%s2598_s27 + $0x80] sm:$0xf] }
  0x54   : > { %2209 = vmatmul.msk.bf16.gmra.mxu3 %vm527_vm0, %v2114_v3 }
  0x5d   : > { %626 = vmatmul.bf16.gmra.mxu0 %v1990_v59  ;;  %686 = vmatmul.bf16.gmra.mxu2 %v2086_v60  ;;  %v2030_v59 = vor.u32 %v2285_v52, %v2029_v51  ;;  %v2126_v60 = vor.u32 %v2309_v55, %v2125_v54 }
  0x63   : > { %2196 = vmatmul.msk.bf16.gmra.mxu1 %vm527_vm0, %v2010_v63 }
  0x64   : > { %2210 = vmatmul.msk.bf16.gmra.mxu3 %vm527_vm0, %v2122_v18 }
  0x6d   : > { %631 = vmatmul.bf16.gmra.mxu0 %v1998_v7  ;;  %691 = vmatmul.bf16.gmra.mxu2 %v2094_v8  ;;  %v2050_v8 = vor.u32 %v2288_v4, %v2047_v5  ;;  %v2765_v5 = vld [vmem:[%s2598_s27 + $0x180] sm:$0xff] }
  0x73   : > { %2197 = vmatmul.msk.bf16.gmra.mxu1 %vm527_vm0, %v2018_v11  ;;  %v2037_v11 = vld [vmem:[%s2598_s27 + $0x90] sm:$0xf] }
  0x74   : > { %2211 = vmatmul.msk.bf16.gmra.mxu3 %vm527_vm0, %v2130_v30  ;;  %v2038_v21 = vor.u32 %v2287_v12, %v2037_v11 }
  0x7d   : > { %636 = vmatmul.bf16.gmra.mxu0 %v2006_v19  ;;  %696 = vmatmul.bf16.gmra.mxu2 %v2102_v20  ;;  %v2314_v19 = vld [vmem:[%s2598_s27 + $0x174] sm:$0xf]  ;;  %v2151_v20 = vld [vmem:[%s2598_s27 + $0x178] sm:$0xf0] }
  0x7e   : > { %v2154_v24 = vor.u32 %v2314_v19, %v2151_v20  ;;  %v2292_v19 = vld [vmem:[%s2598_s27 + $0xc4] sm:$0xf] }
  0x83   : > { %2198 = vmatmul.msk.bf16.gmra.mxu1 %vm527_vm0, %v2026_v23 }
  0x84   : > { %2212 = vmatmul.msk.bf16.gmra.mxu3 %vm527_vm0, %v2138_v43 }
  0x8d   : > { %641 = vmatmul.bf16.gmra.mxu0 %v2014_v31  ;;  %701 = vmatmul.bf16.gmra.mxu2 %v2110_v32 }
  0x90   : > { %v745_v36 = vpop.f32.mrf.mxu1 }
  0x93   : > { %2199 = vmatmul.msk.bf16.gmra.mxu1 %vm527_vm0, %v2034_v35  ;;  %v2055_v35 = vld [vmem:[%s2598_s27 + $0xb8] sm:$0xf0] }
  0x94   : > { %2213 = vmatmul.msk.bf16.gmra.mxu3 %vm527_vm0, %v2146_v58  ;;  %v2058_v40 = vor.u32 %v2290_v34, %v2055_v35 }
  0x97   : > { %v2711_v2 = vpop.f32.mrf.mxu3 }
  0x98   : > { %v747_v46 = vpop.f32.mrf.mxu1 }
  0x9d   : > { %646 = vmatmul.bf16.gmra.mxu0 %v2022_v44  ;;  %706 = vmatmul.bf16.gmra.mxu2 %v2118_v45  ;;  %v2045_v44 = vld [vmem:[%s2598_s27 + $0xa0] sm:$0xf]  ;;  %v2289_v45 = vld [vmem:[%s2598_s27 + $0xa4] sm:$0xf0] }
  0x9f   : > { %v2729_v23 = vpop.f32.mrf.mxu3 }
  0xa0   : > { %v750_v50 = vpop.f32.mrf.mxu1 }
  0xa3   : > { %2200 = vmatmul.msk.bf16.gmra.mxu1 %vm527_vm0, %v2042_v49  ;;  %v2141_v49 = vld [vmem:[%s2598_s27 + $0x160] sm:$0xf] }
  0xa4   : > { %2214 = vmatmul.msk.bf16.gmra.mxu3 %vm527_vm0, %v2154_v24 }
  0xa7   : > { %v2743_v41 = vpop.f32.mrf.mxu3 }
  0xa8   : > { %v752_v63 = vpop.f32.mrf.mxu1 }
  0xaa   : > { %v612_v61 = vpop.f32.mrf.mxu0 }
  0xab   : > { %v613_v62 = vadd.f32 %v2707_v57, %v612_v61 }
  0xad   : > { %v746_v0 = vadd.f32 %v745_v36, %v613_v62  ;;  %651 = vmatmul.bf16.gmra.mxu0 %v2030_v59  ;;  %711 = vmatmul.bf16.gmra.mxu2 %v2126_v60  ;;  %v2046_v59 = vor.u32 %v2289_v45, %v2045_v44  ;;  %v2149_v44 = vld [vmem:[%s2598_s27 + $0x170] sm:$0xf] }
  0xaf   : > { %v2216_v1 = vmul.f32 -1.442695, %v746_v0  ;;  %v2775_v13 = vpop.f32.mrf.mxu3 }
  0xb0   : > { %v2713_v3 = vpop.f32.mrf.mxu2  ;;  %v2718_v9 = vpop.f32.mrf.mxu1 }
  0xb1   : > { %2343 = vpow2.f32 %v2216_v1 }
  0xb2   : > { %v614_v6 = vpop.f32.mrf.mxu0 }
  0xb3   : > { %v615_v7 = vadd.f32 %v2707_v57, %v614_v6  ;;  %2201 = vmatmul.msk.bf16.gmra.mxu1 %vm527_vm0, %v2050_v8 }
  0xb5   : > { %v748_v10 = vadd.f32 %v747_v46, %v615_v7 }
  0xb7   : > { %v2344_v15 = vpop.eup %2343  ;;  %v2217_v16 = vmul.f32 -1.442695, %v748_v10  ;;  %v397_v10 = vunpack.c.h.b16 %v2765_v5 }
  0xb8   : > { %v1016_v17 = vadd.f32 1.0, %v2344_v15  ;;  %v2725_v18 = vpop.f32.mrf.mxu2  ;;  %v2733_v27 = vpop.f32.mrf.mxu1 }
  0xb9   : > { %2345 = vpow2.f32 %v2217_v16  ;;  %v447_v15 = vpack.c.b16 %v397_v10, %v397_v10 }
  0xba   : > { %2347 = vrcp.f32 %v1016_v17  ;;  %v617_v25 = vpop.f32.mrf.mxu0  ;;  %v1076_v42 = vand.u32 2147483648, %v1016_v17  ;;  %v1074_v47 = vand.u32 2147483647, %v1016_v17  ;;  %vm1070_vm2 = vweird.f32 %v1016_v17 }
  0xbb   : > { %v618_v26 = vadd.f32 %v2707_v57, %v617_v25  ;;  %2215 = vmatmul.msk.bf16.gmra.mxu3 %vm527_vm0, %v447_v15 }
  0xbc   : > { %v1077_v55 = vor.u32 1.1754944e-38, %v1076_v42  ;;  %vm1075_vm4 = vcmp.eq.f32.partialorder %v1074_v47, 8.507059e+37  ;;  %v2291_v42 = vld [vmem:[%s2598_s27 + $0xb4] sm:$0xf0] }
  0xbd   : > { %v751_v28 = vadd.f32 %v750_v50, %v618_v26  ;;  %656 = vmatmul.bf16.gmra.mxu0 %v2038_v21  ;;  %716 = vmatmul.bf16.gmra.mxu2 %v2134_v22  ;;  %v2313_v50 = vld [vmem:[%s2598_s27 + $0x164] sm:$0xf0]  ;;  %v2063_v26 = vld [vmem:[%s2598_s27 + $0xc8] sm:$0xf0]  ;;  %v2315_v47 = vld [vmem:[%s2598_s27 + $0x174] sm:$0xf0] }
  0xbe   : > { %v2142_v60 = vor.u32 %v2313_v50, %v2141_v49  ;;  %v2066_v35 = vor.u32 %v2292_v19, %v2063_v26  ;;  %v2294_v26 = vld [vmem:[%s2598_s27 + $0xd4] sm:$0xf] }
  0xbf   : > { %v2346_v29 = vpop.eup %2345  ;;  %v2218_v30 = vmul.f32 -1.442695, %v751_v28 }
  0xc0   : > { %v2348_v31 = vpop.eup %2347  ;;  %v2735_v32 = vadd.f32 1.0, %v2346_v29  ;;  %v2737_v33 = vpop.f32.mrf.mxu2 }
  0xc1   : > { %v1066_v36 = vmul.f32 %v2348_v31, %v1016_v17  ;;  %2349 = vpow2.f32 %v2218_v30  ;;  %v2745_v43 = vpop.f32.mrf.mxu1  ;;  %vm1071_vm1 = vweird.f32 %v2348_v31 }
  0xc2   : > { %2351 = vrcp.f32 %v2735_v32  ;;  %v619_v37 = vpop.f32.mrf.mxu0  ;;  %vm1072_vm3 = vmor %vm1070_vm2, %vm1071_vm1  ;;  %v1091_v6 = vand.u32 2147483648, %v2735_v32  ;;  %v1089_v12 = vand.u32 2147483647, %v2735_v32  ;;  %vm1085_vm7 = vweird.f32 %v2735_v32 }
  0xc3   : > { %v1067_v38 = vsub.f32 1.0, %v1066_v36  ;;  %v620_v39 = vadd.f32 %v2707_v57, %v619_v37  ;;  %2202 = vmatmul.msk.bf16.gmra.mxu1 %vm527_vm0, %v2058_v40  ;;  %v2053_v36 = vld [vmem:[%s2598_s27 + $0xb0] sm:$0xf] }
  0xc4   : > { %v1092_v21 = vor.u32 1.1754944e-38, %v1091_v6  ;;  %vm1090_vm9 = vcmp.eq.f32.partialorder %v1089_v12, 8.507059e+37 }
  0xc5   : > { %v1068_v46 = vmul.f32 %v2348_v31, %v1067_v38  ;;  %v753_v48 = vadd.f32 %v752_v63, %v620_v39 }
  0xc7   : > { %v2350_v51 = vpop.eup %2349  ;;  %v1069_v52 = vadd.f32 %v2348_v31, %v1068_v46  ;;  %v2219_v53 = vmul.f32 -1.442695, %v753_v48 }
  0xc8   : > { %v2352_v54 = vpop.eup %2351  ;;  %v2753_v56 = vadd.f32 1.0, %v2350_v51  ;;  %v2755_v58 = vpop.f32.mrf.mxu2 }
  0xc9   : > { %v1073_v61 = vsel %vm1072_vm3, %v2348_v31, %v1069_v52  ;;  %v1081_v62 = vmul.f32 %v2352_v54, %v2735_v32  ;;  %2353 = vpow2.f32 %v2219_v53  ;;  %v2769_v8 = vpop.f32.mrf.mxu1  ;;  %vm1086_vm6 = vweird.f32 %v2352_v54  ;;  %v2802_v51 = vpop.f32.mrf.mxu3 }
  0xca   : > { %v1078_v63 = vsel %vm1075_vm4, %v1077_v55, %v1073_v61  ;;  %2355 = vrcp.f32 %v2753_v56  ;;  %v622_v0 = vpop.f32.mrf.mxu0  ;;  %vm1087_vm8 = vmor %vm1085_vm7, %vm1086_vm6  ;;  %v1106_v37 = vand.u32 2147483648, %v2753_v56  ;;  %v1104_v46 = vand.u32 2147483647, %v2753_v56 }
  0xcb   : > { %v1800_v1 = vpack.c.bf16 %v1078_v63, %v1078_v63  ;;  %v1082_v4 = vsub.f32 1.0, %v1081_v62  ;;  %v623_v7 = vadd.f32 %v2707_v57, %v622_v0  ;;  %vm1100_vm11 = vweird.f32 %v2753_v56 }
  0xcc   : > { %v1107_v53 = vor.u32 1.1754944e-38, %v1106_v37  ;;  %vm1105_vm13 = vcmp.eq.f32.partialorder %v1104_v46, 8.507059e+37 }
  0xcd   : > { %1850 = vst.msk [vmem:[%s2761_s15] sm:$0xf] %vm1849_vm5, %v1800_v1  ;;  %v1083_v11 = vmul.f32 %v2352_v54, %v1082_v4  ;;  %661 = vmatmul.bf16.gmra.mxu0 %v2046_v59  ;;  %721 = vmatmul.bf16.gmra.mxu2 %v2142_v60  ;;  %v756_v14 = vadd.f32 %v2718_v9, %v623_v7 }
  0xce   : > { %v2150_v59 = vor.u32 %v2315_v47, %v2149_v44 }
  0xcf   : > { %v2354_v16 = vpop.eup %2353  ;;  %v1084_v17 = vadd.f32 %v2352_v54, %v1083_v11  ;;  %v2220_v24 = vmul.f32 -1.442695, %v756_v14 }
  0xd0   : > { %v2356_v20 = vpop.eup %2355  ;;  %v2780_v22 = vadd.f32 1.0, %v2354_v16  ;;  %v682_v25 = vpop.f32.mrf.mxu2 }
  0xd1   : > { %v1088_v28 = vsel %vm1087_vm8, %v2352_v54, %v1084_v17  ;;  %v1096_v9 = vmul.f32 %v2356_v20, %v2753_v56  ;;  %v683_v29 = vadd.f32 %v2707_v57, %v682_v25  ;;  %v2791_v40 = vpop.f32.mrf.mxu1  ;;  %vm1101_vm10 = vweird.f32 %v2356_v20 }
  0xd2   : > { %v1093_v30 = vsel %vm1090_vm9, %v1092_v21, %v1088_v28  ;;  %2357 = vrcp.f32 %v2780_v22  ;;  %v624_v31 = vpop.f32.mrf.mxu0  ;;  %vm1102_vm12 = vmor %vm1100_vm11, %vm1101_vm10  ;;  %v1119_v10 = vand.u32 2147483647, %v2780_v22  ;;  %v1121_v11 = vand.u32 2147483648, %v2780_v22  ;;  %v2071_v28 = vld [vmem:[%s2598_s27 + $0xd8] sm:$0xf0] }
  0xd3   : > { %v1801_v32 = vpack.c.bf16 %v1093_v30, %v1093_v30  ;;  %v1097_v34 = vsub.f32 1.0, %v1096_v9  ;;  %2359 = vpow2.f32 %v2220_v24  ;;  %v816_v38 = vadd.f32 %v2711_v2, %v683_v29  ;;  %2203 = vmatmul.msk.bf16.gmra.mxu1 %vm527_vm0, %v2066_v35 }
  0xd4   : > { %v625_v39 = vadd.f32 %v2707_v57, %v624_v31  ;;  %v2054_v2 = vor.u32 %v2291_v42, %v2053_v36  ;;  %vm1115_vm15 = vweird.f32 %v2780_v22  ;;  %v1122_v24 = vor.u32 1.1754944e-38, %v1121_v11 }
  0xd5   : > { %1851 = vst.msk [vmem:[%s2761_s15 + $0x4] sm:$0xf] %vm1849_vm5, %v1801_v32  ;;  %v1098_v45 = vmul.f32 %v2356_v20, %v1097_v34  ;;  %v2244_v48 = vmul.f32 -1.442695, %v816_v38  ;;  %v396_v9 = vunpack.c.l.b16 %v2765_v5  ;;  %vm1120_vm2 = vcmp.eq.f32.partialorder %v1119_v10, 8.507059e+37 }
  0xd6   : > { %v758_v49 = vadd.f32 %v2733_v27, %v625_v39  ;;  %v2074_v37 = vor.u32 %v2294_v26, %v2071_v28 }
  0xd7   : > { %v1099_v50 = vadd.f32 %v2356_v20, %v1098_v45  ;;  %2361 = vpow2.f32 %v2244_v48  ;;  %v446_v42 = vpack.c.b16 %v396_v9, %v396_v9 }
  0xd8   : > { %v2358_v52 = vpop.eup %2357  ;;  %v2221_v54 = vmul.f32 -1.442695, %v758_v49  ;;  %v684_v55 = vpop.f32.mrf.mxu2 }
  0xd9   : > { %v2360_v60 = vpop.eup %2359  ;;  %v1103_v61 = vsel %vm1102_vm12, %v2356_v20, %v1099_v50  ;;  %v1111_v27 = vmul.f32 %v2358_v52, %v2780_v22  ;;  %v685_v56 = vadd.f32 %v2707_v57, %v684_v55  ;;  %v2813_v12 = vpop.f32.mrf.mxu1  ;;  %vm1116_vm14 = vweird.f32 %v2358_v52 }
  0xda   : > { %v1108_v62 = vsel %vm1105_vm13, %v1107_v53, %v1103_v61  ;;  %v2806_v63 = vadd.f32 1.0, %v2360_v60  ;;  %2363 = vpow2.f32 %v2221_v54  ;;  %v627_v0 = vpop.f32.mrf.mxu0  ;;  %vm1117_vm1 = vmor %vm1115_vm15, %vm1116_vm14  ;;  %v2826_v22 = vpop.f32.mrf.mxu3 }
  0xdb   : > { %v1802_v1 = vpack.c.bf16 %v1108_v62, %v1108_v62  ;;  %v1112_v4 = vsub.f32 1.0, %v1111_v27  ;;  %v818_v6 = vadd.f32 %v2729_v23, %v685_v56  ;;  %v628_v7 = vadd.f32 %v2707_v57, %v627_v0 }
  0xdc   : > { %2365 = vrcp.f32 %v2806_v63  ;;  %v1136_v32 = vand.u32 2147483648, %v2806_v63  ;;  %vm1130_vm3 = vweird.f32 %v2806_v63 }
  0xdd   : > { %1852 = vst.msk [vmem:[%s2761_s15 + $0x8] sm:$0xf] %vm1849_vm5, %v1802_v1  ;;  %v1113_v14 = vmul.f32 %v2358_v52, %v1112_v4  ;;  %v2245_v15 = vmul.f32 -1.442695, %v818_v6  ;;  %v761_v16 = vadd.f32 %v2745_v43, %v628_v7  ;;  %666 = vmatmul.bf16.gmra.mxu0 %v2054_v2  ;;  %726 = vmatmul.bf16.gmra.mxu2 %v2150_v59  ;;  %v2362_v23 = vpop.eup %2361  ;;  %v1134_v43 = vand.u32 2147483647, %v2806_v63 }
  0xde   : > { %v2819_v19 = vadd.f32 1.0, %v2362_v23  ;;  %v1137_v49 = vor.u32 1.1754944e-38, %v1136_v32 }
  0xdf   : > { %v1114_v17 = vadd.f32 %v2358_v52, %v1113_v14  ;;  %2367 = vpow2.f32 %v2245_v15  ;;  %v2222_v20 = vmul.f32 -1.442695, %v761_v16  ;;  %vm2841_vm4 = vcmp.eq.f32.partialorder %v1134_v43, 8.507059e+37 }
  0xe0   : > { %v2364_v21 = vpop.eup %2363  ;;  %v687_v25 = vpop.f32.mrf.mxu2  ;;  %2369 = vrcp.f32 %v2819_v19  ;;  %v1494_v38 = vand.u32 2147483647, %v2819_v19  ;;  %v1496_v50 = vand.u32 2147483648, %v2819_v19  ;;  %vm1490_vm7 = vweird.f32 %v2819_v19 }
  0xe1   : > { %v1118_v29 = vsel %vm1117_vm1, %v2358_v52, %v1114_v17  ;;  %v2829_v34 = vadd.f32 1.0, %v2364_v21  ;;  %2371 = vpow2.f32 %v2222_v20  ;;  %v2834_v39 = vpop.f32.mrf.mxu1  ;;  %v688_v46 = vadd.f32 %v2707_v57, %v687_v25 }
  0xe2   : > { %v2366_v30 = vpop.eup %2365  ;;  %v1123_v31 = vsel %vm1120_vm2, %v1122_v24, %v1118_v29  ;;  %v629_v35 = vpop.f32.mrf.mxu0  ;;  %vm2852_vm8 = vcmp.eq.f32.partialorder %v1494_v38, 8.507059e+37  ;;  %v1497_v6 = vor.u32 1.1754944e-38, %v1496_v50 }
  0xe3   : > { %v1803_v36 = vpack.c.bf16 %v1123_v31, %v1123_v31  ;;  %v1126_v5 = vmul.f32 %v2366_v30, %v2806_v63  ;;  %2373 = vrcp.f32 %v2829_v34  ;;  %v630_v47 = vadd.f32 %v2707_v57, %v629_v35  ;;  %2204 = vmatmul.msk.bf16.gmra.mxu1 %vm527_vm0, %v2074_v37  ;;  %v2868_v15 = vpop.f32.mrf.mxu3 }
  0xe4   : > { %vm1131_vm6 = vweird.f32 %v2366_v30  ;;  %v821_v54 = vadd.f32 %v2743_v41, %v688_v46  ;;  %v1149_v62 = vand.u32 2147483647, %v2829_v34  ;;  %v1151_v0 = vand.u32 2147483648, %v2829_v34 }
  0xe5   : > { %v2368_v44 = vpop.eup %2367  ;;  %1853 = vst.msk [vmem:[%s2761_s15 + $0xc] sm:$0xf] %vm1849_vm5, %v1803_v36  ;;  %v1127_v45 = vsub.f32 1.0, %v1126_v5  ;;  %v763_v61 = vadd.f32 %v2769_v8, %v630_v47  ;;  %vm1132_vm0 = vmor %vm1130_vm3, %vm1131_vm6  ;;  %vm1145_vm10 = vweird.f32 %v2829_v34 }
  0xe6   : > { %v2846_v2 = vadd.f32 1.0, %v2368_v44  ;;  %v2370_v52 = vpop.eup %2369  ;;  %v2246_v7 = vmul.f32 -1.442695, %v821_v54  ;;  %vm2875_vm11 = vcmp.eq.f32.partialorder %v1149_v62, 8.507059e+37  ;;  %v1152_v25 = vor.u32 1.1754944e-38, %v1151_v0 }
  0xe7   : > { %v1128_v53 = vmul.f32 %v2366_v30, %v1127_v45  ;;  %v2372_v55 = vpop.eup %2371  ;;  %v1486_v59 = vmul.f32 %v2370_v52, %v2819_v19  ;;  %vm1491_vm9 = vweird.f32 %v2370_v52  ;;  %v2223_v23 = vmul.f32 -1.442695, %v763_v61 }
  0xe8   : > { %2375 = vrcp.f32 %v2846_v2  ;;  %v689_v27 = vpop.f32.mrf.mxu2  ;;  %v2860_v41 = vadd.f32 1.0, %v2372_v55  ;;  %v1509_v9 = vand.u32 2147483647, %v2846_v2  ;;  %vm1492_vm12 = vmor %vm1490_vm7, %vm1491_vm9  ;;  %vm1505_vm14 = vweird.f32 %v2846_v2 }
  0xe9   : > { %v1129_v56 = vadd.f32 %v2366_v30, %v1128_v53  ;;  %v2374_v1 = vpop.eup %2373  ;;  %v1487_v4 = vsub.f32 1.0, %v1486_v59  ;;  %v690_v10 = vadd.f32 %v2707_v57, %v689_v27  ;;  %v2873_v17 = vpop.f32.mrf.mxu1  ;;  %v1511_v32 = vand.u32 2147483648, %v2846_v2 }
  0xea   : > { %v632_v11 = vpop.f32.mrf.mxu0  ;;  %v1141_v14 = vmul.f32 %v2374_v1, %v2829_v34  ;;  %2377 = vrcp.f32 %v2860_v41  ;;  %vm1146_vm13 = vweird.f32 %v2374_v1  ;;  %vm2894_vm1 = vcmp.eq.f32.partialorder %v1509_v9, 8.507059e+37 }
  0xeb   : > { %v1133_v8 = vsel %vm1132_vm0, %v2366_v30, %v1129_v56  ;;  %v1488_v63 = vmul.f32 %v2370_v52, %v1487_v4  ;;  %2379 = vpow2.f32 %v2246_v7  ;;  %v823_v29 = vadd.f32 %v2775_v13, %v690_v10  ;;  %vm1147_vm15 = vmor %vm1145_vm10, %vm1146_vm13  ;;  %v2910_v56 = vpop.f32.mrf.mxu3 }
  0xec   : > { %v1138_v16 = vsel %vm2841_vm4, %v1137_v49, %v1133_v8  ;;  %v1142_v21 = vsub.f32 1.0, %v1141_v14  ;;  %2381 = vpow2.f32 %v2223_v23  ;;  %v633_v19 = vadd.f32 %v2707_v57, %v632_v11 }
  0xed   : > { %v1804_v20 = vpack.c.bf16 %v1138_v16, %v1138_v16  ;;  %731 = vmatmul.bf16.gmra.mxu2 %v446_v42  ;;  %v1489_v28 = vadd.f32 %v2370_v52, %v1488_v63  ;;  %v2247_v35 = vmul.f32 -1.442695, %v823_v29  ;;  %v1164_v0 = vand.u32 2147483647, %v2860_v41 }
  0xee   : > { %v2376_v26 = vpop.eup %2375  ;;  %v1143_v43 = vmul.f32 %v2374_v1, %v1142_v21  ;;  %v766_v53 = vadd.f32 %v2791_v40, %v633_v19  ;;  %v1166_v40 = vand.u32 2147483648, %v2860_v41  ;;  %vm1160_vm6 = vweird.f32 %v2860_v41 }
  0xef   : > { %1854 = vst.msk [vmem:[%s2761_s15 + $0x10] sm:$0xf] %vm1849_vm5, %v1804_v20  ;;  %v1501_v30 = vmul.f32 %v2376_v26, %v2846_v2  ;;  %v1493_v31 = vsel %vm1492_vm12, %v2370_v52, %v1489_v28  ;;  %2383 = vpow2.f32 %v2247_v35  ;;  %vm1506_vm2 = vweird.f32 %v2376_v26 }
  0xf0   : > { %v692_v36 = vpop.f32.mrf.mxu2  ;;  %v1498_v13 = vsel %vm2852_vm8, %v1497_v6, %v1493_v31  ;;  %v1144_v5 = vadd.f32 %v2374_v1, %v1143_v43  ;;  %v2378_v38 = vpop.eup %2377  ;;  %v1512_v52 = vor.u32 1.1754944e-38, %v1511_v32  ;;  %vm1507_vm3 = vmor %vm1505_vm14, %vm1506_vm2  ;;  %vm1165_vm8 = vcmp.eq.f32.partialorder %v1164_v0, 8.507059e+37 }
  0xf1   : > { %v1502_v37 = vsub.f32 1.0, %v1501_v30  ;;  %v1828_v42 = vpack.c.bf16 %v1498_v13, %v1498_v13  ;;  %v693_v45 = vadd.f32 %v2707_v57, %v692_v36  ;;  %v1156_v49 = vmul.f32 %v2378_v38, %v2860_v41  ;;  %v2380_v50 = vpop.eup %2379  ;;  %v2906_v55 = vpop.f32.mrf.mxu1 }
  0xf2   : > { %v634_v46 = vpop.f32.mrf.mxu0  ;;  %v1148_v47 = vsel %vm1147_vm15, %v2374_v1, %v1144_v5  ;;  %v2908_v27 = vadd.f32 1.0, %v2380_v50  ;;  %v2382_v62 = vpop.eup %2381  ;;  %vm1161_vm4 = vweird.f32 %v2378_v38  ;;  %v1167_v23 = vor.u32 1.1754944e-38, %v1166_v40 }
  0xf3   : > { %v1503_v48 = vmul.f32 %v2376_v26, %v1502_v37  ;;  %1878 = vst.msk [vmem:[%s2761_s15 + $0x70] sm:$0xf] %vm1849_vm5, %v1828_v42  ;;  %v1153_v34 = vsel %vm2875_vm11, %v1152_v25, %v1148_v47  ;;  %v826_v54 = vadd.f32 %v2802_v51, %v693_v45  ;;  %v1157_v61 = vsub.f32 1.0, %v1156_v49  ;;  %vm1162_vm7 = vmor %vm1160_vm6, %vm1161_vm4  ;;  %v2948_v36 = vpop.f32.mrf.mxu3 }
  0xf4   : > { %v1805_v59 = vpack.c.bf16 %v1153_v34, %v1153_v34  ;;  %v2224_v51 = vmul.f32 -1.442695, %v766_v53  ;;  %2385 = vrcp.f32 %v2908_v27  ;;  %v635_v6 = vadd.f32 %v2707_v57, %v634_v46 }
  0xf5   : > { %v1504_v60 = vadd.f32 %v2376_v26, %v1503_v48  ;;  %v1158_v4 = vmul.f32 %v2378_v38, %v1157_v61  ;;  %v2384_v7 = vpop.eup %2383  ;;  %v2924_v10 = vadd.f32 1.0, %v2382_v62  ;;  %v2248_v11 = vmul.f32 -1.442695, %v826_v54 }
  0xf6   : > { %1855 = vst.msk [vmem:[%s2761_s15 + $0x14] sm:$0xf] %vm1849_vm5, %v1805_v59  ;;  %v2926_v63 = vadd.f32 1.0, %v2384_v7  ;;  %2387 = vpow2.f32 %v2224_v51  ;;  %v1524_v20 = vand.u32 2147483647, %v2908_v27  ;;  %v1526_v24 = vand.u32 2147483648, %v2908_v27 }
  0xf7   : > { %v1508_v1 = vsel %vm1507_vm3, %v2376_v26, %v1504_v60  ;;  %v1159_v16 = vadd.f32 %v2378_v38, %v1158_v4  ;;  %2389 = vrcp.f32 %v2924_v10  ;;  %v768_v25 = vadd.f32 %v2813_v12, %v635_v6 }
  0xf8   : > { %v1513_v2 = vsel %vm2894_vm1, %v1512_v52, %v1508_v1  ;;  %v694_v8 = vpop.f32.mrf.mxu2  ;;  %2391 = vrcp.f32 %v2926_v63  ;;  %vm1520_vm0 = vweird.f32 %v2908_v27  ;;  %vm2940_vm9 = vcmp.eq.f32.partialorder %v1524_v20, 8.507059e+37 }
  0xf9   : > { %v1829_v14 = vpack.c.bf16 %v1513_v2, %v1513_v2  ;;  %v1163_v41 = vsel %vm1162_vm7, %v2378_v38, %v1159_v16  ;;  %v2936_v28 = vpop.f32.mrf.mxu1  ;;  %2393 = vpow2.f32 %v2248_v11  ;;  %v1527_v32 = vor.u32 1.1754944e-38, %v1526_v24 }
  0xfa   : > { %v637_v21 = vpop.f32.mrf.mxu0  ;;  %v1168_v26 = vsel %vm1165_vm8, %v1167_v23, %v1163_v41  ;;  %v2386_v9 = vpop.eup %2385  ;;  %vm1175_vm10 = vweird.f32 %v2924_v10  ;;  %v2225_v12 = vmul.f32 -1.442695, %v768_v25  ;;  %v695_v35 = vadd.f32 %v2707_v57, %v694_v8 }
  0xfb   : > { %1879 = vst.msk [vmem:[%s2761_s15 + $0x74] sm:$0xf] %vm1849_vm5, %v1829_v14  ;;  %v1806_v29 = vpack.c.bf16 %v1168_v26, %v1168_v26  ;;  %v1516_v43 = vmul.f32 %v2386_v9, %v2908_v27  ;;  %v1179_v37 = vand.u32 2147483647, %v2924_v10  ;;  %v1181_v19 = vand.u32 2147483648, %v2924_v10 }
  0xfc   : > { %v2388_v31 = vpop.eup %2387  ;;  %vm1535_vm11 = vweird.f32 %v2926_v63  ;;  %2395 = vpow2.f32 %v2225_v12  ;;  %v828_v46 = vadd.f32 %v2826_v22, %v695_v35  ;;  %vm1521_vm12 = vweird.f32 %v2386_v9 }
  0xfd   : > { %1856 = vst.msk [vmem:[%s2761_s15 + $0x18] sm:$0xf] %vm1849_vm5, %v1806_v29  ;;  %v2390_v13 = vpop.eup %2389  ;;  %v1517_v5 = vsub.f32 1.0, %v1516_v43  ;;  %v2952_v38 = vadd.f32 1.0, %v2388_v31  ;;  %v1539_v52 = vand.u32 2147483647, %v2926_v63  ;;  %v638_v54 = vadd.f32 %v2707_v57, %v637_v21  ;;  %vm1522_vm13 = vmor %vm1520_vm0, %vm1521_vm12 }
  0xfe   : > { %v2392_v44 = vpop.eup %2391  ;;  %v1171_v45 = vmul.f32 %v2390_v13, %v2924_v10  ;;  %v1541_v53 = vand.u32 2147483648, %v2926_v63  ;;  %v2249_v22 = vmul.f32 -1.442695, %v828_v46  ;;  %vm1176_vm14 = vweird.f32 %v2390_v13 }
  0xff   : > { %v1518_v47 = vmul.f32 %v2386_v9, %v1517_v5  ;;  %v1531_v48 = vmul.f32 %v2392_v44, %v2926_v63  ;;  %2397 = vrcp.f32 %v2952_v38  ;;  %v2394_v50 = vpop.eup %2393  ;;  %vm2972_vm15 = vcmp.eq.f32.partialorder %v1179_v37, 8.507059e+37  ;;  %vm1177_vm2 = vmor %vm1175_vm10, %vm1176_vm14 }
 0x100   : > { %v2954_v42 = vpop.f32.mrf.mxu2  ;;  %v1172_v34 = vsub.f32 1.0, %v1171_v45  ;;  %v2966_v61 = vadd.f32 1.0, %v2394_v50  ;;  %v1182_v51 = vor.u32 1.1754944e-38, %v1181_v19  ;;  %vm1536_vm1 = vweird.f32 %v2392_v44 }
 0x101   : > { %v1519_v59 = vadd.f32 %v2386_v9, %v1518_v47  ;;  %v1532_v60 = vsub.f32 1.0, %v1531_v48  ;;  %v2968_v62 = vpop.f32.mrf.mxu1  ;;  %v1194_v27 = vand.u32 2147483647, %v2952_v38  ;;  %v771_v11 = vadd.f32 %v2834_v39, %v638_v54  ;;  %vm1537_vm3 = vmor %vm1535_vm11, %vm1536_vm1  ;;  %v2989_v39 = vpop.f32.mrf.mxu3 }
 0x102   : > { %v2961_v49 = vpop.f32.mrf.mxu0  ;;  %v1173_v0 = vmul.f32 %v2390_v13, %v1172_v34  ;;  %2399 = vrcp.f32 %v2966_v61  ;;  %v2396_v6 = vpop.eup %2395  ;;  %vm1540_vm4 = vcmp.eq.f32.partialorder %v1539_v52, 8.507059e+37  ;;  %v1542_v41 = vor.u32 1.1754944e-38, %v1541_v53 }
 0x103   : > { %v1523_v1 = vsel %vm1522_vm13, %v2386_v9, %v1519_v59  ;;  %v1533_v4 = vmul.f32 %v2392_v44, %v1532_v60  ;;  %v2983_v23 = vadd.f32 1.0, %v2396_v6  ;;  %2401 = vpow2.f32 %v2249_v22 }
 0x104   : > { %v1528_v7 = vsel %vm2940_vm9, %v1527_v32, %v1523_v1  ;;  %v1174_v2 = vadd.f32 %v2390_v13, %v1173_v0  ;;  %v1196_v26 = vand.u32 2147483648, %v2952_v38  ;;  %vm1190_vm6 = vweird.f32 %v2952_v38 }
 0x105   : > { %v2398_v8 = vpop.eup %2397  ;;  %v1830_v14 = vpack.c.bf16 %v1528_v7, %v1528_v7  ;;  %v1534_v16 = vadd.f32 %v2392_v44, %v1533_v4  ;;  %2403 = vrcp.f32 %v2983_v23  ;;  %vm2998_vm7 = vcmp.eq.f32.partialorder %v1194_v27, 8.507059e+37 }
 0x106   : > { %v1178_v21 = vsel %vm1177_vm2, %v2390_v13, %v1174_v2  ;;  %v1186_v24 = vmul.f32 %v2398_v8, %v2952_v38  ;;  %v1554_v12 = vand.u32 2147483647, %v2966_v61  ;;  %v2226_v35 = vmul.f32 -1.442695, %v771_v11 }
 0x107   : > { %1880 = vst.msk [vmem:[%s2761_s15 + $0x78] sm:$0xf] %vm1849_vm5, %v1830_v14  ;;  %v1183_v10 = vsel %vm2972_vm15, %v1182_v51, %v1178_v21  ;;  %v1538_v25 = vsel %vm1537_vm3, %v2392_v44, %v1534_v16  ;;  %vm1191_vm8 = vweird.f32 %v2398_v8  ;;  %v698_v37 = vadd.f32 %v2707_v57, %v2954_v42 }
 0x108   : > { %v699_v20 = vpop.f32.mrf.mxu2  ;;  %v1807_v63 = vpack.c.bf16 %v1183_v10, %v1183_v10  ;;  %v1543_v29 = vsel %vm1540_vm4, %v1542_v41, %v1538_v25  ;;  %v1187_v43 = vsub.f32 1.0, %v1186_v24  ;;  %v2400_v30 = vpop.eup %2399  ;;  %v1197_v44 = vor.u32 1.1754944e-38, %v1196_v26  ;;  %vm1192_vm9 = vmor %vm1190_vm6, %vm1191_vm8 }
 0x109   : > { %v1831_v31 = vpack.c.bf16 %v1543_v29, %v1543_v29  ;;  %v1546_v5 = vmul.f32 %v2400_v30, %v2966_v61  ;;  %v2402_v19 = vpop.eup %2401  ;;  %v1556_v45 = vand.u32 2147483648, %v2966_v61  ;;  %2405 = vpow2.f32 %v2226_v35  ;;  %v3013_v47 = vpop.f32.mrf.mxu1 }
 0x10a   : > { %v642_v9 = vpop.f32.mrf.mxu0  ;;  %1857 = vst.msk [vmem:[%s2761_s15 + $0x1c] sm:$0xf] %vm1849_vm5, %v1807_v63  ;;  %v1188_v13 = vmul.f32 %v2398_v8, %v1187_v43  ;;  %v640_v46 = vadd.f32 %v2707_v57, %v2961_v49  ;;  %vm1550_vm0 = vweird.f32 %v2966_v61  ;;  %v3016_v34 = vadd.f32 1.0, %v2402_v19  ;;  %v3034_v6 = vpop.f32.mrf.mxu3 }
 0x10b   : > { %1881 = vst.msk [vmem:[%s2761_s15 + $0x7c] sm:$0xf] %vm1849_vm5, %v1831_v31  ;;  %v1547_v50 = vsub.f32 1.0, %v1546_v5  ;;  %v2404_v52 = vpop.eup %2403  ;;  %vm3021_vm10 = vcmp.eq.f32.partialorder %v1554_v12, 8.507059e+37  ;;  %v831_v53 = vadd.f32 %v2868_v15, %v698_v37  ;;  %v700_v54 = vadd.f32 %v2707_v57, %v699_v20 }
 0x10c   : > { %v1189_v48 = vadd.f32 %v2398_v8, %v1188_v13  ;;  %v773_v49 = vadd.f32 %v2873_v17, %v640_v46  ;;  %vm1551_vm11 = vweird.f32 %v2400_v30  ;;  %v1201_v0 = vmul.f32 %v2404_v52, %v2983_v23 }
 0x10d   : > { %v1548_v22 = vmul.f32 %v2400_v30, %v1547_v50  ;;  %v1557_v40 = vor.u32 1.1754944e-38, %v1556_v45  ;;  %2407 = vrcp.f32 %v3016_v34  ;;  %v643_v51 = vadd.f32 %v2707_v57, %v642_v9  ;;  %vm1552_vm12 = vmor %vm1550_vm0, %vm1551_vm11 }
 0x10e   : > { %v1193_v60 = vsel %vm1192_vm9, %v2398_v8, %v1189_v48  ;;  %v1202_v17 = vsub.f32 1.0, %v1201_v0  ;;  %v1209_v4 = vand.u32 2147483647, %v2983_v23  ;;  %v1211_v2 = vand.u32 2147483648, %v2983_v23 }
 0x10f   : > { %v1198_v38 = vsel %vm2998_vm7, %v1197_v44, %v1193_v60  ;;  %v1549_v1 = vadd.f32 %v2400_v30, %v1548_v22  ;;  %v2406_v7 = vpop.eup %2405  ;;  %v2250_v27 = vmul.f32 -1.442695, %v831_v53  ;;  %v2227_v11 = vmul.f32 -1.442695, %v773_v49 }
 0x110   : > { %v702_v59 = vpop.f32.mrf.mxu2  ;;  %v1808_v15 = vpack.c.bf16 %v1198_v38, %v1198_v38  ;;  %v833_v8 = vadd.f32 %v2910_v56, %v700_v54  ;;  %v1203_v20 = vmul.f32 %v2404_v52, %v1202_v17  ;;  %vm1206_vm13 = vweird.f32 %v2404_v52 }
 0x111   : > { %v1553_v16 = vsel %vm1552_vm12, %v2400_v30, %v1549_v1  ;;  %v3042_v21 = vadd.f32 1.0, %v2406_v7  ;;  %2409 = vpow2.f32 %v2250_v27  ;;  %v776_v24 = vadd.f32 %v2906_v55, %v643_v51  ;;  %v3050_v29 = vpop.f32.mrf.mxu1 }
 0x112   : > { %v644_v14 = vpop.f32.mrf.mxu0  ;;  %1858 = vst.msk [vmem:[%s2761_s15 + $0x20] sm:$0xf] %vm1849_vm5, %v1808_v15  ;;  %v1558_v41 = vsel %vm3021_vm10, %v1557_v40, %v1553_v16  ;;  %v2251_v61 = vmul.f32 -1.442695, %v833_v8  ;;  %v1204_v25 = vadd.f32 %v2404_v52, %v1203_v20  ;;  %vm1205_vm14 = vweird.f32 %v2983_v23  ;;  %v3068_v48 = vpop.f32.mrf.mxu3 }
 0x113   : > { %v1832_v10 = vpack.c.bf16 %v1558_v41, %v1558_v41  ;;  %2411 = vrcp.f32 %v3042_v21  ;;  %v2408_v56 = vpop.eup %2407  ;;  %vm1207_vm15 = vmor %vm1205_vm14, %vm1206_vm13  ;;  %v1212_v26 = vor.u32 1.1754944e-38, %v1211_v2  ;;  %v1569_v9 = vand.u32 2147483647, %v3016_v34 }
 0x114   : > { %2413 = vpow2.f32 %v2227_v11  ;;  %v2228_v63 = vmul.f32 -1.442695, %v776_v24  ;;  %v1208_v55 = vsel %vm1207_vm15, %v2404_v52, %v1204_v25  ;;  %vm1210_vm1 = vcmp.eq.f32.partialorder %v1209_v4, 8.507059e+37 }
 0x115   : > { %1882 = vst.msk [vmem:[%s2761_s15 + $0x80] sm:$0xf] %vm1849_vm5, %v1832_v10  ;;  %v1561_v30 = vmul.f32 %v2408_v56, %v3016_v34  ;;  %2415 = vpow2.f32 %v2251_v61  ;;  %v1213_v23 = vsel %vm1210_vm1, %v1212_v26, %v1208_v55  ;;  %v1571_v31 = vand.u32 2147483648, %v3016_v34 }
 0x116   : > { %v1224_v32 = vand.u32 2147483647, %v3042_v21  ;;  %2417 = vpow2.f32 %v2228_v63  ;;  %v1809_v12 = vpack.c.bf16 %v1213_v23, %v1213_v23  ;;  %vm1565_vm2 = vweird.f32 %v3016_v34 }
 0x117   : > { %v1562_v35 = vsub.f32 1.0, %v1561_v30  ;;  %v2410_v13 = vpop.eup %2409  ;;  %vm3058_vm3 = vcmp.eq.f32.partialorder %v1569_v9, 8.507059e+37  ;;  %v703_v37 = vadd.f32 %v2707_v57, %v702_v59  ;;  %vm1566_vm4 = vweird.f32 %v2408_v56  ;;  %v3077_v59 = vld [vmem:[#allocation2] ss:$0 sm:$0xff] }
 0x118   : > { %v704_v43 = vpop.f32.mrf.mxu2  ;;  %1859 = vst.msk [vmem:[%s2761_s15 + $0x24] sm:$0xf] %vm1849_vm5, %v1809_v12  ;;  %v1226_v45 = vand.u32 2147483648, %v3042_v21  ;;  %v3066_v46 = vadd.f32 1.0, %v2410_v13  ;;  %v1572_v52 = vor.u32 1.1754944e-38, %v1571_v31  ;;  %vm1220_vm6 = vweird.f32 %v3042_v21  ;;  %vm1567_vm8 = vmor %vm1565_vm2, %vm1566_vm4 }
 0x119   : > { %v2412_v19 = vpop.eup %2411  ;;  %v1563_v44 = vmul.f32 %v2408_v56, %v1562_v35  ;;  %vm3072_vm7 = vcmp.eq.f32.partialorder %v1224_v32, 8.507059e+37  ;;  %v645_v60 = vadd.f32 %v3077_v59, %v644_v14  ;;  %v705_v22 = vadd.f32 %v3077_v59, %v704_v43  ;;  %v3097_v11 = vpop.f32.mrf.mxu1 }
 0x11a   : > { %v2414_v50 = vpop.eup %2413  ;;  %v1216_v42 = vmul.f32 %v2412_v19, %v3042_v21  ;;  %v647_v57 = vpop.f32.mrf.mxu0  ;;  %2419 = vrcp.f32 %v3066_v46  ;;  %v836_v15 = vadd.f32 %v2948_v36, %v703_v37  ;;  %v1227_v4 = vor.u32 1.1754944e-38, %v1226_v45 }
 0x11b   : > { %v2416_v49 = vpop.eup %2415  ;;  %v1564_v54 = vadd.f32 %v2408_v56, %v1563_v44  ;;  %v3084_v40 = vadd.f32 1.0, %v2414_v50  ;;  %v648_v2 = vadd.f32 %v3077_v59, %v647_v57  ;;  %vm1221_vm0 = vweird.f32 %v2412_v19  ;;  %v3122_v55 = vpop.f32.mrf.mxu3 }
 0x11c   : > { %v2418_v0 = vpop.eup %2417  ;;  %v1217_v38 = vsub.f32 1.0, %v1216_v42  ;;  %v3086_v51 = vadd.f32 1.0, %v2416_v49  ;;  %v1584_v36 = vand.u32 2147483647, %v3066_v46  ;;  %v1586_v14 = vand.u32 2147483648, %v3066_v46  ;;  %vm1222_vm9 = vmor %vm1220_vm6, %vm1221_vm0 }
 0x11d   : > { %v1568_v17 = vsel %vm1567_vm8, %v2408_v56, %v1564_v54  ;;  %v3091_v7 = vadd.f32 1.0, %v2418_v0  ;;  %2421 = vrcp.f32 %v3084_v40  ;;  %v778_v16 = vadd.f32 %v2936_v28, %v645_v60 }
 0x11e   : > { %v1573_v34 = vsel %vm3058_vm3, %v1572_v52, %v1568_v17  ;;  %v1218_v27 = vmul.f32 %v2412_v19, %v1217_v38  ;;  %2423 = vrcp.f32 %v3086_v51  ;;  %v2252_v41 = vmul.f32 -1.442695, %v836_v15 }
 0x11f   : > { %v1833_v8 = vpack.c.bf16 %v1573_v34, %v1573_v34  ;;  %v838_v61 = vadd.f32 %v2989_v39, %v705_v22  ;;  %v1239_v10 = vand.u32 2147483647, %v3084_v40  ;;  %v1241_v25 = vand.u32 2147483648, %v3084_v40 }
 0x120   : > { %v3089_v1 = vpop.f32.mrf.mxu2  ;;  %v1219_v20 = vadd.f32 %v2412_v19, %v1218_v27  ;;  %v2420_v24 = vpop.eup %2419  ;;  %2425 = vrcp.f32 %v3091_v7  ;;  %v781_v28 = vadd.f32 %v2968_v62, %v648_v2  ;;  %vm1580_vm10 = vweird.f32 %v3066_v46 }
 0x121   : > { %1883 = vst.msk [vmem:[%s2761_s15 + $0x84] sm:$0xf] %vm1849_vm5, %v1833_v8  ;;  %v1576_v26 = vmul.f32 %v2420_v24, %v3066_v46  ;;  %v1601_v39 = vand.u32 2147483648, %v3086_v51  ;;  %vm3117_vm11 = vcmp.eq.f32.partialorder %v1584_v36, 8.507059e+37  ;;  %v1587_v63 = vor.u32 1.1754944e-38, %v1586_v14  ;;  %v3145_v22 = vpop.f32.mrf.mxu1 }
 0x122   : > { %v1223_v56 = vsel %vm1222_vm9, %v2412_v19, %v1219_v20  ;;  %v1599_v43 = vand.u32 2147483647, %v3086_v51  ;;  %vm1235_vm12 = vweird.f32 %v3084_v40  ;;  %2427 = vpow2.f32 %v2252_v41  ;;  %v3135_v45 = vpop.f32.mrf.mxu0 }
 0x123   : > { %v1228_v9 = vsel %vm3072_vm7, %v1227_v4, %v1223_v56  ;;  %v2422_v62 = vpop.eup %2421  ;;  %v1577_v23 = vsub.f32 1.0, %v1576_v26  ;;  %vm3128_vm13 = vcmp.eq.f32.partialorder %v1239_v10, 8.507059e+37  ;;  %v1242_v35 = vor.u32 1.1754944e-38, %v1241_v25 }
 0x124   : > { %v1810_v30 = vpack.c.bf16 %v1228_v9, %v1228_v9  ;;  %v1231_v32 = vmul.f32 %v2422_v62, %v3084_v40  ;;  %vm1595_vm14 = vweird.f32 %v3086_v51  ;;  %v2229_v13 = vmul.f32 -1.442695, %v778_v16  ;;  %v2424_v5 = vpop.eup %2423 }
 0x125   : > { %v1578_v37 = vmul.f32 %v2420_v24, %v1577_v23  ;;  %vm1581_vm15 = vweird.f32 %v2420_v24  ;;  %v1602_v19 = vor.u32 1.1754944e-38, %v1601_v39  ;;  %v2253_v44 = vmul.f32 -1.442695, %v838_v61 }
 0x126   : > { %1860 = vst.msk [vmem:[%s2761_s15 + $0x28] sm:$0xf] %vm1849_vm5, %v1810_v30  ;;  %v2426_v50 = vpop.eup %2425  ;;  %v1232_v52 = vsub.f32 1.0, %v1231_v32  ;;  %v1591_v42 = vmul.f32 %v2424_v5, %v3086_v51  ;;  %vm3138_vm1 = vcmp.eq.f32.partialorder %v1599_v43, 8.507059e+37  ;;  %v1254_v57 = vand.u32 2147483647, %v3091_v7  ;;  %vm1582_vm2 = vmor %vm1580_vm10, %vm1581_vm15 }
 0x127   : > { %2429 = vpow2.f32 %v2229_v13  ;;  %v1579_v49 = vadd.f32 %v2420_v24, %v1578_v37  ;;  %v1246_v54 = vmul.f32 %v2426_v50, %v3091_v7  ;;  %v1256_v60 = vand.u32 2147483648, %v3091_v7 }
 0x128   : > { %v3125_v31 = vpop.f32.mrf.mxu2  ;;  %2431 = vpow2.f32 %v2253_v44  ;;  %v1233_v0 = vmul.f32 %v2422_v62, %v1232_v52  ;;  %vm1236_vm3 = vweird.f32 %v2422_v62  ;;  %v1592_v38 = vsub.f32 1.0, %v1591_v42  ;;  %v2428_v17 = vpop.eup %2427 }
 0x129   : > { %v2230_v15 = vmul.f32 -1.442695, %v781_v28  ;;  %v1583_v4 = vsel %vm1582_vm2, %v2420_v24, %v1579_v49  ;;  %vm1596_vm4 = vweird.f32 %v2424_v5  ;;  %v1247_v2 = vsub.f32 1.0, %v1246_v54  ;;  %vm1237_vm6 = vmor %vm1235_vm12, %vm1236_vm3  ;;  %v3162_v24 = vpop.f32.mrf.mxu3 }
 0x12a   : > { %v708_v34 = vadd.f32 %v3077_v59, %v3089_v1  ;;  %v1588_v27 = vsel %vm3117_vm11, %v1587_v63, %v1583_v4  ;;  %v1234_v8 = vadd.f32 %v2422_v62, %v1233_v0  ;;  %v1593_v36 = vmul.f32 %v2424_v5, %v1592_v38  ;;  %vm1597_vm0 = vmor %vm1595_vm14, %vm1596_vm4  ;;  %v652_v51 = vpop.f32.mrf.mxu0 }
 0x12b   : > { %v3154_v14 = vadd.f32 1.0, %v2428_v17  ;;  %v1834_v46 = vpack.c.bf16 %v1588_v27, %v1588_v27  ;;  %v1248_v16 = vmul.f32 %v2426_v50, %v1247_v2  ;;  %vm1251_vm7 = vweird.f32 %v2426_v50 }
 0x12c   : > { %2433 = vpow2.f32 %v2230_v15  ;;  %v1238_v61 = vsel %vm1237_vm6, %v2422_v62, %v1234_v8  ;;  %v1594_v1 = vadd.f32 %v2424_v5, %v1593_v36  ;;  %vm1250_vm8 = vweird.f32 %v3091_v7 }
 0x12d   : > { %v2430_v41 = vpop.eup %2429  ;;  %2435 = vrcp.f32 %v3154_v14  ;;  %1884 = vst.msk [vmem:[%s2761_s15 + $0x88] sm:$0xf] %vm1849_vm5, %v1834_v46  ;;  %v1243_v40 = vsel %vm3128_vm13, %v1242_v35, %v1238_v61  ;;  %v1249_v25 = vadd.f32 %v2426_v50, %v1248_v16  ;;  %v1257_v28 = vor.u32 1.1754944e-38, %v1256_v60  ;;  %vm1252_vm9 = vmor %vm1250_vm8, %vm1251_vm7  ;;  %v3185_v35 = vpop.f32.mrf.mxu1 }
 0x12e   : > { %v2432_v10 = vpop.eup %2431  ;;  %v841_v56 = vadd.f32 %v3034_v6, %v708_v34  ;;  %v1811_v7 = vpack.c.bf16 %v1243_v40, %v1243_v40  ;;  %v1598_v26 = vsel %vm1597_vm0, %v2424_v5, %v1594_v1  ;;  %v3173_v39 = vadd.f32 1.0, %v2430_v41 }
 0x12f   : > { %v3175_v9 = vadd.f32 1.0, %v2432_v10  ;;  %v1603_v21 = vsel %vm3138_vm1, %v1602_v19, %v1598_v26  ;;  %v1253_v63 = vsel %vm1252_vm9, %v2426_v50, %v1249_v25  ;;  %vm1255_vm10 = vcmp.eq.f32.partialorder %v1254_v57, 8.507059e+37 }
 0x130   : > { %v3158_v20 = vpop.f32.mrf.mxu2  ;;  %1861 = vst.msk [vmem:[%s2761_s15 + $0x2c] sm:$0xf] %vm1849_vm5, %v1811_v7  ;;  %v1835_v43 = vpack.c.bf16 %v1603_v21, %v1603_v21  ;;  %v1258_v6 = vsel %vm1255_vm10, %v1257_v28, %v1253_v63  ;;  %v1614_v62 = vand.u32 2147483647, %v3154_v14  ;;  %2437 = vrcp.f32 %v3173_v39 }
 0x131   : > { %v1812_v23 = vpack.c.bf16 %v1258_v6, %v1258_v6  ;;  %v1616_v32 = vand.u32 2147483648, %v3154_v14  ;;  %2439 = vrcp.f32 %v3175_v9  ;;  %v2254_v12 = vmul.f32 -1.442695, %v841_v56  ;;  %v3215_v15 = vpop.f32.mrf.mxu3 }
 0x132   : > { %v2434_v30 = vpop.eup %2433  ;;  %1885 = vst.msk [vmem:[%s2761_s15 + $0x8c] sm:$0xf] %vm1849_vm5, %v1835_v43  ;;  %v650_v37 = vadd.f32 %v3077_v59, %v3135_v45  ;;  %v710_v19 = vadd.f32 %v3077_v59, %v3125_v31  ;;  %vm1610_vm11 = vweird.f32 %v3154_v14  ;;  %v1269_v50 = vand.u32 2147483647, %v3173_v39  ;;  %v654_v10 = vpop.f32.mrf.mxu0 }
 0x133   : > { %v2436_v13 = vpop.eup %2435  ;;  %v3189_v5 = vadd.f32 1.0, %v2434_v30  ;;  %1862 = vst.msk [vmem:[%s2761_s15 + $0x30] sm:$0xf] %vm1849_vm5, %v1812_v23  ;;  %v1271_v52 = vand.u32 2147483648, %v3173_v39  ;;  %vm3201_vm12 = vcmp.eq.f32.partialorder %v1614_v62, 8.507059e+37  ;;  %v1631_v45 = vand.u32 2147483648, %v3175_v9 }
 0x134   : > { %v1606_v44 = vmul.f32 %v2436_v13, %v3154_v14  ;;  %v1629_v53 = vand.u32 2147483647, %v3175_v9  ;;  %v1617_v49 = vor.u32 1.1754944e-38, %v1616_v32  ;;  %vm1265_vm13 = vweird.f32 %v3173_v39 }
 0x135   : > { %2441 = vrcp.f32 %v3189_v5  ;;  %vm1611_vm14 = vweird.f32 %v2436_v13  ;;  %vm1625_vm15 = vweird.f32 %v3175_v9  ;;  %v783_v60 = vadd.f32 %v3013_v47, %v650_v37  ;;  %v3235_v21 = vpop.f32.mrf.mxu1 }
 0x136   : > { %v1607_v57 = vsub.f32 1.0, %v1606_v44  ;;  %2443 = vpow2.f32 %v2254_v12  ;;  %v2438_v54 = vpop.eup %2437  ;;  %v843_v0 = vadd.f32 %v3068_v48, %v710_v19  ;;  %v653_v38 = vadd.f32 %v3077_v59, %v652_v51  ;;  %vm1612_vm3 = vmor %vm1610_vm11, %vm1611_vm14 }
 0x137   : > { %v2440_v17 = vpop.eup %2439  ;;  %v1261_v2 = vmul.f32 %v2438_v54, %v3173_v39  ;;  %vm3218_vm1 = vcmp.eq.f32.partialorder %v1269_v50, 8.507059e+37  ;;  %v1272_v27 = vor.u32 1.1754944e-38, %v1271_v52  ;;  %v713_v8 = vadd.f32 %v3077_v59, %v3158_v20 }
 0x138   : > { %v3208_v31 = vpop.f32.mrf.mxu2  ;;  %v1608_v4 = vmul.f32 %v2436_v13, %v1607_v57  ;;  %v1621_v47 = vmul.f32 %v2440_v17, %v3175_v9  ;;  %vm3225_vm2 = vcmp.eq.f32.partialorder %v1629_v53, 8.507059e+37  ;;  %v1632_v36 = vor.u32 1.1754944e-38, %v1631_v45 }
 0x139   : > { %v2231_v46 = vmul.f32 -1.442695, %v783_v60  ;;  %v1262_v41 = vsub.f32 1.0, %v1261_v2  ;;  %v2255_v61 = vmul.f32 -1.442695, %v843_v0  ;;  %v786_v1 = vadd.f32 %v3050_v29, %v653_v38  ;;  %v3257_v52 = vpop.f32.mrf.mxu3 }
 0x13a   : > { %v1609_v16 = vadd.f32 %v2436_v13, %v1608_v4  ;;  %vm1266_vm4 = vweird.f32 %v2438_v54  ;;  %v1622_v20 = vsub.f32 1.0, %v1621_v47  ;;  %vm1626_vm6 = vweird.f32 %v2440_v17 }
 0x13b   : > { %v2442_v40 = vpop.eup %2441  ;;  %2445 = vpow2.f32 %v2231_v46  ;;  %v1263_v56 = vmul.f32 %v2438_v54, %v1262_v41  ;;  %v846_v26 = vadd.f32 %v3122_v55, %v713_v8  ;;  %v2232_v62 = vmul.f32 -1.442695, %v786_v1  ;;  %vm1267_vm7 = vmor %vm1265_vm13, %vm1266_vm4 }
 0x13c   : > { %v2444_v25 = vpop.eup %2443  ;;  %v1613_v28 = vsel %vm1612_vm3, %v2436_v13, %v1609_v16  ;;  %v1276_v7 = vmul.f32 %v2442_v40, %v3189_v5  ;;  %v1623_v63 = vmul.f32 %v2440_v17, %v1622_v20  ;;  %2447 = vpow2.f32 %v2255_v61  ;;  %vm1627_vm8 = vmor %vm1625_vm15, %vm1626_vm6 }
 0x13d   : > { %v1618_v29 = vsel %vm3201_vm12, %v1617_v49, %v1613_v28  ;;  %v3239_v14 = vadd.f32 1.0, %v2444_v25  ;;  %v1264_v43 = vadd.f32 %v2438_v54, %v1263_v56  ;;  %v1284_v55 = vand.u32 2147483647, %v3189_v5 }
 0x13e   : > { %v1836_v51 = vpack.c.bf16 %v1618_v29, %v1618_v29  ;;  %v1277_v6 = vsub.f32 1.0, %v1276_v7  ;;  %v1624_v30 = vadd.f32 %v2440_v17, %v1623_v63  ;;  %v1286_v23 = vand.u32 2147483648, %v3189_v5 }
 0x13f   : > { %2449 = vrcp.f32 %v3239_v14  ;;  %v1268_v12 = vsel %vm1267_vm7, %v2438_v54, %v1264_v43  ;;  %vm1281_vm0 = vweird.f32 %v2442_v40  ;;  %v2256_v44 = vmul.f32 -1.442695, %v846_v26 }
 0x140   : > { %v3247_v32 = vpop.f32.mrf.mxu2  ;;  %1886 = vst.msk [vmem:[%s2761_s15 + $0x90] sm:$0xf] %vm1849_vm5, %v1836_v51  ;;  %v1278_v13 = vmul.f32 %v2442_v40, %v1277_v6  ;;  %2451 = vpow2.f32 %v2232_v62  ;;  %v1273_v37 = vsel %vm3218_vm1, %v1272_v27, %v1268_v12  ;;  %v1628_v19 = vsel %vm1627_vm8, %v2440_v17, %v1624_v30  ;;  %v657_v17 = vpop.f32.mrf.mxu0 }
 0x141   : > { %v2446_v39 = vpop.eup %2445  ;;  %v655_v50 = vadd.f32 %v3077_v59, %v654_v10  ;;  %v1813_v42 = vpack.c.bf16 %v1273_v37, %v1273_v37  ;;  %v1633_v53 = vsel %vm3225_vm2, %v1632_v36, %v1628_v19  ;;  %vm1280_vm9 = vweird.f32 %v3189_v5  ;;  %v3280_v36 = vpop.f32.mrf.mxu1 }
 0x142   : > { %v1279_v9 = vadd.f32 %v2442_v40, %v1278_v13  ;;  %v2448_v45 = vpop.eup %2447  ;;  %v1837_v57 = vpack.c.bf16 %v1633_v53, %v1633_v53  ;;  %vm1282_vm10 = vmor %vm1280_vm9, %vm1281_vm0  ;;  %v1287_v49 = vor.u32 1.1754944e-38, %v1286_v23  ;;  %v3262_v54 = vadd.f32 1.0, %v2446_v39  ;;  %v3308_v29 = vpop.f32.mrf.mxu3 }
 0x143   : > { %2453 = vpow2.f32 %v2256_v44  ;;  %1863 = vst.msk [vmem:[%s2761_s15 + $0x34] sm:$0xf] %vm1849_vm5, %v1813_v42  ;;  %vm1285_vm11 = vcmp.eq.f32.partialorder %v1284_v55, 8.507059e+37  ;;  %v1644_v0 = vand.u32 2147483647, %v3239_v14  ;;  %v3267_v38 = vadd.f32 1.0, %v2448_v45 }
 0x144   : > { %v1283_v60 = vsel %vm1282_vm10, %v2442_v40, %v1279_v9  ;;  %1887 = vst.msk [vmem:[%s2761_s15 + $0x94] sm:$0xf] %vm1849_vm5, %v1837_v57  ;;  %2455 = vrcp.f32 %v3262_v54  ;;  %v788_v2 = vadd.f32 %v3097_v11, %v655_v50  ;;  %v715_v34 = vadd.f32 %v3077_v59, %v3208_v31 }
 0x145   : > { %v2450_v4 = vpop.eup %2449  ;;  %v1288_v5 = vsel %vm1285_vm11, %v1287_v49, %v1283_v60  ;;  %v3277_v8 = vadd.f32 %v3077_v59, %v2713_v3  ;;  %v3284_v46 = vadd.f32 %v3077_v59, %v2725_v18  ;;  %vm1640_vm12 = vweird.f32 %v3239_v14 }
 0x146   : > { %v2452_v27 = vpop.eup %2451  ;;  %v1814_v47 = vpack.c.bf16 %v1288_v5, %v1288_v5  ;;  %v1636_v48 = vmul.f32 %v2450_v4, %v3239_v14  ;;  %v1646_v11 = vand.u32 2147483648, %v3239_v14  ;;  %2457 = vrcp.f32 %v3267_v38 }
 0x147   : > { %v1299_v3 = vand.u32 2147483647, %v3262_v54  ;;  %v3292_v16 = vadd.f32 1.0, %v2452_v27  ;;  %v658_v41 = vadd.f32 %v3077_v59, %v657_v17  ;;  %vm3295_vm13 = vcmp.eq.f32.partialorder %v1644_v0, 8.507059e+37 }
 0x148   : > { %1864 = vst.msk [vmem:[%s2761_s15 + $0x38] sm:$0xf] %vm1849_vm5, %v1814_v47  ;;  %v1637_v31 = vsub.f32 1.0, %v1636_v48  ;;  %v1301_v18 = vand.u32 2147483648, %v3262_v54  ;;  %v2233_v10 = vmul.f32 -1.442695, %v788_v2  ;;  %v848_v40 = vadd.f32 %v3162_v24, %v715_v34  ;;  %v3301_v20 = vpop.f32.mrf.mxu2  ;;  %v659_v37 = vpop.f32.mrf.mxu0 }
 0x149   : > { %v2454_v61 = vpop.eup %2453  ;;  %vm1641_vm14 = vweird.f32 %v2450_v4  ;;  %v1659_v28 = vand.u32 2147483647, %v3267_v38  ;;  %2459 = vrcp.f32 %v3292_v16  ;;  %v1647_v7 = vor.u32 1.1754944e-38, %v1646_v11  ;;  %v3331_v45 = vpop.f32.mrf.mxu1 }
 0x14a   : > { %v1638_v25 = vmul.f32 %v2450_v4, %v1637_v31  ;;  %v2456_v56 = vpop.eup %2455  ;;  %vm1295_vm15 = vweird.f32 %v3262_v54  ;;  %v3306_v26 = vadd.f32 1.0, %v2454_v61  ;;  %2461 = vpow2.f32 %v2233_v10  ;;  %vm1642_vm2 = vmor %vm1640_vm12, %vm1641_vm14 }
 0x14b   : > { %v1291_v24 = vmul.f32 %v2456_v56, %v3262_v54  ;;  %vm3311_vm1 = vcmp.eq.f32.partialorder %v1299_v3, 8.507059e+37  ;;  %v2257_v43 = vmul.f32 -1.442695, %v848_v40  ;;  %v791_v6 = vadd.f32 %v3145_v22, %v658_v41 }
 0x14c   : > { %v1639_v63 = vadd.f32 %v2450_v4, %v1638_v25  ;;  %v2458_v62 = vpop.eup %2457  ;;  %v1302_v30 = vor.u32 1.1754944e-38, %v1301_v18  ;;  %vm1655_vm3 = vweird.f32 %v3267_v38  ;;  %v1661_v55 = vand.u32 2147483648, %v3267_v38  ;;  %v3358_v18 = vpop.f32.mrf.mxu3 }
 0x14d   : > { %2463 = vrcp.f32 %v3306_v26  ;;  %v1292_v12 = vsub.f32 1.0, %v1291_v24  ;;  %v1651_v13 = vmul.f32 %v2458_v62, %v3267_v38  ;;  %vm3323_vm4 = vcmp.eq.f32.partialorder %v1659_v28, 8.507059e+37 }
 0x14e   : > { %v1643_v23 = vsel %vm1642_vm2, %v2450_v4, %v1639_v63  ;;  %v1314_v22 = vand.u32 2147483647, %v3292_v16  ;;  %vm1296_vm6 = vweird.f32 %v2456_v56  ;;  %v1316_v19 = vand.u32 2147483648, %v3292_v16 }
 0x14f   : > { %v1648_v14 = vsel %vm3295_vm13, %v1647_v7, %v1643_v23  ;;  %2465 = vpow2.f32 %v2257_v43  ;;  %v2460_v44 = vpop.eup %2459  ;;  %v1293_v42 = vmul.f32 %v2456_v56, %v1292_v12  ;;  %v1652_v53 = vsub.f32 1.0, %v1651_v13  ;;  %vm1297_vm0 = vmor %vm1295_vm15, %vm1296_vm6 }
 0x150   : > { %v1838_v50 = vpack.c.bf16 %v1648_v14, %v1648_v14  ;;  %v2234_v9 = vmul.f32 -1.442695, %v791_v6  ;;  %v2462_v57 = vpop.eup %2461  ;;  %vm1656_vm7 = vweird.f32 %v2458_v62  ;;  %v1662_v49 = vor.u32 1.1754944e-38, %v1661_v55  ;;  %v3347_v48 = vpop.f32.mrf.mxu2 }
 0x151   : > { %v1306_v60 = vmul.f32 %v2460_v44, %v3292_v16  ;;  %vm1310_vm8 = vweird.f32 %v3292_v16  ;;  %v1294_v0 = vadd.f32 %v2456_v56, %v1293_v42  ;;  %v1653_v17 = vmul.f32 %v2458_v62, %v1652_v53  ;;  %vm1657_vm10 = vmor %vm1655_vm3, %vm1656_vm7  ;;  %v662_v6 = vpop.f32.mrf.mxu0 }
 0x152   : > { %1888 = vst.msk [vmem:[%s2761_s15 + $0x98] sm:$0xf] %vm1849_vm5, %v1838_v50  ;;  %v3337_v4 = vadd.f32 1.0, %v2462_v57  ;;  %2467 = vpow2.f32 %v2234_v9  ;;  %vm3342_vm9 = vcmp.eq.f32.partialorder %v1314_v22, 8.507059e+37  ;;  %v1317_v27 = vor.u32 1.1754944e-38, %v1316_v19 }
 0x153   : > { %v2464_v5 = vpop.eup %2463  ;;  %v1307_v2 = vsub.f32 1.0, %v1306_v60  ;;  %v1674_v47 = vand.u32 2147483647, %v3306_v26  ;;  %v1298_v11 = vsel %vm1297_vm0, %v2456_v56, %v1294_v0  ;;  %v1654_v31 = vadd.f32 %v2458_v62, %v1653_v17 }
 0x154   : > { %v1666_v3 = vmul.f32 %v2464_v5, %v3306_v26  ;;  %v718_v41 = vadd.f32 %v3077_v59, %v3247_v32  ;;  %v1303_v54 = vsel %vm3311_vm1, %v1302_v30, %v1298_v11  ;;  %vm1311_vm11 = vweird.f32 %v2460_v44 }
 0x155   : > { %v2466_v61 = vpop.eup %2465  ;;  %v1308_v1 = vmul.f32 %v2460_v44, %v1307_v2  ;;  %2469 = vrcp.f32 %v3337_v4  ;;  %v1815_v10 = vpack.c.bf16 %v1303_v54, %v1303_v54  ;;  %v1658_v40 = vsel %vm1657_vm10, %v2458_v62, %v1654_v31  ;;  %vm1312_vm12 = vmor %vm1310_vm8, %vm1311_vm11 }
 0x156   : > { %v1667_v25 = vsub.f32 1.0, %v1666_v3  ;;  %v1676_v32 = vand.u32 2147483648, %v3306_v26  ;;  %v1663_v28 = vsel %vm3323_vm4, %v1662_v49, %v1658_v40  ;;  %v3363_v7 = vadd.f32 1.0, %v2466_v61 }
 0x157   : > { %v1309_v56 = vadd.f32 %v2460_v44, %v1308_v1  ;;  %v660_v38 = vadd.f32 %v3077_v59, %v659_v37  ;;  %1865 = vst.msk [vmem:[%s2761_s15 + $0x3c] sm:$0xf] %vm1849_vm5, %v1815_v10  ;;  %v1839_v24 = vpack.c.bf16 %v1663_v28, %v1663_v28  ;;  %vm1671_vm13 = vweird.f32 %v2464_v5 }
 0x158   : > { %v2468_v63 = vpop.eup %2467  ;;  %v1668_v51 = vmul.f32 %v2464_v5, %v1667_v25  ;;  %v851_v43 = vadd.f32 %v3215_v15, %v718_v41  ;;  %vm1670_vm14 = vweird.f32 %v3306_v26  ;;  %v1329_v30 = vand.u32 2147483647, %v3337_v4  ;;  %v3380_v15 = vpop.f32.mrf.mxu1 }
 0x159   : > { %v1313_v62 = vsel %vm1312_vm12, %v2460_v44, %v1309_v56  ;;  %2471 = vrcp.f32 %v3363_v7  ;;  %1889 = vst.msk [vmem:[%s2761_s15 + $0x9c] sm:$0xf] %vm1849_vm5, %v1839_v24  ;;  %v1677_v23 = vor.u32 1.1754944e-38, %v1676_v32  ;;  %v720_v12 = vadd.f32 %v3077_v59, %v3301_v20  ;;  %vm1672_vm15 = vmor %vm1670_vm14, %vm1671_vm13  ;;  %v724_v42 = vpop.f32.mrf.mxu2  ;;  %v664_v61 = vpop.f32.mrf.mxu0 }
 0x15a   : > { %v1318_v55 = vsel %vm3342_vm9, %v1317_v27, %v1313_v62  ;;  %v1669_v16 = vadd.f32 %v2464_v5, %v1668_v51  ;;  %v3383_v26 = vadd.f32 1.0, %v2468_v63  ;;  %v2258_v22 = vmul.f32 -1.442695, %v851_v43 }
 0x15b   : > { %v2470_v13 = vpop.eup %2469  ;;  %v1816_v39 = vpack.c.bf16 %v1318_v55, %v1318_v55  ;;  %v793_v37 = vadd.f32 %v3185_v35, %v660_v38  ;;  %vm1675_vm1 = vcmp.eq.f32.partialorder %v1674_v47, 8.507059e+37  ;;  %v1331_v44 = vand.u32 2147483648, %v3337_v4 }
 0x15c   : > { %v1673_v14 = vsel %vm1672_vm15, %v2464_v5, %v1669_v16  ;;  %v1321_v19 = vmul.f32 %v2470_v13, %v3337_v4  ;;  %vm1325_vm2 = vweird.f32 %v3337_v4  ;;  %vm3391_vm3 = vcmp.eq.f32.partialorder %v1329_v30, 8.507059e+37  ;;  %v3400_v5 = vpop.f32.mrf.mxu3 }
 0x15d   : > { %1866 = vst.msk [vmem:[%s2761_s15 + $0x40] sm:$0xf] %vm1849_vm5, %v1816_v39  ;;  %v1678_v20 = vsel %vm1675_vm1, %v1677_v23, %v1673_v14  ;;  %2473 = vrcp.f32 %v3383_v26  ;;  %v1689_v9 = vand.u32 2147483647, %v3363_v7  ;;  %v1691_v57 = vand.u32 2147483648, %v3363_v7 }
 0x15e   : > { %v1840_v35 = vpack.c.bf16 %v1678_v20, %v1678_v20  ;;  %v1322_v53 = vsub.f32 1.0, %v1321_v19  ;;  %2475 = vpow2.f32 %v2258_v22  ;;  %v2235_v60 = vmul.f32 -1.442695, %v793_v37 }
 0x15f   : > { %v2472_v49 = vpop.eup %2471  ;;  %v853_v0 = vadd.f32 %v3257_v52, %v720_v12  ;;  %v663_v17 = vadd.f32 %v3077_v59, %v662_v6  ;;  %vm1326_vm4 = vweird.f32 %v2470_v13  ;;  %v1332_v34 = vor.u32 1.1754944e-38, %v1331_v44 }
 0x160   : > { %1890 = vst.msk [vmem:[%s2761_s15 + $0xa0] sm:$0xf] %vm1849_vm5, %v1840_v35  ;;  %v1323_v2 = vmul.f32 %v2470_v13, %v1322_v53  ;;  %v1681_v27 = vmul.f32 %v2472_v49, %v3363_v7  ;;  %vm1685_vm6 = vweird.f32 %v3363_v7  ;;  %2477 = vpow2.f32 %v2235_v60  ;;  %vm1327_vm8 = vmor %vm1325_vm2, %vm1326_vm4  ;;  %v805_v32 = vpop.f32.mrf.mxu1 }
 0x161   : > { %v2259_v47 = vmul.f32 -1.442695, %v853_v0  ;;  %v796_v11 = vadd.f32 %v3235_v21, %v663_v17  ;;  %vm3407_vm7 = vcmp.eq.f32.partialorder %v1689_v9, 8.507059e+37  ;;  %v723_v41 = vadd.f32 %v3077_v59, %v3347_v48  ;;  %v3428_v16 = vpop.f32.mrf.mxu2 }
 0x162   : > { %v1324_v31 = vadd.f32 %v2470_v13, %v1323_v2  ;;  %v1682_v3 = vsub.f32 1.0, %v1681_v27  ;;  %v1692_v1 = vor.u32 1.1754944e-38, %v1691_v57  ;;  %vm1340_vm0 = vweird.f32 %v3383_v26 }
 0x163   : > { %v2474_v54 = vpop.eup %2473  ;;  %2479 = vpow2.f32 %v2259_v47  ;;  %v2236_v10 = vmul.f32 -1.442695, %v796_v11  ;;  %vm1686_vm9 = vweird.f32 %v2472_v49  ;;  %v856_v4 = vadd.f32 %v3308_v29, %v723_v41 }
 0x164   : > { %v1328_v21 = vsel %vm1327_vm8, %v2470_v13, %v1324_v31  ;;  %v1683_v40 = vmul.f32 %v2472_v49, %v1682_v3  ;;  %v1336_v25 = vmul.f32 %v2474_v54, %v3383_v26  ;;  %v2476_v28 = vpop.eup %2475  ;;  %v665_v56 = vadd.f32 %v3077_v59, %v664_v61  ;;  %vm1687_vm10 = vmor %vm1685_vm6, %vm1686_vm9  ;;  %v3439_v22 = vpop.f32.mrf.mxu3 }
 0x165   : > { %v1333_v48 = vsel %vm3391_vm3, %v1332_v34, %v1328_v21  ;;  %2481 = vpow2.f32 %v2236_v10  ;;  %v3421_v51 = vadd.f32 1.0, %v2476_v28  ;;  %v1344_v6 = vand.u32 2147483647, %v3383_v26 }
 0x166   : > { %v1817_v38 = vpack.c.bf16 %v1333_v48, %v1333_v48  ;;  %v1684_v63 = vadd.f32 %v2472_v49, %v1683_v40  ;;  %v1337_v24 = vsub.f32 1.0, %v1336_v25  ;;  %v2478_v43 = vpop.eup %2477  ;;  %v1346_v62 = vand.u32 2147483648, %v3383_v26 }
 0x167   : > { %v2260_v30 = vmul.f32 -1.442695, %v856_v4  ;;  %v806_v55 = vadd.f32 %v805_v32, %v3277_v8  ;;  %vm1341_vm11 = vweird.f32 %v2474_v54  ;;  %2483 = vrcp.f32 %v3421_v51 }
 0x168   : > { %1867 = vst.msk [vmem:[%s2761_s15 + $0x44] sm:$0xf] %vm1849_vm5, %v1817_v38  ;;  %v1688_v29 = vsel %vm1687_vm10, %v2472_v49, %v1684_v63  ;;  %v1338_v23 = vmul.f32 %v2474_v54, %v1337_v24  ;;  %v3435_v13 = vadd.f32 1.0, %v2478_v43  ;;  %v798_v39 = vadd.f32 %v3280_v36, %v665_v56  ;;  %vm1342_vm12 = vmor %vm1340_vm0, %vm1341_vm11  ;;  %v667_v43 = vpop.f32.mrf.mxu0 }
 0x169   : > { %v2480_v12 = vpop.eup %2479  ;;  %v1693_v7 = vsel %vm3407_vm7, %v1692_v1, %v1688_v29  ;;  %v725_v8 = vadd.f32 %v3077_v59, %v724_v42  ;;  %2485 = vpow2.f32 %v2260_v30  ;;  %v1347_v20 = vor.u32 1.1754944e-38, %v1346_v62  ;;  %v3476_v31 = vpop.f32.mrf.mxu2 }
 0x16a   : > { %v1841_v37 = vpack.c.bf16 %v1693_v7, %v1693_v7  ;;  %v1339_v14 = vadd.f32 %v2474_v54, %v1338_v23  ;;  %v3441_v19 = vadd.f32 1.0, %v2480_v12  ;;  %v1704_v50 = vand.u32 2147483647, %v3421_v51 }
 0x16b   : > { %v2482_v44 = vpop.eup %2481  ;;  %v1706_v35 = vand.u32 2147483648, %v3421_v51  ;;  %2487 = vrcp.f32 %v3435_v13  ;;  %v3450_v36 = vadd.f32 %v3077_v59, %v2737_v33  ;;  %vm1345_vm13 = vcmp.eq.f32.partialorder %v1344_v6, 8.507059e+37  ;;  %v807_v6 = vpop.f32.mrf.mxu1 }
 0x16c   : > { %1891 = vst.msk [vmem:[%s2761_s15 + $0xa4] sm:$0xf] %vm1849_vm5, %v1841_v37  ;;  %v1343_v42 = vsel %vm1342_vm12, %v2474_v54, %v1339_v14  ;;  %2489 = vrcp.f32 %v3441_v19  ;;  %v3457_v26 = vadd.f32 %v3077_v59, %v2755_v58  ;;  %v2237_v9 = vmul.f32 -1.442695, %v798_v39  ;;  %v3481_v61 = vpop.f32.mrf.mxu3 }
 0x16d   : > { %v1348_v53 = vsel %vm1345_vm13, %v1347_v20, %v1343_v42  ;;  %v2240_v57 = vmul.f32 -1.442695, %v806_v55  ;;  %v2484_v49 = vpop.eup %2483  ;;  %v1359_v0 = vand.u32 2147483647, %v3435_v13  ;;  %v3460_v33 = vadd.f32 1.0, %v2482_v44 }
 0x16e   : > { %v1818_v60 = vpack.c.bf16 %v1348_v53, %v1348_v53  ;;  %v858_v17 = vadd.f32 %v3358_v18, %v725_v8  ;;  %v1696_v2 = vmul.f32 %v2484_v49, %v3421_v51  ;;  %vm1700_vm14 = vweird.f32 %v3421_v51 }
 0x16f   : > { %vm3465_vm15 = vcmp.eq.f32.partialorder %v1704_v50, 8.507059e+37  ;;  %v1707_v58 = vor.u32 1.1754944e-38, %v1706_v35  ;;  %v2486_v27 = vpop.eup %2485  ;;  %vm1355_vm1 = vweird.f32 %v3435_v13  ;;  %v1361_v47 = vand.u32 2147483648, %v3435_v13 }
 0x170   : > { %1868 = vst.msk [vmem:[%s2761_s15 + $0x48] sm:$0xf] %vm1849_vm5, %v1818_v60  ;;  %v1719_v11 = vand.u32 2147483647, %v3441_v19  ;;  %v1721_v18 = vand.u32 2147483648, %v3441_v19  ;;  %2491 = vrcp.f32 %v3460_v33  ;;  %v1697_v52 = vsub.f32 1.0, %v1696_v2 }
 0x171   : > { %v2488_v3 = vpop.eup %2487  ;;  %vm1715_vm2 = vweird.f32 %v3441_v19  ;;  %v3479_v41 = vadd.f32 1.0, %v2486_v27  ;;  %2493 = vpow2.f32 %v2237_v9  ;;  %vm1701_vm3 = vweird.f32 %v2484_v49 }
 0x172   : > { %v2490_v54 = vpop.eup %2489  ;;  %v1351_v1 = vmul.f32 %v2488_v3, %v3435_v13  ;;  %vm3484_vm4 = vcmp.eq.f32.partialorder %v1359_v0, 8.507059e+37  ;;  %v1376_v21 = vand.u32 2147483648, %v3460_v33  ;;  %v2261_v40 = vmul.f32 -1.442695, %v858_v17  ;;  %vm1702_vm8 = vmor %vm1700_vm14, %vm1701_vm3 }
 0x173   : > { %v1698_v25 = vmul.f32 %v2484_v49, %v1697_v52  ;;  %v1711_v32 = vmul.f32 %v2490_v54, %v3441_v19  ;;  %v1374_v28 = vand.u32 2147483647, %v3460_v33  ;;  %2495 = vrcp.f32 %v3479_v41 }
 0x174   : > { %v1352_v48 = vsub.f32 1.0, %v1351_v1  ;;  %v1362_v4 = vor.u32 1.1754944e-38, %v1361_v47  ;;  %vm3492_vm6 = vcmp.eq.f32.partialorder %v1719_v11, 8.507059e+37  ;;  %v1722_v38 = vor.u32 1.1754944e-38, %v1721_v18  ;;  %v867_v53 = vpop.f32.mrf.mxu3 }
 0x175   : > { %v1699_v63 = vadd.f32 %v2484_v49, %v1698_v25  ;;  %v1712_v24 = vsub.f32 1.0, %v1711_v32  ;;  %vm1370_vm7 = vweird.f32 %v3460_v33  ;;  %2497 = vpow2.f32 %v2240_v57 }
 0x176   : > { %v2492_v62 = vpop.eup %2491  ;;  %v1353_v30 = vmul.f32 %v2488_v3, %v1352_v48  ;;  %vm1356_vm0 = vweird.f32 %v2488_v3  ;;  %v1377_v55 = vor.u32 1.1754944e-38, %v1376_v21  ;;  %2499 = vpow2.f32 %v2261_v40  ;;  %v810_v40 = vpop.f32.mrf.mxu1 }
 0x177   : > { %v2494_v29 = vpop.eup %2493  ;;  %v1703_v23 = vsel %vm1702_vm8, %v2484_v49, %v1699_v63  ;;  %v1713_v12 = vmul.f32 %v2490_v54, %v1712_v24  ;;  %vm1716_vm9 = vweird.f32 %v2490_v54  ;;  %v1366_v7 = vmul.f32 %v2492_v62, %v3460_v33  ;;  %vm1357_vm12 = vmor %vm1355_vm1, %vm1356_vm0  ;;  %v3521_v49 = vpop.f32.mrf.mxu2 }
 0x178   : > { %vm3501_vm10 = vcmp.eq.f32.partialorder %v1374_v28, 8.507059e+37  ;;  %v1708_v8 = vsel %vm3465_vm15, %v1707_v58, %v1703_v23  ;;  %v1354_v37 = vadd.f32 %v2488_v3, %v1353_v30  ;;  %vm1730_vm11 = vweird.f32 %v3479_v41  ;;  %vm1717_vm13 = vmor %vm1715_vm2, %vm1716_vm9  ;;  %v3567_v23 = vld [vmem:[#allocation2] ss:$0 sm:$0xff] }
 0x179   : > { %v3508_v51 = vadd.f32 1.0, %v2494_v29  ;;  %v668_v14 = vadd.f32 %v3077_v59, %v667_v43  ;;  %v2496_v44 = vpop.eup %2495  ;;  %v1842_v20 = vpack.c.bf16 %v1708_v8, %v1708_v8  ;;  %v1714_v50 = vadd.f32 %v2490_v54, %v1713_v12 }
 0x17a   : > { %v1367_v35 = vsub.f32 1.0, %v1366_v7  ;;  %v1734_v42 = vand.u32 2147483647, %v3479_v41  ;;  %v1358_v9 = vsel %vm1357_vm12, %v2488_v3, %v1354_v37  ;;  %v1726_v57 = vmul.f32 %v2496_v44, %v3479_v41 }
 0x17b   : > { %v1736_v59 = vand.u32 2147483648, %v3479_v41  ;;  %2501 = vrcp.f32 %v3508_v51  ;;  %v2498_v13 = vpop.eup %2497  ;;  %1892 = vst.msk [vmem:[%s2761_s15 + $0xa8] sm:$0xf] %vm1849_vm5, %v1842_v20  ;;  %v1363_v60 = vsel %vm3484_vm4, %v1362_v4, %v1358_v9  ;;  %v1718_v0 = vsel %vm1717_vm13, %v2490_v54, %v1714_v50 }
 0x17c   : > { %v1368_v17 = vmul.f32 %v2492_v62, %v1367_v35  ;;  %vm1371_vm14 = vweird.f32 %v2492_v62  ;;  %v2500_v19 = vpop.eup %2499  ;;  %v1819_v2 = vpack.c.bf16 %v1363_v60, %v1363_v60  ;;  %v1723_v34 = vsel %vm3492_vm6, %v1722_v38, %v1718_v0 }
 0x17d   : > { %v1727_v58 = vsub.f32 1.0, %v1726_v57  ;;  %v801_v27 = vadd.f32 %v3331_v45, %v668_v14  ;;  %v1843_v47 = vpack.c.bf16 %v1723_v34, %v1723_v34  ;;  %vm1731_vm15 = vweird.f32 %v2496_v44  ;;  %vm1372_vm1 = vmor %vm1370_vm7, %vm1371_vm14 }
 0x17e   : > { %v1369_v11 = vadd.f32 %v2492_v62, %v1368_v17  ;;  %v3530_v18 = vadd.f32 1.0, %v2498_v13  ;;  %1869 = vst.msk [vmem:[%s2761_s15 + $0x4c] sm:$0xf] %vm1849_vm5, %v1819_v2  ;;  %v1389_v52 = vand.u32 2147483647, %v3508_v51  ;;  %v1391_v54 = vand.u32 2147483648, %v3508_v51  ;;  %vm1732_vm3 = vmor %vm1730_vm11, %vm1731_vm15 }
 0x17f   : > { %v1728_v3 = vmul.f32 %v2496_v44, %v1727_v58  ;;  %v3538_v1 = vadd.f32 1.0, %v2500_v19  ;;  %1893 = vst.msk [vmem:[%s2761_s15 + $0xac] sm:$0xf] %vm1849_vm5, %v1843_v47  ;;  %vm3542_vm2 = vcmp.eq.f32.partialorder %v1734_v42, 8.507059e+37  ;;  %v1737_v21 = vor.u32 1.1754944e-38, %v1736_v59 }
 0x180   : > { %v1373_v45 = vsel %vm1372_vm1, %v2492_v62, %v1369_v11  ;;  %2503 = vrcp.f32 %v3530_v18  ;;  %v2238_v28 = vmul.f32 -1.442695, %v801_v27  ;;  %v808_v48 = vadd.f32 %v807_v6, %v3284_v46  ;;  %v669_v46 = vpop.f32.mrf.mxu0  ;;  %v734_v6 = vpop.f32.mrf.mxu2 }
 0x181   : > { %v2502_v33 = vpop.eup %2501  ;;  %v1378_v25 = vsel %vm3501_vm10, %v1377_v55, %v1373_v45  ;;  %v1729_v32 = vadd.f32 %v2496_v44, %v1728_v3  ;;  %vm1385_vm4 = vweird.f32 %v3508_v51  ;;  %2505 = vrcp.f32 %v3538_v1 }
 0x182   : > { %v1820_v4 = vpack.c.bf16 %v1378_v25, %v1378_v25  ;;  %v1381_v56 = vmul.f32 %v2502_v33, %v3508_v51  ;;  %vm3556_vm6 = vcmp.eq.f32.partialorder %v1389_v52, 8.507059e+37  ;;  %v1392_v24 = vor.u32 1.1754944e-38, %v1391_v54 }
 0x183   : > { %v1733_v38 = vsel %vm1732_vm3, %v2496_v44, %v1729_v32  ;;  %v1434_v43 = vand.u32 2147483647, %v3530_v18  ;;  %vm1386_vm7 = vweird.f32 %v2502_v33  ;;  %v1436_v30 = vand.u32 2147483648, %v3530_v18 }
 0x184   : > { %1870 = vst.msk [vmem:[%s2761_s15 + $0x50] sm:$0xf] %vm1849_vm5, %v1820_v4  ;;  %v1738_v41 = vsel %vm3542_vm2, %v1737_v21, %v1733_v38  ;;  %v1382_v62 = vsub.f32 1.0, %v1381_v56  ;;  %vm1430_vm8 = vweird.f32 %v3530_v18  ;;  %2507 = vpow2.f32 %v2238_v28  ;;  %vm1387_vm9 = vmor %vm1385_vm4, %vm1386_vm7 }
 0x185   : > { %v1844_v55 = vpack.c.bf16 %v1738_v41, %v1738_v41  ;;  %v2241_v29 = vmul.f32 -1.442695, %v808_v48  ;;  %v728_v12 = vadd.f32 %v3567_v23, %v3428_v16  ;;  %v1749_v8 = vand.u32 2147483647, %v3538_v1 }
 0x186   : > { %v2504_v7 = vpop.eup %2503  ;;  %v1383_v39 = vmul.f32 %v2502_v33, %v1382_v62  ;;  %v1751_v37 = vand.u32 2147483648, %v3538_v1  ;;  %v670_v14 = vadd.f32 %v3567_v23, %v669_v46  ;;  %v811_v42 = vadd.f32 %v810_v40, %v3450_v36 }
 0x187   : > { %1894 = vst.msk [vmem:[%s2761_s15 + $0xb0] sm:$0xf] %vm1849_vm5, %v1844_v55  ;;  %v1426_v44 = vmul.f32 %v2504_v7, %v3530_v18  ;;  %vm1431_vm0 = vweird.f32 %v2504_v7  ;;  %2509 = vpow2.f32 %v2241_v29  ;;  %v861_v20 = vadd.f32 %v3400_v5, %v728_v12  ;;  %v2506_v50 = vpop.eup %2505 }
 0x188   : > { %v1384_v35 = vadd.f32 %v2502_v33, %v1383_v39  ;;  %v803_v16 = vadd.f32 %v3380_v15, %v670_v14  ;;  %v730_v53 = vadd.f32 %v3567_v23, %v3476_v31  ;;  %v1741_v57 = vmul.f32 %v2506_v50, %v3538_v1  ;;  %v812_v15 = vpop.f32.mrf.mxu1  ;;  %vm1432_vm11 = vmor %vm1430_vm8, %vm1431_vm0 }
 0x189   : > { %v1427_v9 = vsub.f32 1.0, %v1426_v44  ;;  %vm1746_vm10 = vweird.f32 %v2506_v50  ;;  %v2262_v59 = vmul.f32 -1.442695, %v861_v20  ;;  %v2242_v60 = vmul.f32 -1.442695, %v811_v42 }
 0x18a   : > { %v1388_v13 = vsel %vm1387_vm9, %v2502_v33, %v1384_v35  ;;  %v2239_v5 = vmul.f32 -1.442695, %v803_v16  ;;  %v863_v0 = vadd.f32 %v3439_v22, %v730_v53  ;;  %v2508_v36 = vpop.eup %2507  ;;  %v1742_v19 = vsub.f32 1.0, %v1741_v57 }
 0x18b   : > { %v1393_v31 = vsel %vm3556_vm6, %v1392_v24, %v1388_v13  ;;  %v1428_v17 = vmul.f32 %v2504_v7, %v1427_v9  ;;  %2511 = vpow2.f32 %v2262_v59  ;;  %v3589_v2 = vadd.f32 1.0, %v2508_v36 }
 0x18c   : > { %v1821_v51 = vpack.c.bf16 %v1393_v31, %v1393_v31  ;;  %2513 = vpow2.f32 %v2239_v5  ;;  %v2263_v34 = vmul.f32 -1.442695, %v863_v0  ;;  %v1743_v47 = vmul.f32 %v2506_v50, %v1742_v19 }
 0x18d   : > { %v2510_v58 = vpop.eup %2509  ;;  %v1429_v27 = vadd.f32 %v2504_v7, %v1428_v17  ;;  %2515 = vpow2.f32 %v2242_v60  ;;  %v813_v22 = vadd.f32 %v812_v15, %v3457_v26  ;;  %vm1435_vm12 = vcmp.eq.f32.partialorder %v1434_v43, 8.507059e+37 }
 0x18e   : > { %1871 = vst.msk [vmem:[%s2761_s15 + $0x54] sm:$0xf] %vm1849_vm5, %v1821_v51  ;;  %v1437_v11 = vor.u32 1.1754944e-38, %v1436_v30  ;;  %2517 = vrcp.f32 %v3589_v2  ;;  %v1744_v52 = vadd.f32 %v2506_v50, %v1743_v47  ;;  %vm1745_vm13 = vweird.f32 %v3538_v1 }
 0x18f   : > { %v1433_v3 = vsel %vm1432_vm11, %v2504_v7, %v1429_v27  ;;  %v3599_v54 = vadd.f32 1.0, %v2510_v58  ;;  %vm1747_vm14 = vmor %vm1745_vm13, %vm1746_vm10  ;;  %v1752_v26 = vor.u32 1.1754944e-38, %v1751_v37  ;;  %2519 = vpow2.f32 %v2263_v34 }
 0x190   : > { %v1438_v45 = vsel %vm1435_vm12, %v1437_v11, %v1433_v3  ;;  %v2243_v10 = vmul.f32 -1.442695, %v813_v22  ;;  %v1748_v40 = vsel %vm1747_vm14, %v2506_v50, %v1744_v52  ;;  %vm1750_vm15 = vcmp.eq.f32.partialorder %v1749_v8, 8.507059e+37 }
 0x191   : > { %v2512_v21 = vpop.eup %2511  ;;  %v1824_v18 = vpack.c.bf16 %v1438_v45, %v1438_v45  ;;  %2521 = vrcp.f32 %v3599_v54  ;;  %v1753_v25 = vsel %vm1750_vm15, %v1752_v26, %v1748_v40  ;;  %v1404_v1 = vand.u32 2147483647, %v3589_v2 }
 0x192   : > { %v2514_v33 = vpop.eup %2513  ;;  %v1406_v32 = vand.u32 2147483648, %v3589_v2  ;;  %v3605_v28 = vadd.f32 1.0, %v2512_v21  ;;  %v1845_v4 = vpack.c.bf16 %v1753_v25, %v1753_v25  ;;  %2523 = vpow2.f32 %v2243_v10 }
 0x193   : > { %v2516_v48 = vpop.eup %2515  ;;  %1874 = vst.msk [vmem:[%s2761_s15 + $0x60] sm:$0xf] %vm1849_vm5, %v1824_v18  ;;  %v3609_v56 = vadd.f32 1.0, %v2514_v33  ;;  %v1449_v63 = vand.u32 2147483647, %v3599_v54  ;;  %v1451_v24 = vand.u32 2147483648, %v3599_v54  ;;  %vm1400_vm1 = vweird.f32 %v3589_v2 }
 0x194   : > { %v2518_v38 = vpop.eup %2517  ;;  %2525 = vrcp.f32 %v3605_v28  ;;  %1895 = vst.msk [vmem:[%s2761_s15 + $0xb4] sm:$0xf] %vm1849_vm5, %v1845_v4  ;;  %vm3618_vm2 = vcmp.eq.f32.partialorder %v1404_v1, 8.507059e+37  ;;  %v1407_v41 = vor.u32 1.1754944e-38, %v1406_v32  ;;  %vm1445_vm3 = vweird.f32 %v3599_v54 }
 0x195   : > { %v1396_v43 = vmul.f32 %v2518_v38, %v3589_v2  ;;  %v2520_v46 = vpop.eup %2519  ;;  %2527 = vrcp.f32 %v3609_v56  ;;  %v1764_v55 = vand.u32 2147483647, %v3605_v28  ;;  %v3625_v29 = vadd.f32 1.0, %v2516_v48 }
 0x196   : > { %v3629_v12 = vadd.f32 %v3567_v23, %v3521_v49  ;;  %vm3632_vm4 = vcmp.eq.f32.partialorder %v1449_v63, 8.507059e+37  ;;  %v1452_v8 = vor.u32 1.1754944e-38, %v1451_v24  ;;  %v1766_v37 = vand.u32 2147483648, %v3605_v28 }
 0x197   : > { %v2522_v62 = vpop.eup %2521  ;;  %v1397_v30 = vsub.f32 1.0, %v1396_v43  ;;  %vm1401_vm6 = vweird.f32 %v2518_v38  ;;  %vm1760_vm7 = vweird.f32 %v3605_v28  ;;  %2529 = vrcp.f32 %v3625_v29 }
 0x198   : > { %v1441_v7 = vmul.f32 %v2522_v62, %v3599_v54  ;;  %v2524_v14 = vpop.eup %2523  ;;  %v1419_v49 = vand.u32 2147483647, %v3609_v56  ;;  %v1421_v23 = vand.u32 2147483648, %v3609_v56  ;;  %v3641_v35 = vadd.f32 1.0, %v2520_v46  ;;  %vm1402_vm9 = vmor %vm1400_vm1, %vm1401_vm6 }
 0x199   : > { %v1398_v44 = vmul.f32 %v2518_v38, %v1397_v30  ;;  %vm3644_vm8 = vcmp.eq.f32.partialorder %v1764_v55, 8.507059e+37  ;;  %vm1415_vm0 = vweird.f32 %v3609_v56  ;;  %v3649_v9 = vadd.f32 1.0, %v2524_v14 }
 0x19a   : > { %v2526_v20 = vpop.eup %2525  ;;  %v1442_v50 = vsub.f32 1.0, %v1441_v7  ;;  %vm1446_vm10 = vweird.f32 %v2522_v62  ;;  %v1767_v13 = vor.u32 1.1754944e-38, %v1766_v37  ;;  %2531 = vrcp.f32 %v3641_v35 }
 0x19b   : > { %v1399_v16 = vadd.f32 %v2518_v38, %v1398_v44  ;;  %v1756_v42 = vmul.f32 %v2526_v20, %v3605_v28  ;;  %v2528_v57 = vpop.eup %2527  ;;  %v1464_v15 = vand.u32 2147483647, %v3625_v29  ;;  %vm1761_vm11 = vweird.f32 %v2526_v20  ;;  %vm1447_vm12 = vmor %vm1445_vm3, %vm1446_vm10 }
 0x19c   : > { %v1443_v59 = vmul.f32 %v2522_v62, %v1442_v50  ;;  %v1411_v0 = vmul.f32 %v2528_v57, %v3609_v56  ;;  %v1466_v17 = vand.u32 2147483648, %v3625_v29  ;;  %2533 = vrcp.f32 %v3649_v9  ;;  %vm1762_vm15 = vmor %vm1760_vm7, %vm1761_vm11 }
 0x19d   : > { %v1403_v5 = vsel %vm1402_vm9, %v2518_v38, %v1399_v16  ;;  %v1757_v60 = vsub.f32 1.0, %v1756_v42  ;;  %v2530_v19 = vpop.eup %2529  ;;  %vm3662_vm13 = vcmp.eq.f32.partialorder %v1419_v49, 8.507059e+37  ;;  %v1422_v47 = vor.u32 1.1754944e-38, %v1421_v23 }
 0x19e   : > { %v1408_v36 = vsel %vm3618_vm2, %v1407_v41, %v1403_v5  ;;  %v1444_v31 = vadd.f32 %v2522_v62, %v1443_v59  ;;  %v1412_v34 = vsub.f32 1.0, %v1411_v0  ;;  %v1456_v22 = vmul.f32 %v2530_v19, %v3625_v29 }
 0x19f   : > { %v1822_v51 = vpack.c.bf16 %v1408_v36, %v1408_v36  ;;  %v1758_v2 = vmul.f32 %v2526_v20, %v1757_v60  ;;  %vm1416_vm14 = vweird.f32 %v2528_v57  ;;  %vm1460_vm1 = vweird.f32 %v3625_v29 }
 0x1a0   : > { %v1448_v58 = vsel %vm1447_vm12, %v2522_v62, %v1444_v31  ;;  %v1413_v52 = vmul.f32 %v2528_v57, %v1412_v34  ;;  %v2532_v54 = vpop.eup %2531  ;;  %v1457_v26 = vsub.f32 1.0, %v1456_v22  ;;  %vm3675_vm2 = vcmp.eq.f32.partialorder %v1464_v15, 8.507059e+37  ;;  %vm1417_vm3 = vmor %vm1415_vm0, %vm1416_vm14 }
 0x1a1   : > { %1872 = vst.msk [vmem:[%s2761_s15 + $0x58] sm:$0xf] %vm1849_vm5, %v1822_v51  ;;  %v1453_v11 = vsel %vm3632_vm4, %v1452_v8, %v1448_v58  ;;  %v1759_v3 = vadd.f32 %v2526_v20, %v1758_v2  ;;  %v1467_v40 = vor.u32 1.1754944e-38, %v1466_v17  ;;  %v1771_v33 = vmul.f32 %v2532_v54, %v3641_v35 }
 0x1a2   : > { %v1825_v45 = vpack.c.bf16 %v1453_v11, %v1453_v11  ;;  %v1414_v18 = vadd.f32 %v2528_v57, %v1413_v52  ;;  %v1458_v1 = vmul.f32 %v2530_v19, %v1457_v26  ;;  %vm1461_vm4 = vweird.f32 %v2530_v19  ;;  %v2534_v28 = vpop.eup %2533 }
 0x1a3   : > { %v1763_v21 = vsel %vm1762_vm15, %v2526_v20, %v1759_v3  ;;  %v1781_v32 = vand.u32 2147483648, %v3641_v35  ;;  %v1772_v38 = vsub.f32 1.0, %v1771_v33  ;;  %v866_v63 = vadd.f32 %v3481_v61, %v3629_v12  ;;  %vm1462_vm6 = vmor %vm1460_vm1, %vm1461_vm4 }
 0x1a4   : > { %1875 = vst.msk [vmem:[%s2761_s15 + $0x64] sm:$0xf] %vm1849_vm5, %v1825_v45  ;;  %v1768_v25 = vsel %vm3644_vm8, %v1767_v13, %v1763_v21  ;;  %v1418_v4 = vsel %vm1417_vm3, %v2528_v57, %v1414_v18  ;;  %v1459_v43 = vadd.f32 %v2530_v19, %v1458_v1  ;;  %v1779_v46 = vand.u32 2147483647, %v3641_v35 }
 0x1a5   : > { %v1846_v48 = vpack.c.bf16 %v1768_v25, %v1768_v25  ;;  %v1423_v24 = vsel %vm3662_vm13, %v1422_v47, %v1418_v4  ;;  %v1471_v56 = vmul.f32 %v2534_v28, %v3649_v9  ;;  %v1773_v41 = vmul.f32 %v2532_v54, %v1772_v38 }
 0x1a6   : > { %v1823_v6 = vpack.c.bf16 %v1423_v24, %v1423_v24  ;;  %vm1776_vm7 = vweird.f32 %v2532_v54  ;;  %v2264_v62 = vmul.f32 -1.442695, %v866_v63  ;;  %v1463_v30 = vsel %vm1462_vm6, %v2530_v19, %v1459_v43 }
 0x1a7   : > { %1896 = vst.msk [vmem:[%s2761_s15 + $0xb8] sm:$0xf] %vm1849_vm5, %v1846_v48  ;;  %vm1775_vm8 = vweird.f32 %v3641_v35  ;;  %v1782_v61 = vor.u32 1.1754944e-38, %v1781_v32  ;;  %v1472_v55 = vsub.f32 1.0, %v1471_v56  ;;  %v1468_v12 = vsel %vm3675_vm2, %v1467_v40, %v1463_v30 }
 0x1a8   : > { %1873 = vst.msk [vmem:[%s2761_s15 + $0x5c] sm:$0xf] %vm1849_vm5, %v1823_v6  ;;  %v1774_v7 = vadd.f32 %v2532_v54, %v1773_v41  ;;  %v1481_v39 = vand.u32 2147483648, %v3649_v9  ;;  %2535 = vpow2.f32 %v2264_v62  ;;  %v1826_v29 = vpack.c.bf16 %v1468_v12, %v1468_v12  ;;  %vm1777_vm0 = vmor %vm1775_vm8, %vm1776_vm7 }
 0x1a9   : > { %v1473_v8 = vmul.f32 %v2534_v28, %v1472_v55  ;;  %vm1476_vm9 = vweird.f32 %v2534_v28  ;;  %v1479_v37 = vand.u32 2147483647, %v3649_v9  ;;  %vm1780_vm10 = vcmp.eq.f32.partialorder %v1779_v46, 8.507059e+37 }
 0x1aa   : > { %v1778_v14 = vsel %vm1777_vm0, %v2532_v54, %v1774_v7  ;;  %1876 = vst.msk [vmem:[%s2761_s15 + $0x68] sm:$0xf] %vm1849_vm5, %v1826_v29  ;;  %vm1475_vm11 = vweird.f32 %v3649_v9  ;;  %v1482_v49 = vor.u32 1.1754944e-38, %v1481_v39 }
 0x1ab   : > { %v1783_v44 = vsel %vm1780_vm10, %v1782_v61, %v1778_v14  ;;  %v1474_v20 = vadd.f32 %v2534_v28, %v1473_v8  ;;  %vm1477_vm12 = vmor %vm1475_vm11, %vm1476_vm9  ;;  %vm1480_vm13 = vcmp.eq.f32.partialorder %v1479_v37, 8.507059e+37 }
 0x1ac   : > { %v1847_v50 = vpack.c.bf16 %v1783_v44, %v1783_v44 }
 0x1ad   : > { %v1478_v23 = vsel %vm1477_vm12, %v2534_v28, %v1474_v20 }
 0x1ae   : > { %v2536_v35 = vpop.eup %2535  ;;  %1897 = vst.msk [vmem:[%s2761_s15 + $0xbc] sm:$0xf] %vm1849_vm5, %v1847_v50  ;;  %v1483_v16 = vsel %vm1480_vm13, %v1482_v49, %v1478_v23 }
 0x1af   : > { %v1827_v42 = vpack.c.bf16 %v1483_v16, %v1483_v16  ;;  %v1064_v53 = vadd.f32 1.0, %v2536_v35 }
 0x1b1   : > { %1877 = vst.msk [vmem:[%s2761_s15 + $0x6c] sm:$0xf] %vm1849_vm5, %v1827_v42  ;;  %2537 = vrcp.f32 %v1064_v53  ;;  %v1796_v5 = vand.u32 2147483648, %v1064_v53  ;;  %v1794_v60 = vand.u32 2147483647, %v1064_v53  ;;  %vm1790_vm15 = vweird.f32 %v1064_v53 }
 0x1b3   : > { %v1797_v15 = vor.u32 1.1754944e-38, %v1796_v5  ;;  %vm1795_vm2 = vcmp.eq.f32.partialorder %v1794_v60, 8.507059e+37 }
 0x1b7   : > { %v2538_v57 = vpop.eup %2537 }
 0x1b8   : > { %v1786_v59 = vmul.f32 %v2538_v57, %v1064_v53  ;;  %vm1791_vm14 = vweird.f32 %v2538_v57 }
 0x1b9   : > { %vm1792_vm1 = vmor %vm1790_vm15, %vm1791_vm14 }
 0x1ba   : > { %v1787_v13 = vsub.f32 1.0, %v1786_v59 }
 0x1bc   : > { %v1788_v9 = vmul.f32 %v2538_v57, %v1787_v13 }
 0x1be   : > { %v1789_v0 = vadd.f32 %v2538_v57, %v1788_v9 }
 0x1c0   : > { %v1793_v36 = vsel %vm1792_vm1, %v2538_v57, %v1789_v0 }
 0x1c1   : > { %v1798_v31 = vsel %vm1795_vm2, %v1797_v15, %v1793_v36 }
 0x1c2   : > { %v1848_v17 = vpack.c.bf16 %v1798_v31, %v1798_v31 }
 0x1c4   : > { %1898 = vst.msk [vmem:[%s2761_s15 + $0xc0] sm:$0xf] %vm1849_vm5, %v1848_v17 }
 0x1c5 PF: > { %s15_s14 = sadd.s32 1, %s2547_s14  }
 0x1c6   : > { %p12_p4 = scmp.ge.s32.totalorder %s15_s14, 6  }
 0x1c8   :  { %14 = sbr.rel (!%p12_p4) target bundleno = 3 (0x3), region = 62 }

</bundles_post_ra>
